<compile_context>
chip_gen: v7x
topology: tpu7x:2x2x1
jax: 0.10.0
libtpu: 0.0.40
codegen_flags: <defaults>
</compile_context>

<pallas_src>
import functools
import math

import numpy as np

import jax
import jax.numpy as jnp
from jax.experimental import pallas as pl
from jax.experimental.pallas import tpu as pltpu

F32 = jnp.float32
BF16 = jnp.bfloat16


# ----------------------------- in-kernel helpers ----------------------------

def _dot(a, b):
    """(M,K) @ (K,N); bf16 operands, f32 accumulation."""
    return jnp.dot(a.astype(BF16), b.astype(BF16),
                   preferred_element_type=F32)


def _dot_t(a, b):
    """(M,K) x (N,K) -> (M,N) contracting the last dim of both (no transpose)."""
    return jax.lax.dot_general(
        a.astype(BF16), b.astype(BF16),
        dimension_numbers=(((1,), (1,)), ((), ())),
        preferred_element_type=F32)


def _layernorm(h, g, b, eps):
    mu = jnp.mean(h, axis=-1, keepdims=True)
    c = h - mu
    var = jnp.mean(c * c, axis=-1, keepdims=True)
    return c * jax.lax.rsqrt(var + eps) * g + b


# ------------------------- banded conv (+ReLU) kernel ------------------------

def _banded_conv_kernel(x_ref, wb_ref, b_ref, o_ref, *, h_out, kh):
    # x_ref : (1, H_in, (W+2)*Cin)   padded, W/Cin flattened into lanes
    # wb_ref: (kh, (W+2)*Cin, W*Cout) banded weights (bf16)
    # b_ref : (1, W*Cout)
    acc = _dot(x_ref[0, 0:h_out, :], wb_ref[0])
    for ky in range(1, kh):
        acc = acc + _dot(x_ref[0, ky:ky + h_out, :], wb_ref[ky])
    o_ref[0] = jnp.maximum(acc + b_ref[...], 0.0)


def banded_conv_relu(x, wb, brep):
    B, h_in, k_in = x.shape
    kh, _, n = wb.shape
    h_out = h_in - 2
    return pl.pallas_call(
        functools.partial(_banded_conv_kernel, h_out=h_out, kh=kh),
        grid=(B,),
        in_specs=[pl.BlockSpec((1, h_in, k_in), lambda i: (i, 0, 0)),
                  pl.BlockSpec((kh, k_in, n), lambda i: (0, 0, 0)),
                  pl.BlockSpec((1, n), lambda i: (0, 0))],
        out_specs=pl.BlockSpec((1, h_out, n), lambda i: (i, 0, 0)),
        out_shape=jax.ShapeDtypeStruct((B, h_out, n), F32),
        compiler_params=pltpu.CompilerParams(dimension_semantics=("parallel",)),
    )(x, wb, brep)


# ----------------------- audio flatten + positional add ----------------------

def _flatten_pos_kernel(x_ref, w_ref, b_ref, pos_ref, o_ref):
    o_ref[0] = _dot(x_ref[0], w_ref[...]) + b_ref[...] + pos_ref[0]


def flatten_pos(x, w, b, pos):
    B, S, K = x.shape
    d = w.shape[1]
    return pl.pallas_call(
        _flatten_pos_kernel,
        grid=(B,),
        in_specs=[pl.BlockSpec((1, S, K), lambda i: (i, 0, 0)),
                  pl.BlockSpec((K, d), lambda i: (0, 0)),
                  pl.BlockSpec((1, d), lambda i: (0, 0)),
                  pl.BlockSpec((1, S, d), lambda i: (0, 0, 0))],
        out_specs=pl.BlockSpec((1, S, d), lambda i: (i, 0, 0)),
        out_shape=jax.ShapeDtypeStruct((B, S, d), F32),
        compiler_params=pltpu.CompilerParams(dimension_semantics=("parallel",)),
    )(x, w, b, pos)


# ---------------------- fused transformer encoder layer ----------------------

def _encoder_layer_kernel(x_ref, bias_ref, hmask_ref,
                          wqkv_ref, bqkv_ref, wo_ref, bo_ref,
                          w1_ref, b1_ref, w2_ref, b2_ref,
                          g1_ref, be1_ref, g2_ref, be2_ref,
                          o_ref, *, nhead, eps):
    x = x_ref[0]                               # (S, d) f32
    S, d = x.shape
    dh = d // nhead
    scale = 1.0 / math.sqrt(dh)
    bias = bias_ref[0]                         # (1, S) additive key-padding bias

    qkv = _dot(x, wqkv_ref[...]) + bqkv_ref[...]   # (S, 3d) f32
    q = qkv[:, :d]
    k = qkv[:, d:2 * d]
    v = qkv[:, 2 * d:]

    # Per-head attention with lane-dense (full-d) matmuls: head selection is a
    # band mask on the 128-lane feature axis, and head contexts land directly
    # in their own lane band (no slicing / concat / transpose).
    ctx = jnp.zeros((S, d), F32)
    for h in range(nhead):
        m = hmask_ref[h:h + 1, :]                        # (1, d) 0/1 band
        s = _dot_t(q * m, k) * scale + bias              # (S, S)
        s = s - jnp.max(s, axis=-1, keepdims=True)
        p = jnp.exp(s)
        p = p * pl.reciprocal(jnp.sum(p, axis=-1, keepdims=True), approx=True)
        ctx = ctx + _dot(p, v * m)                       # only head-h lanes nonzero

    attn = _dot(ctx, wo_ref[...]) + bo_ref[...]
    h1 = _layernorm(x + attn, g1_ref[...], be1_ref[...], eps)

    # NOTE: reference FFN has NO activation between linear1 and linear2.
    ff = _dot(h1, w1_ref[...]) + b1_ref[...]
    ff = _dot(ff, w2_ref[...]) + b2_ref[...]
    o_ref[0] = _layernorm(h1 + ff, g2_ref[...], be2_ref[...], eps)


def encoder_layer(x, bias, head_mask, lp, nhead):
    B, S, d = x.shape
    dff = lp["ff1_w"].shape[1]

    def full(shape):
        return pl.BlockSpec(shape, lambda i, _s=shape: (0,) * len(_s))

    return pl.pallas_call(
        functools.partial(_encoder_layer_kernel, nhead=nhead, eps=1e-5),
        grid=(B,),
        in_specs=[pl.BlockSpec((1, S, d), lambda i: (i, 0, 0)),
                  pl.BlockSpec((1, 1, S), lambda i: (i, 0, 0)),
                  full((nhead, d)),
                  full((d, 3 * d)), full((1, 3 * d)),
                  full((d, d)), full((1, d)),
                  full((d, dff)), full((1, dff)),
                  full((dff, d)), full((1, d)),
                  full((1, d)), full((1, d)), full((1, d)), full((1, d))],
        out_specs=pl.BlockSpec((1, S, d), lambda i: (i, 0, 0)),
        out_shape=jax.ShapeDtypeStruct((B, S, d), F32),
        compiler_params=pltpu.CompilerParams(dimension_semantics=("parallel",)),
    )(x, bias, head_mask,
      lp["in_w"], lp["in_b"], lp["out_w"], lp["out_b"],
      lp["ff1_w"], lp["ff1_b"], lp["ff2_w"], lp["ff2_b"],
      lp["ln1_g"], lp["ln1_b"], lp["ln2_g"], lp["ln2_b"])


# ------------------- fused tail: means + cues + fusion + cls ------------------

def _tail_kernel(a_ref, t_ref, c_ref, wc_ref, bc_ref, wf_ref, bf_ref,
                 wcls_ref, bcls_ref, o_ref):
    sa = a_ref.shape[1]
    st = t_ref.shape[1]
    a = jnp.sum(a_ref[0], axis=0, keepdims=True) * (1.0 / sa)   # (1, d)
    t = jnp.sum(t_ref[0], axis=0, keepdims=True) * (1.0 / st)   # (1, d)
    cue = _dot(c_ref[0], wc_ref[...]) + bc_ref[...]             # (1, d)
    fused = jnp.concatenate([a, t, cue], axis=-1)               # (1, 3d)
    fused = _dot(fused, wf_ref[...]) + bf_ref[...]              # (1, d)
    o_ref[0] = _dot(fused, wcls_ref[...]) + bcls_ref[...]       # (1, 4)


def fusion_head(a_seq, t_seq, cue, kp):
    B, Sa, d = a_seq.shape
    St = t_seq.shape[1]
    n_cls = kp["cls_b"].shape[1]
    n_cue = kp["cue_w"].shape[0]

    def full(shape):
        return pl.BlockSpec(shape, lambda i, _s=shape: (0,) * len(_s))

    out = pl.pallas_call(
        _tail_kernel,
        grid=(B,),
        in_specs=[pl.BlockSpec((1, Sa, d), lambda i: (i, 0, 0)),
                  pl.BlockSpec((1, St, d), lambda i: (i, 0, 0)),
                  pl.BlockSpec((1, 1, n_cue), lambda i: (i, 0, 0)),
                  full((n_cue, d)), full((1, d)),
                  full((3 * d, d)), full((1, d)),
                  full((d, n_cls)), full((1, n_cls))],
        out_specs=pl.BlockSpec((1, 1, n_cls), lambda i: (i, 0, 0)),
        out_shape=jax.ShapeDtypeStruct((B, 1, n_cls), F32),
        compiler_params=pltpu.CompilerParams(dimension_semantics=("parallel",)),
    )(a_seq, t_seq, cue.reshape(B, 1, n_cue),
      kp["cue_w"], kp["cue_b"], kp["fusion_w"], kp["fusion_b"],
      kp["cls_w"], kp["cls_b"])
    return out.reshape(B, n_cls)


# ------------------------------- glue helpers --------------------------------

def maxpool2_nhwc(x):
    # TODO(synk): 2x2 maxpool + edge padding kept as tiny XLA glue (awkward to
    # express lane-packed inside Mosaic without risky relayouts).
    B, H, W, C = x.shape
    return jnp.max(x.reshape(B, H // 2, 2, W // 2, 2, C), axis=(2, 4))


def make_banded_conv(w, w_out):
    """w: (3,3,Cin,Cout) -> banded (3, (w_out+2)*Cin, w_out*Cout) bf16 weight
    so conv(pad=1) == sum_ky  Xflat[ky:ky+H, :] @ Wb[ky]."""
    w_np = np.asarray(w, dtype=np.float32)
    KH, KW, Cin, Cout = w_np.shape
    wb = np.zeros((KH, (w_out + 2) * Cin, w_out * Cout), np.float32)
    for ky in range(KH):
        for kx in range(KW):
            for wi in range(w_out):
                wb[ky,
                   (wi + kx) * Cin:(wi + kx + 1) * Cin,
                   wi * Cout:(wi + 1) * Cout] = w_np[ky, kx]
    return jnp.asarray(wb, dtype=BF16)


# --------------------------------- forward -----------------------------------

def collection_status_forward(kp, audio, audio_lengths, text, cue_features, cfg):
    B = audio.shape[0]
    nhead = cfg["nhead"]
    T, F = cfg["audio_T"], cfg["audio_F"]
    C1, C2 = cfg["conv1_ch"], cfg["conv2_ch"]

    # ---- audio CNN front-end (conv as banded matmul, pool in glue) ----
    x = audio[:, 0]                                        # (B, T, F), Cin=1
    xp = jnp.pad(x, ((0, 0), (1, 1), (1, 1)))              # (B, T+2, F+2)
    y1 = banded_conv_relu(xp, kp["wb1"], kp["b1rep"])      # (B, T, F*C1)
    y1 = maxpool2_nhwc(y1.reshape(B, T, F, C1))            # (B, T/2, F/2, C1)

    H2, W2 = T // 2, F // 2
    xp2 = jnp.pad(y1, ((0, 0), (1, 1), (1, 1), (0, 0)))
    xp2 = xp2.reshape(B, H2 + 2, (W2 + 2) * C1)            # rows=h, lanes=[w,cin]
    y2 = banded_conv_relu(xp2, kp["wb2"], kp["b2rep"])     # (B, H2, W2*C2)
    y2 = maxpool2_nhwc(y2.reshape(B, H2, W2, C2))          # (B, T/4, F/4, C2)

    Sa = T // 4
    flat = y2.reshape(B, Sa, (F // 4) * C2)                # [w, c] order == PyTorch
    a = flatten_pos(flat, kp["flat_w"], kp["flat_b"], kp["audio_pos"])

    # key-padding mask -> additive bias (0 valid, -1e30 padded)
    pos = jnp.arange(Sa)[None, :]
    a_bias = jnp.where(pos >= audio_lengths[:, None], -1e30, 0.0)
    a_bias = a_bias.astype(F32)[:, None, :]                # (B, 1, Sa)

    for lp in kp["audio_layers"]:
        a = encoder_layer(a, a_bias, kp["head_mask"], lp, nhead)

    # ---- text path ----
    # TODO(synk): embedding gather stays in XLA (no clean tiny-Pallas gather).
    t = jnp.take(kp["text_emb"], text, axis=0) + kp["text_pos"]
    t_bias = jnp.zeros((B, 1, t.shape[1]), F32)
    for lp in kp["text_layers"]:
        t = encoder_layer(t, t_bias, kp["head_mask"], lp, nhead)

    # ---- fused tail: seq means + cues + fusion + classifier ----
    return fusion_head(a, t, cue_features, kp)


# ------------------------------- init / prep ---------------------------------

def init_params(key, cfg):
    d = cfg["d_model"]
    ff = 4 * d
    keys = iter(jax.random.split(key, 64))

    def w(shape, scale=0.02):
        return (scale * jax.random.normal(next(keys), shape)).astype(F32)

    def zeros(n):
        return jnp.zeros((n,), F32)

    def layer_params():
        return dict(
            in_w=w((d, 3 * d)), in_b=zeros(3 * d),
            out_w=w((d, d)), out_b=zeros(d),
            ff1_w=w((d, ff)), ff1_b=zeros(ff),
            ff2_w=w((ff, d)), ff2_b=zeros(d),
            ln1_g=jnp.ones((d,), F32), ln1_b=zeros(d),
            ln2_g=jnp.ones((d,), F32), ln2_b=zeros(d),
        )

    flatten_dim = cfg["conv2_ch"] * (cfg["audio_F"] // 4)
    return dict(
        conv1_w=w((3, 3, 1, cfg["conv1_ch"])), conv1_b=zeros(cfg["conv1_ch"]),
        conv2_w=w((3, 3, cfg["conv1_ch"], cfg["conv2_ch"])),
        conv2_b=zeros(cfg["conv2_ch"]),
        audio_flatten_w=w((flatten_dim, d)), audio_flatten_b=zeros(d),
        audio_pos=w((1, cfg["audio_pos_max"], d), 1.0),
        text_emb=w((cfg["vocab_size"], d), 1.0),
        text_pos=w((1, cfg["text_S"], d), 1.0),
        audio_layers=[layer_params() for _ in range(cfg["num_layers"])],
        text_layers=[layer_params() for _ in range(cfg["num_layers"])],
        cue_w=w((4, d)), cue_b=zeros(d),
        fusion_w=w((3 * d, d)), fusion_b=zeros(d),
        cls_w=w((d, 4)), cls_b=zeros(4),
    )


def _prep_layer(lp):
    return dict(
        in_w=lp["in_w"].astype(BF16), in_b=lp["in_b"].reshape(1, -1),
        out_w=lp["out_w"].astype(BF16), out_b=lp["out_b"].reshape(1, -1),
        ff1_w=lp["ff1_w"].astype(BF16), ff1_b=lp["ff1_b"].reshape(1, -1),
        ff2_w=lp["ff2_w"].astype(BF16), ff2_b=lp["ff2_b"].reshape(1, -1),
        ln1_g=lp["ln1_g"].reshape(1, -1), ln1_b=lp["ln1_b"].reshape(1, -1),
        ln2_g=lp["ln2_g"].reshape(1, -1), ln2_b=lp["ln2_b"].reshape(1, -1),
    )


def prepare_kernel_params(params, cfg):
    d = cfg["d_model"]
    nhead = cfg["nhead"]
    dh = d // nhead
    F = cfg["audio_F"]
    Sa = cfg["audio_T"] // 4

    hm = np.zeros((nhead, d), np.float32)
    for h in range(nhead):
        hm[h, h * dh:(h + 1) * dh] = 1.0

    return dict(
        wb1=make_banded_conv(params["conv1_w"], F),
        b1rep=jnp.tile(params["conv1_b"], F).reshape(1, -1),
        wb2=make_banded_conv(params["conv2_w"], F // 2),
        b2rep=jnp.tile(params["conv2_b"], F // 2).reshape(1, -1),
        flat_w=params["audio_flatten_w"].astype(BF16),
        flat_b=params["audio_flatten_b"].reshape(1, -1),
        audio_pos=params["audio_pos"][:, :Sa, :],
        text_emb=params["text_emb"],
        text_pos=params["text_pos"],
        audio_layers=[_prep_layer(lp) for lp in params["audio_layers"]],
        text_layers=[_prep_layer(lp) for lp in params["text_layers"]],
        cue_w=params["cue_w"].astype(BF16), cue_b=params["cue_b"].reshape(1, -1),
        fusion_w=params["fusion_w"].astype(BF16),
        fusion_b=params["fusion_b"].reshape(1, -1),
        cls_w=params["cls_w"].astype(BF16), cls_b=params["cls_b"].reshape(1, -1),
        head_mask=jnp.asarray(hm),
    )


# ----------------------------------- main -------------------------------------

if __name__ == "__main__":
    cfg = dict(
        vocab_size=1000, d_model=128, nhead=8, num_layers=2,
        conv1_ch=16, conv2_ch=32,
        audio_T=16, audio_F=32, text_S=16, batch=2,
        audio_pos_max=64,
    )

    key = jax.random.PRNGKey(0)
    k1, k2, k3, k4 = jax.random.split(key, 4)

    B = cfg["batch"]
    audio = jax.random.normal(k1, (B, 1, cfg["audio_T"], cfg["audio_F"]), F32)
    audio_lengths = jnp.array([4, 2], jnp.int32)      # downsampled frame counts
    text = jax.random.randint(k2, (B, cfg["text_S"]), 0, cfg["vocab_size"])
    cue_features = jax.random.normal(k3, (B, 4), F32)

    params = init_params(k4, cfg)
    kp = prepare_kernel_params(params, cfg)

    fwd = jax.jit(functools.partial(collection_status_forward, cfg=cfg))
    logits = fwd(kp, audio, audio_lengths, text, cue_features)
    jax.block_until_ready(logits)

    assert logits.shape == (B, 4)
    assert bool(jnp.all(jnp.isfinite(logits)))
    print("KERNEL_OK")
</pallas_src>

<mosaic_0001>
module attributes {stable_mosaic.version = 11 : i64} {
  func.func @_banded_conv_kernel(%arg0: i32, %arg1: memref<1x18x34xf32, #tpu.memory_space<vmem>>, %arg2: memref<3x34x512xbf16, #tpu.memory_space<vmem>>, %arg3: memref<1x512xf32, #tpu.memory_space<vmem>>, %arg4: memref<1x16x512xf32, #tpu.memory_space<vmem>>) attributes {dimension_semantics = [#tpu.dimension_semantics<parallel>], iteration_bounds = array<i64: 2>, scalar_prefetch = 0 : i64, scratch_operands = 0 : i64, tpu.core_type = #tpu.core_type<tc>, window_params = [{transform_indices = @transform_0, window_bounds = array<i64: 1, 18, 34>}, {pipeline_mode = #tpu.pipeline_mode<synchronous>, transform_indices = @transform_1, window_bounds = array<i64: 3, 34, 512>}, {pipeline_mode = #tpu.pipeline_mode<synchronous>, transform_indices = @transform_2, window_bounds = array<i64: 1, 512>}, {transform_indices = @transform_3, window_bounds = array<i64: 1, 16, 512>}]} {
    %c0 = arith.constant 0 : index
    %c0_0 = arith.constant 0 : index
    %c0_1 = arith.constant 0 : index
    %0 = vector.load %arg1[%c0, %c0_0, %c0_1] : memref<1x18x34xf32, #tpu.memory_space<vmem>>, vector<1x16x34xf32>
    %1 = vector.shape_cast %0 : vector<1x16x34xf32> to vector<16x34xf32>
    %c0_2 = arith.constant 0 : index
    %c0_3 = arith.constant 0 : index
    %c0_4 = arith.constant 0 : index
    %2 = vector.load %arg2[%c0_2, %c0_3, %c0_4] : memref<3x34x512xbf16, #tpu.memory_space<vmem>>, vector<1x34x512xbf16>
    %3 = vector.shape_cast %2 : vector<1x34x512xbf16> to vector<34x512xbf16>
    %4 = arith.truncf %1 : vector<16x34xf32> to vector<16x34xbf16>
    %cst = arith.constant dense<0.000000e+00> : vector<16x512xf32>
    %5 = tpu.matmul %4, %3, %cst {dimension_numbers = #tpu.dot_dimension_numbers<[1], [0], [0], [1], [0, 0, 1, 1], [], []>} : vector<16x34xbf16>, vector<34x512xbf16>, vector<16x512xf32> -> vector<16x512xf32>
    %c0_5 = arith.constant 0 : index
    %c1 = arith.constant 1 : index
    %c0_6 = arith.constant 0 : index
    %6 = vector.load %arg1[%c0_5, %c1, %c0_6] : memref<1x18x34xf32, #tpu.memory_space<vmem>>, vector<1x16x34xf32>
    %7 = vector.shape_cast %6 : vector<1x16x34xf32> to vector<16x34xf32>
    %c1_7 = arith.constant 1 : index
    %c0_8 = arith.constant 0 : index
    %c0_9 = arith.constant 0 : index
    %8 = vector.load %arg2[%c1_7, %c0_8, %c0_9] : memref<3x34x512xbf16, #tpu.memory_space<vmem>>, vector<1x34x512xbf16>
    %9 = vector.shape_cast %8 : vector<1x34x512xbf16> to vector<34x512xbf16>
    %10 = arith.truncf %7 : vector<16x34xf32> to vector<16x34xbf16>
    %cst_10 = arith.constant dense<0.000000e+00> : vector<16x512xf32>
    %11 = tpu.matmul %10, %9, %cst_10 {dimension_numbers = #tpu.dot_dimension_numbers<[1], [0], [0], [1], [0, 0, 1, 1], [], []>} : vector<16x34xbf16>, vector<34x512xbf16>, vector<16x512xf32> -> vector<16x512xf32>
    %12 = arith.addf %5, %11 : vector<16x512xf32>
    %c0_11 = arith.constant 0 : index
    %c2 = arith.constant 2 : index
    %c0_12 = arith.constant 0 : index
    %13 = vector.load %arg1[%c0_11, %c2, %c0_12] : memref<1x18x34xf32, #tpu.memory_space<vmem>>, vector<1x16x34xf32>
    %14 = vector.shape_cast %13 : vector<1x16x34xf32> to vector<16x34xf32>
    %c2_13 = arith.constant 2 : index
    %c0_14 = arith.constant 0 : index
    %c0_15 = arith.constant 0 : index
    %15 = vector.load %arg2[%c2_13, %c0_14, %c0_15] : memref<3x34x512xbf16, #tpu.memory_space<vmem>>, vector<1x34x512xbf16>
    %16 = vector.shape_cast %15 : vector<1x34x512xbf16> to vector<34x512xbf16>
    %17 = arith.truncf %14 : vector<16x34xf32> to vector<16x34xbf16>
    %cst_16 = arith.constant dense<0.000000e+00> : vector<16x512xf32>
    %18 = tpu.matmul %17, %16, %cst_16 {dimension_numbers = #tpu.dot_dimension_numbers<[1], [0], [0], [1], [0, 0, 1, 1], [], []>} : vector<16x34xbf16>, vector<34x512xbf16>, vector<16x512xf32> -> vector<16x512xf32>
    %19 = arith.addf %12, %18 : vector<16x512xf32>
    %c0_17 = arith.constant 0 : index
    %c0_18 = arith.constant 0 : index
    %20 = vector.load %arg3[%c0_17, %c0_18] : memref<1x512xf32, #tpu.memory_space<vmem>>, vector<1x512xf32>
    %21 = vector.broadcast %20 : vector<1x512xf32> to vector<16x512xf32>
    %22 = arith.addf %19, %21 : vector<16x512xf32>
    %cst_19 = arith.constant 0.000000e+00 : f32
    %23 = vector.broadcast %cst_19 : f32 to vector<16x512xf32>
    %24 = arith.maximumf %22, %23 : vector<16x512xf32>
    %c0_20 = arith.constant 0 : index
    %c0_21 = arith.constant 0 : index
    %c0_22 = arith.constant 0 : index
    %25 = vector.load %arg4[%c0_20, %c0_21, %c0_22] : memref<1x16x512xf32, #tpu.memory_space<vmem>>, vector<1x16x512xf32>
    %26 = vector.shape_cast %25 : vector<1x16x512xf32> to vector<16x512xf32>
    %27 = vector.shape_cast %24 : vector<16x512xf32> to vector<1x16x512xf32>
    tpu.vector_store %arg4[%c0_20, %c0_21, %c0_22], %27 {strides = array<i32>} : memref<1x16x512xf32, #tpu.memory_space<vmem>>, vector<1x16x512xf32>,
    return
  }
  func.func @transform_0(%arg0: i32) -> (i32, i32, i32) {
    %c0_i32 = arith.constant 0 : i32
    %c0_i32_0 = arith.constant 0 : i32
    %c0_i32_1 = arith.constant 0 : i32
    return %arg0, %c0_i32, %c0_i32_0 : i32, i32, i32
  }
  func.func @transform_1(%arg0: i32) -> (i32, i32, i32) {
    %c0_i32 = arith.constant 0 : i32
    %c0_i32_0 = arith.constant 0 : i32
    %c0_i32_1 = arith.constant 0 : i32
    %c0_i32_2 = arith.constant 0 : i32
    return %c0_i32, %c0_i32_0, %c0_i32_1 : i32, i32, i32
  }
  func.func @transform_2(%arg0: i32) -> (i32, i32) {
    %c0_i32 = arith.constant 0 : i32
    %c0_i32_0 = arith.constant 0 : i32
    %c0_i32_1 = arith.constant 0 : i32
    return %c0_i32, %c0_i32_0 : i32, i32
  }
  func.func @transform_3(%arg0: i32) -> (i32, i32, i32) {
    %c0_i32 = arith.constant 0 : i32
    %c0_i32_0 = arith.constant 0 : i32
    %c0_i32_1 = arith.constant 0 : i32
    return %arg0, %c0_i32, %c0_i32_0 : i32, i32, i32
  }
}

module attributes {stable_mosaic.version = 11 : i64} {
  func.func @_banded_conv_kernel(%arg0: i32, %arg1: memref<1x10x288xf32, #tpu.memory_space<vmem>>, %arg2: memref<3x288x512xbf16, #tpu.memory_space<vmem>>, %arg3: memref<1x512xf32, #tpu.memory_space<vmem>>, %arg4: memref<1x8x512xf32, #tpu.memory_space<vmem>>) attributes {dimension_semantics = [#tpu.dimension_semantics<parallel>], iteration_bounds = array<i64: 2>, scalar_prefetch = 0 : i64, scratch_operands = 0 : i64, tpu.core_type = #tpu.core_type<tc>, window_params = [{transform_indices = @transform_0, window_bounds = array<i64: 1, 10, 288>}, {pipeline_mode = #tpu.pipeline_mode<synchronous>, transform_indices = @transform_1, window_bounds = array<i64: 3, 288, 512>}, {pipeline_mode = #tpu.pipeline_mode<synchronous>, transform_indices = @transform_2, window_bounds = array<i64: 1, 512>}, {transform_indices = @transform_3, window_bounds = array<i64: 1, 8, 512>}]} {
    %c0 = arith.constant 0 : index
    %c0_0 = arith.constant 0 : index
    %c0_1 = arith.constant 0 : index
    %0 = vector.load %arg1[%c0, %c0_0, %c0_1] : memref<1x10x288xf32, #tpu.memory_space<vmem>>, vector<1x8x288xf32>
    %1 = vector.shape_cast %0 : vector<1x8x288xf32> to vector<8x288xf32>
    %c0_2 = arith.constant 0 : index
    %c0_3 = arith.constant 0 : index
    %c0_4 = arith.constant 0 : index
    %2 = vector.load %arg2[%c0_2, %c0_3, %c0_4] : memref<3x288x512xbf16, #tpu.memory_space<vmem>>, vector<1x288x512xbf16>
    %3 = vector.shape_cast %2 : vector<1x288x512xbf16> to vector<288x512xbf16>
    %4 = arith.truncf %1 : vector<8x288xf32> to vector<8x288xbf16>
    %cst = arith.constant dense<0.000000e+00> : vector<8x512xf32>
    %5 = tpu.matmul %4, %3, %cst {dimension_numbers = #tpu.dot_dimension_numbers<[1], [0], [0], [1], [0, 0, 1, 1], [], []>} : vector<8x288xbf16>, vector<288x512xbf16>, vector<8x512xf32> -> vector<8x512xf32>
    %c0_5 = arith.constant 0 : index
    %c1 = arith.constant 1 : index
    %c0_6 = arith.constant 0 : index
    %6 = vector.load %arg1[%c0_5, %c1, %c0_6] : memref<1x10x288xf32, #tpu.memory_space<vmem>>, vector<1x8x288xf32>
    %7 = vector.shape_cast %6 : vector<1x8x288xf32> to vector<8x288xf32>
    %c1_7 = arith.constant 1 : index
    %c0_8 = arith.constant 0 : index
    %c0_9 = arith.constant 0 : index
    %8 = vector.load %arg2[%c1_7, %c0_8, %c0_9] : memref<3x288x512xbf16, #tpu.memory_space<vmem>>, vector<1x288x512xbf16>
    %9 = vector.shape_cast %8 : vector<1x288x512xbf16> to vector<288x512xbf16>
    %10 = arith.truncf %7 : vector<8x288xf32> to vector<8x288xbf16>
    %cst_10 = arith.constant dense<0.000000e+00> : vector<8x512xf32>
    %11 = tpu.matmul %10, %9, %cst_10 {dimension_numbers = #tpu.dot_dimension_numbers<[1], [0], [0], [1], [0, 0, 1, 1], [], []>} : vector<8x288xbf16>, vector<288x512xbf16>, vector<8x512xf32> -> vector<8x512xf32>
    %12 = arith.addf %5, %11 : vector<8x512xf32>
    %c0_11 = arith.constant 0 : index
    %c2 = arith.constant 2 : index
    %c0_12 = arith.constant 0 : index
    %13 = vector.load %arg1[%c0_11, %c2, %c0_12] : memref<1x10x288xf32, #tpu.memory_space<vmem>>, vector<1x8x288xf32>
    %14 = vector.shape_cast %13 : vector<1x8x288xf32> to vector<8x288xf32>
    %c2_13 = arith.constant 2 : index
    %c0_14 = arith.constant 0 : index
    %c0_15 = arith.constant 0 : index
    %15 = vector.load %arg2[%c2_13, %c0_14, %c0_15] : memref<3x288x512xbf16, #tpu.memory_space<vmem>>, vector<1x288x512xbf16>
    %16 = vector.shape_cast %15 : vector<1x288x512xbf16> to vector<288x512xbf16>
    %17 = arith.truncf %14 : vector<8x288xf32> to vector<8x288xbf16>
    %cst_16 = arith.constant dense<0.000000e+00> : vector<8x512xf32>
    %18 = tpu.matmul %17, %16, %cst_16 {dimension_numbers = #tpu.dot_dimension_numbers<[1], [0], [0], [1], [0, 0, 1, 1], [], []>} : vector<8x288xbf16>, vector<288x512xbf16>, vector<8x512xf32> -> vector<8x512xf32>
    %19 = arith.addf %12, %18 : vector<8x512xf32>
    %c0_17 = arith.constant 0 : index
    %c0_18 = arith.constant 0 : index
    %20 = vector.load %arg3[%c0_17, %c0_18] : memref<1x512xf32, #tpu.memory_space<vmem>>, vector<1x512xf32>
    %21 = vector.broadcast %20 : vector<1x512xf32> to vector<8x512xf32>
    %22 = arith.addf %19, %21 : vector<8x512xf32>
    %cst_19 = arith.constant 0.000000e+00 : f32
    %23 = vector.broadcast %cst_19 : f32 to vector<8x512xf32>
    %24 = arith.maximumf %22, %23 : vector<8x512xf32>
    %c0_20 = arith.constant 0 : index
    %c0_21 = arith.constant 0 : index
    %c0_22 = arith.constant 0 : index
    %25 = vector.load %arg4[%c0_20, %c0_21, %c0_22] : memref<1x8x512xf32, #tpu.memory_space<vmem>>, vector<1x8x512xf32>
    %26 = vector.shape_cast %25 : vector<1x8x512xf32> to vector<8x512xf32>
    %27 = vector.shape_cast %24 : vector<8x512xf32> to vector<1x8x512xf32>
    tpu.vector_store %arg4[%c0_20, %c0_21, %c0_22], %27 {strides = array<i32>} : memref<1x8x512xf32, #tpu.memory_space<vmem>>, vector<1x8x512xf32>,
    return
  }
  func.func @transform_0(%arg0: i32) -> (i32, i32, i32) {
    %c0_i32 = arith.constant 0 : i32
    %c0_i32_0 = arith.constant 0 : i32
    %c0_i32_1 = arith.constant 0 : i32
    return %arg0, %c0_i32, %c0_i32_0 : i32, i32, i32
  }
  func.func @transform_1(%arg0: i32) -> (i32, i32, i32) {
    %c0_i32 = arith.constant 0 : i32
    %c0_i32_0 = arith.constant 0 : i32
    %c0_i32_1 = arith.constant 0 : i32
    %c0_i32_2 = arith.constant 0 : i32
    return %c0_i32, %c0_i32_0, %c0_i32_1 : i32, i32, i32
  }
  func.func @transform_2(%arg0: i32) -> (i32, i32) {
    %c0_i32 = arith.constant 0 : i32
    %c0_i32_0 = arith.constant 0 : i32
    %c0_i32_1 = arith.constant 0 : i32
    return %c0_i32, %c0_i32_0 : i32, i32
  }
  func.func @transform_3(%arg0: i32) -> (i32, i32, i32) {
    %c0_i32 = arith.constant 0 : i32
    %c0_i32_0 = arith.constant 0 : i32
    %c0_i32_1 = arith.constant 0 : i32
    return %arg0, %c0_i32, %c0_i32_0 : i32, i32, i32
  }
}

module attributes {stable_mosaic.version = 11 : i64} {
  func.func @_flatten_pos_kernel(%arg0: i32, %arg1: memref<1x4x256xf32, #tpu.memory_space<vmem>>, %arg2: memref<256x128xbf16, #tpu.memory_space<vmem>>, %arg3: memref<1x128xf32, #tpu.memory_space<vmem>>, %arg4: memref<1x4x128xf32, #tpu.memory_space<vmem>>, %arg5: memref<1x4x128xf32, #tpu.memory_space<vmem>>) attributes {dimension_semantics = [#tpu.dimension_semantics<parallel>], iteration_bounds = array<i64: 2>, scalar_prefetch = 0 : i64, scratch_operands = 0 : i64, tpu.core_type = #tpu.core_type<tc>, window_params = [{transform_indices = @transform_0, window_bounds = array<i64: 1, 4, 256>}, {pipeline_mode = #tpu.pipeline_mode<synchronous>, transform_indices = @transform_1, window_bounds = array<i64: 256, 128>}, {pipeline_mode = #tpu.pipeline_mode<synchronous>, transform_indices = @transform_2, window_bounds = array<i64: 1, 128>}, {pipeline_mode = #tpu.pipeline_mode<synchronous>, transform_indices = @transform_3, window_bounds = array<i64: 1, 4, 128>}, {transform_indices = @transform_4, window_bounds = array<i64: 1, 4, 128>}]} {
    %c0 = arith.constant 0 : index
    %c0_0 = arith.constant 0 : index
    %c0_1 = arith.constant 0 : index
    %0 = vector.load %arg1[%c0, %c0_0, %c0_1] : memref<1x4x256xf32, #tpu.memory_space<vmem>>, vector<1x4x256xf32>
    %1 = vector.shape_cast %0 : vector<1x4x256xf32> to vector<4x256xf32>
    %c0_2 = arith.constant 0 : index
    %c0_3 = arith.constant 0 : index
    %2 = vector.load %arg2[%c0_2, %c0_3] : memref<256x128xbf16, #tpu.memory_space<vmem>>, vector<256x128xbf16>
    %3 = arith.truncf %1 : vector<4x256xf32> to vector<4x256xbf16>
    %cst = arith.constant dense<0.000000e+00> : vector<4x128xf32>
    %4 = tpu.matmul %3, %2, %cst {dimension_numbers = #tpu.dot_dimension_numbers<[1], [0], [0], [1], [0, 0, 1, 1], [], []>} : vector<4x256xbf16>, vector<256x128xbf16>, vector<4x128xf32> -> vector<4x128xf32>
    %c0_4 = arith.constant 0 : index
    %c0_5 = arith.constant 0 : index
    %5 = vector.load %arg3[%c0_4, %c0_5] : memref<1x128xf32, #tpu.memory_space<vmem>>, vector<1x128xf32>
    %6 = vector.broadcast %5 : vector<1x128xf32> to vector<4x128xf32>
    %7 = arith.addf %4, %6 : vector<4x128xf32>
    %c0_6 = arith.constant 0 : index
    %c0_7 = arith.constant 0 : index
    %c0_8 = arith.constant 0 : index
    %8 = vector.load %arg4[%c0_6, %c0_7, %c0_8] : memref<1x4x128xf32, #tpu.memory_space<vmem>>, vector<1x4x128xf32>
    %9 = vector.shape_cast %8 : vector<1x4x128xf32> to vector<4x128xf32>
    %10 = arith.addf %7, %9 : vector<4x128xf32>
    %c0_9 = arith.constant 0 : index
    %c0_10 = arith.constant 0 : index
    %c0_11 = arith.constant 0 : index
    %11 = vector.load %arg5[%c0_9, %c0_10, %c0_11] : memref<1x4x128xf32, #tpu.memory_space<vmem>>, vector<1x4x128xf32>
    %12 = vector.shape_cast %11 : vector<1x4x128xf32> to vector<4x128xf32>
    %13 = vector.shape_cast %10 : vector<4x128xf32> to vector<1x4x128xf32>
    tpu.vector_store %arg5[%c0_9, %c0_10, %c0_11], %13 {strides = array<i32>} : memref<1x4x128xf32, #tpu.memory_space<vmem>>, vector<1x4x128xf32>,
    return
  }
  func.func @transform_0(%arg0: i32) -> (i32, i32, i32) {
    %c0_i32 = arith.constant 0 : i32
    %c0_i32_0 = arith.constant 0 : i32
    %c0_i32_1 = arith.constant 0 : i32
    return %arg0, %c0_i32, %c0_i32_0 : i32, i32, i32
  }
  func.func @transform_1(%arg0: i32) -> (i32, i32) {
    %c0_i32 = arith.constant 0 : i32
    %c0_i32_0 = arith.constant 0 : i32
    %c0_i32_1 = arith.constant 0 : i32
    return %c0_i32, %c0_i32_0 : i32, i32
  }
  func.func @transform_2(%arg0: i32) -> (i32, i32) {
    %c0_i32 = arith.constant 0 : i32
    %c0_i32_0 = arith.constant 0 : i32
    %c0_i32_1 = arith.constant 0 : i32
    return %c0_i32, %c0_i32_0 : i32, i32
  }
  func.func @transform_3(%arg0: i32) -> (i32, i32, i32) {
    %c0_i32 = arith.constant 0 : i32
    %c0_i32_0 = arith.constant 0 : i32
    %c0_i32_1 = arith.constant 0 : i32
    %c0_i32_2 = arith.constant 0 : i32
    return %c0_i32, %c0_i32_0, %c0_i32_1 : i32, i32, i32
  }
  func.func @transform_4(%arg0: i32) -> (i32, i32, i32) {
    %c0_i32 = arith.constant 0 : i32
    %c0_i32_0 = arith.constant 0 : i32
    %c0_i32_1 = arith.constant 0 : i32
    return %arg0, %c0_i32, %c0_i32_0 : i32, i32, i32
  }
}

module attributes {stable_mosaic.version = 11 : i64} {
  func.func @_encoder_layer_kernel(%arg0: i32, %arg1: memref<1x4x128xf32, #tpu.memory_space<vmem>>, %arg2: memref<1x1x4xf32, #tpu.memory_space<vmem>>, %arg3: memref<8x128xf32, #tpu.memory_space<vmem>>, %arg4: memref<128x384xbf16, #tpu.memory_space<vmem>>, %arg5: memref<1x384xf32, #tpu.memory_space<vmem>>, %arg6: memref<128x128xbf16, #tpu.memory_space<vmem>>, %arg7: memref<1x128xf32, #tpu.memory_space<vmem>>, %arg8: memref<128x512xbf16, #tpu.memory_space<vmem>>, %arg9: memref<1x512xf32, #tpu.memory_space<vmem>>, %arg10: memref<512x128xbf16, #tpu.memory_space<vmem>>, %arg11: memref<1x128xf32, #tpu.memory_space<vmem>>, %arg12: memref<1x128xf32, #tpu.memory_space<vmem>>, %arg13: memref<1x128xf32, #tpu.memory_space<vmem>>, %arg14: memref<1x128xf32, #tpu.memory_space<vmem>>, %arg15: memref<1x128xf32, #tpu.memory_space<vmem>>, %arg16: memref<1x4x128xf32, #tpu.memory_space<vmem>>) attributes {dimension_semantics = [#tpu.dimension_semantics<parallel>], iteration_bounds = array<i64: 2>, scalar_prefetch = 0 : i64, scratch_operands = 0 : i64, tpu.core_type = #tpu.core_type<tc>, window_params = [{transform_indices = @transform_0, window_bounds = array<i64: 1, 4, 128>}, {transform_indices = @transform_1, window_bounds = array<i64: 1, 1, 4>}, {pipeline_mode = #tpu.pipeline_mode<synchronous>, transform_indices = @transform_2, window_bounds = array<i64: 8, 128>}, {pipeline_mode = #tpu.pipeline_mode<synchronous>, transform_indices = @transform_3, window_bounds = array<i64: 128, 384>}, {pipeline_mode = #tpu.pipeline_mode<synchronous>, transform_indices = @transform_4, window_bounds = array<i64: 1, 384>}, {pipeline_mode = #tpu.pipeline_mode<synchronous>, transform_indices = @transform_5, window_bounds = array<i64: 128, 128>}, {pipeline_mode = #tpu.pipeline_mode<synchronous>, transform_indices = @transform_6, window_bounds = array<i64: 1, 128>}, {pipeline_mode = #tpu.pipeline_mode<synchronous>, transform_indices = @transform_7, window_bounds = array<i64: 128, 512>}, {pipeline_mode = #tpu.pipeline_mode<synchronous>, transform_indices = @transform_8, window_bounds = array<i64: 1, 512>}, {pipeline_mode = #tpu.pipeline_mode<synchronous>, transform_indices = @transform_9, window_bounds = array<i64: 512, 128>}, {pipeline_mode = #tpu.pipeline_mode<synchronous>, transform_indices = @transform_10, window_bounds = array<i64: 1, 128>}, {pipeline_mode = #tpu.pipeline_mode<synchronous>, transform_indices = @transform_11, window_bounds = array<i64: 1, 128>}, {pipeline_mode = #tpu.pipeline_mode<synchronous>, transform_indices = @transform_12, window_bounds = array<i64: 1, 128>}, {pipeline_mode = #tpu.pipeline_mode<synchronous>, transform_indices = @transform_13, window_bounds = array<i64: 1, 128>}, {pipeline_mode = #tpu.pipeline_mode<synchronous>, transform_indices = @transform_14, window_bounds = array<i64: 1, 128>}, {transform_indices = @transform_15, window_bounds = array<i64: 1, 4, 128>}]} {
    %c0 = arith.constant 0 : index
    %c0_0 = arith.constant 0 : index
    %c0_1 = arith.constant 0 : index
    %0 = vector.load %arg1[%c0, %c0_0, %c0_1] : memref<1x4x128xf32, #tpu.memory_space<vmem>>, vector<1x4x128xf32>
    %1 = vector.shape_cast %0 : vector<1x4x128xf32> to vector<4x128xf32>
    %c0_2 = arith.constant 0 : index
    %c0_3 = arith.constant 0 : index
    %c0_4 = arith.constant 0 : index
    %2 = vector.load %arg2[%c0_2, %c0_3, %c0_4] : memref<1x1x4xf32, #tpu.memory_space<vmem>>, vector<1x1x4xf32>
    %3 = vector.shape_cast %2 : vector<1x1x4xf32> to vector<1x4xf32>
    %c0_5 = arith.constant 0 : index
    %c0_6 = arith.constant 0 : index
    %4 = vector.load %arg4[%c0_5, %c0_6] : memref<128x384xbf16, #tpu.memory_space<vmem>>, vector<128x384xbf16>
    %5 = arith.truncf %1 : vector<4x128xf32> to vector<4x128xbf16>
    %cst = arith.constant dense<0.000000e+00> : vector<4x384xf32>
    %6 = tpu.matmul %5, %4, %cst {dimension_numbers = #tpu.dot_dimension_numbers<[1], [0], [0], [1], [0, 0, 1, 1], [], []>} : vector<4x128xbf16>, vector<128x384xbf16>, vector<4x384xf32> -> vector<4x384xf32>
    %c0_7 = arith.constant 0 : index
    %c0_8 = arith.constant 0 : index
    %7 = vector.load %arg5[%c0_7, %c0_8] : memref<1x384xf32, #tpu.memory_space<vmem>>, vector<1x384xf32>
    %8 = vector.broadcast %7 : vector<1x384xf32> to vector<4x384xf32>
    %9 = arith.addf %6, %8 : vector<4x384xf32>
    %10 = vector.extract_strided_slice %9 {offsets = [0, 0], sizes = [4, 128], strides = [1, 1]} : vector<4x384xf32> to vector<4x128xf32>
    %11 = vector.extract_strided_slice %9 {offsets = [0, 128], sizes = [4, 128], strides = [1, 1]} : vector<4x384xf32> to vector<4x128xf32>
    %12 = vector.extract_strided_slice %9 {offsets = [0, 256], sizes = [4, 128], strides = [1, 1]} : vector<4x384xf32> to vector<4x128xf32>
    %cst_9 = arith.constant 0.000000e+00 : f32
    %13 = vector.broadcast %cst_9 : f32 to vector<4x128xf32>
    %c0_10 = arith.constant 0 : index
    %c0_11 = arith.constant 0 : index
    %14 = vector.load %arg3[%c0_10, %c0_11] : memref<8x128xf32, #tpu.memory_space<vmem>>, vector<1x128xf32>
    %15 = vector.broadcast %14 : vector<1x128xf32> to vector<4x128xf32>
    %16 = arith.mulf %10, %15 : vector<4x128xf32>
    %17 = arith.truncf %16 : vector<4x128xf32> to vector<4x128xbf16>
    %18 = arith.truncf %11 : vector<4x128xf32> to vector<4x128xbf16>
    %cst_12 = arith.constant dense<0.000000e+00> : vector<4x4xf32>
    %19 = tpu.matmul %17, %18, %cst_12 {dimension_numbers = #tpu.dot_dimension_numbers<[1], [1], [0], [0], [0, 0, 1, 0], [], []>} : vector<4x128xbf16>, vector<4x128xbf16>, vector<4x4xf32> -> vector<4x4xf32>
    %cst_13 = arith.constant 2.500000e-01 : f32
    %20 = vector.broadcast %cst_13 : f32 to vector<4x4xf32>
    %21 = arith.mulf %19, %20 : vector<4x4xf32>
    %22 = vector.broadcast %3 : vector<1x4xf32> to vector<4x4xf32>
    %23 = arith.addf %21, %22 : vector<4x4xf32>
    %cst_14 = arith.constant dense<0xFF800000> : vector<4xf32>
    %24 = vector.multi_reduction <maximumf>, %23, %cst_14 [1] : vector<4x4xf32> to vector<4xf32>
    %25 = vector.shape_cast %24 : vector<4xf32> to vector<4x1xf32>
    %26 = vector.broadcast %25 : vector<4x1xf32> to vector<4x4xf32>
    %27 = arith.subf %23, %26 : vector<4x4xf32>
    %28 = math.exp %27 : vector<4x4xf32>
    %cst_15 = arith.constant dense<0.000000e+00> : vector<4xf32>
    %29 = vector.multi_reduction <add>, %28, %cst_15 [1] : vector<4x4xf32> to vector<4xf32>
    %30 = vector.shape_cast %29 : vector<4xf32> to vector<4x1xf32>
    %31 = tpu.reciprocal %30 {approx = true} : vector<4x1xf32> -> vector<4x1xf32>
    %32 = vector.broadcast %31 : vector<4x1xf32> to vector<4x4xf32>
    %33 = arith.mulf %28, %32 : vector<4x4xf32>
    %34 = vector.broadcast %14 : vector<1x128xf32> to vector<4x128xf32>
    %35 = arith.mulf %12, %34 : vector<4x128xf32>
    %36 = arith.truncf %33 : vector<4x4xf32> to vector<4x4xbf16>
    %37 = arith.truncf %35 : vector<4x128xf32> to vector<4x128xbf16>
    %cst_16 = arith.constant dense<0.000000e+00> : vector<4x128xf32>
    %38 = tpu.matmul %36, %37, %cst_16 {dimension_numbers = #tpu.dot_dimension_numbers<[1], [0], [0], [1], [0, 0, 1, 1], [], []>} : vector<4x4xbf16>, vector<4x128xbf16>, vector<4x128xf32> -> vector<4x128xf32>
    %39 = arith.addf %13, %38 : vector<4x128xf32>
    %c1 = arith.constant 1 : index
    %c0_17 = arith.constant 0 : index
    %40 = vector.load %arg3[%c1, %c0_17] : memref<8x128xf32, #tpu.memory_space<vmem>>, vector<1x128xf32>
    %41 = vector.broadcast %40 : vector<1x128xf32> to vector<4x128xf32>
    %42 = arith.mulf %10, %41 : vector<4x128xf32>
    %43 = arith.truncf %42 : vector<4x128xf32> to vector<4x128xbf16>
    %44 = arith.truncf %11 : vector<4x128xf32> to vector<4x128xbf16>
    %cst_18 = arith.constant dense<0.000000e+00> : vector<4x4xf32>
    %45 = tpu.matmul %43, %44, %cst_18 {dimension_numbers = #tpu.dot_dimension_numbers<[1], [1], [0], [0], [0, 0, 1, 0], [], []>} : vector<4x128xbf16>, vector<4x128xbf16>, vector<4x4xf32> -> vector<4x4xf32>
    %cst_19 = arith.constant 2.500000e-01 : f32
    %46 = vector.broadcast %cst_19 : f32 to vector<4x4xf32>
    %47 = arith.mulf %45, %46 : vector<4x4xf32>
    %48 = vector.broadcast %3 : vector<1x4xf32> to vector<4x4xf32>
    %49 = arith.addf %47, %48 : vector<4x4xf32>
    %cst_20 = arith.constant dense<0xFF800000> : vector<4xf32>
    %50 = vector.multi_reduction <maximumf>, %49, %cst_20 [1] : vector<4x4xf32> to vector<4xf32>
    %51 = vector.shape_cast %50 : vector<4xf32> to vector<4x1xf32>
    %52 = vector.broadcast %51 : vector<4x1xf32> to vector<4x4xf32>
    %53 = arith.subf %49, %52 : vector<4x4xf32>
    %54 = math.exp %53 : vector<4x4xf32>
    %cst_21 = arith.constant dense<0.000000e+00> : vector<4xf32>
    %55 = vector.multi_reduction <add>, %54, %cst_21 [1] : vector<4x4xf32> to vector<4xf32>
    %56 = vector.shape_cast %55 : vector<4xf32> to vector<4x1xf32>
    %57 = tpu.reciprocal %56 {approx = true} : vector<4x1xf32> -> vector<4x1xf32>
    %58 = vector.broadcast %57 : vector<4x1xf32> to vector<4x4xf32>
    %59 = arith.mulf %54, %58 : vector<4x4xf32>
    %60 = vector.broadcast %40 : vector<1x128xf32> to vector<4x128xf32>
    %61 = arith.mulf %12, %60 : vector<4x128xf32>
    %62 = arith.truncf %59 : vector<4x4xf32> to vector<4x4xbf16>
    %63 = arith.truncf %61 : vector<4x128xf32> to vector<4x128xbf16>
    %cst_22 = arith.constant dense<0.000000e+00> : vector<4x128xf32>
    %64 = tpu.matmul %62, %63, %cst_22 {dimension_numbers = #tpu.dot_dimension_numbers<[1], [0], [0], [1], [0, 0, 1, 1], [], []>} : vector<4x4xbf16>, vector<4x128xbf16>, vector<4x128xf32> -> vector<4x128xf32>
    %65 = arith.addf %39, %64 : vector<4x128xf32>
    %c2 = arith.constant 2 : index
    %c0_23 = arith.constant 0 : index
    %66 = vector.load %arg3[%c2, %c0_23] : memref<8x128xf32, #tpu.memory_space<vmem>>, vector<1x128xf32>
    %67 = vector.broadcast %66 : vector<1x128xf32> to vector<4x128xf32>
    %68 = arith.mulf %10, %67 : vector<4x128xf32>
    %69 = arith.truncf %68 : vector<4x128xf32> to vector<4x128xbf16>
    %70 = arith.truncf %11 : vector<4x128xf32> to vector<4x128xbf16>
    %cst_24 = arith.constant dense<0.000000e+00> : vector<4x4xf32>
    %71 = tpu.matmul %69, %70, %cst_24 {dimension_numbers = #tpu.dot_dimension_numbers<[1], [1], [0], [0], [0, 0, 1, 0], [], []>} : vector<4x128xbf16>, vector<4x128xbf16>, vector<4x4xf32> -> vector<4x4xf32>
    %cst_25 = arith.constant 2.500000e-01 : f32
    %72 = vector.broadcast %cst_25 : f32 to vector<4x4xf32>
    %73 = arith.mulf %71, %72 : vector<4x4xf32>
    %74 = vector.broadcast %3 : vector<1x4xf32> to vector<4x4xf32>
    %75 = arith.addf %73, %74 : vector<4x4xf32>
    %cst_26 = arith.constant dense<0xFF800000> : vector<4xf32>
    %76 = vector.multi_reduction <maximumf>, %75, %cst_26 [1] : vector<4x4xf32> to vector<4xf32>
    %77 = vector.shape_cast %76 : vector<4xf32> to vector<4x1xf32>
    %78 = vector.broadcast %77 : vector<4x1xf32> to vector<4x4xf32>
    %79 = arith.subf %75, %78 : vector<4x4xf32>
    %80 = math.exp %79 : vector<4x4xf32>
    %cst_27 = arith.constant dense<0.000000e+00> : vector<4xf32>
    %81 = vector.multi_reduction <add>, %80, %cst_27 [1] : vector<4x4xf32> to vector<4xf32>
    %82 = vector.shape_cast %81 : vector<4xf32> to vector<4x1xf32>
    %83 = tpu.reciprocal %82 {approx = true} : vector<4x1xf32> -> vector<4x1xf32>
    %84 = vector.broadcast %83 : vector<4x1xf32> to vector<4x4xf32>
    %85 = arith.mulf %80, %84 : vector<4x4xf32>
    %86 = vector.broadcast %66 : vector<1x128xf32> to vector<4x128xf32>
    %87 = arith.mulf %12, %86 : vector<4x128xf32>
    %88 = arith.truncf %85 : vector<4x4xf32> to vector<4x4xbf16>
    %89 = arith.truncf %87 : vector<4x128xf32> to vector<4x128xbf16>
    %cst_28 = arith.constant dense<0.000000e+00> : vector<4x128xf32>
    %90 = tpu.matmul %88, %89, %cst_28 {dimension_numbers = #tpu.dot_dimension_numbers<[1], [0], [0], [1], [0, 0, 1, 1], [], []>} : vector<4x4xbf16>, vector<4x128xbf16>, vector<4x128xf32> -> vector<4x128xf32>
    %91 = arith.addf %65, %90 : vector<4x128xf32>
    %c3 = arith.constant 3 : index
    %c0_29 = arith.constant 0 : index
    %92 = vector.load %arg3[%c3, %c0_29] : memref<8x128xf32, #tpu.memory_space<vmem>>, vector<1x128xf32>
    %93 = vector.broadcast %92 : vector<1x128xf32> to vector<4x128xf32>
    %94 = arith.mulf %10, %93 : vector<4x128xf32>
    %95 = arith.truncf %94 : vector<4x128xf32> to vector<4x128xbf16>
    %96 = arith.truncf %11 : vector<4x128xf32> to vector<4x128xbf16>
    %cst_30 = arith.constant dense<0.000000e+00> : vector<4x4xf32>
    %97 = tpu.matmul %95, %96, %cst_30 {dimension_numbers = #tpu.dot_dimension_numbers<[1], [1], [0], [0], [0, 0, 1, 0], [], []>} : vector<4x128xbf16>, vector<4x128xbf16>, vector<4x4xf32> -> vector<4x4xf32>
    %cst_31 = arith.constant 2.500000e-01 : f32
    %98 = vector.broadcast %cst_31 : f32 to vector<4x4xf32>
    %99 = arith.mulf %97, %98 : vector<4x4xf32>
    %100 = vector.broadcast %3 : vector<1x4xf32> to vector<4x4xf32>
    %101 = arith.addf %99, %100 : vector<4x4xf32>
    %cst_32 = arith.constant dense<0xFF800000> : vector<4xf32>
    %102 = vector.multi_reduction <maximumf>, %101, %cst_32 [1] : vector<4x4xf32> to vector<4xf32>
    %103 = vector.shape_cast %102 : vector<4xf32> to vector<4x1xf32>
    %104 = vector.broadcast %103 : vector<4x1xf32> to vector<4x4xf32>
    %105 = arith.subf %101, %104 : vector<4x4xf32>
    %106 = math.exp %105 : vector<4x4xf32>
    %cst_33 = arith.constant dense<0.000000e+00> : vector<4xf32>
    %107 = vector.multi_reduction <add>, %106, %cst_33 [1] : vector<4x4xf32> to vector<4xf32>
    %108 = vector.shape_cast %107 : vector<4xf32> to vector<4x1xf32>
    %109 = tpu.reciprocal %108 {approx = true} : vector<4x1xf32> -> vector<4x1xf32>
    %110 = vector.broadcast %109 : vector<4x1xf32> to vector<4x4xf32>
    %111 = arith.mulf %106, %110 : vector<4x4xf32>
    %112 = vector.broadcast %92 : vector<1x128xf32> to vector<4x128xf32>
    %113 = arith.mulf %12, %112 : vector<4x128xf32>
    %114 = arith.truncf %111 : vector<4x4xf32> to vector<4x4xbf16>
    %115 = arith.truncf %113 : vector<4x128xf32> to vector<4x128xbf16>
    %cst_34 = arith.constant dense<0.000000e+00> : vector<4x128xf32>
    %116 = tpu.matmul %114, %115, %cst_34 {dimension_numbers = #tpu.dot_dimension_numbers<[1], [0], [0], [1], [0, 0, 1, 1], [], []>} : vector<4x4xbf16>, vector<4x128xbf16>, vector<4x128xf32> -> vector<4x128xf32>
    %117 = arith.addf %91, %116 : vector<4x128xf32>
    %c4 = arith.constant 4 : index
    %c0_35 = arith.constant 0 : index
    %118 = vector.load %arg3[%c4, %c0_35] : memref<8x128xf32, #tpu.memory_space<vmem>>, vector<1x128xf32>
    %119 = vector.broadcast %118 : vector<1x128xf32> to vector<4x128xf32>
    %120 = arith.mulf %10, %119 : vector<4x128xf32>
    %121 = arith.truncf %120 : vector<4x128xf32> to vector<4x128xbf16>
    %122 = arith.truncf %11 : vector<4x128xf32> to vector<4x128xbf16>
    %cst_36 = arith.constant dense<0.000000e+00> : vector<4x4xf32>
    %123 = tpu.matmul %121, %122, %cst_36 {dimension_numbers = #tpu.dot_dimension_numbers<[1], [1], [0], [0], [0, 0, 1, 0], [], []>} : vector<4x128xbf16>, vector<4x128xbf16>, vector<4x4xf32> -> vector<4x4xf32>
    %cst_37 = arith.constant 2.500000e-01 : f32
    %124 = vector.broadcast %cst_37 : f32 to vector<4x4xf32>
    %125 = arith.mulf %123, %124 : vector<4x4xf32>
    %126 = vector.broadcast %3 : vector<1x4xf32> to vector<4x4xf32>
    %127 = arith.addf %125, %126 : vector<4x4xf32>
    %cst_38 = arith.constant dense<0xFF800000> : vector<4xf32>
    %128 = vector.multi_reduction <maximumf>, %127, %cst_38 [1] : vector<4x4xf32> to vector<4xf32>
    %129 = vector.shape_cast %128 : vector<4xf32> to vector<4x1xf32>
    %130 = vector.broadcast %129 : vector<4x1xf32> to vector<4x4xf32>
    %131 = arith.subf %127, %130 : vector<4x4xf32>
    %132 = math.exp %131 : vector<4x4xf32>
    %cst_39 = arith.constant dense<0.000000e+00> : vector<4xf32>
    %133 = vector.multi_reduction <add>, %132, %cst_39 [1] : vector<4x4xf32> to vector<4xf32>
    %134 = vector.shape_cast %133 : vector<4xf32> to vector<4x1xf32>
    %135 = tpu.reciprocal %134 {approx = true} : vector<4x1xf32> -> vector<4x1xf32>
    %136 = vector.broadcast %135 : vector<4x1xf32> to vector<4x4xf32>
    %137 = arith.mulf %132, %136 : vector<4x4xf32>
    %138 = vector.broadcast %118 : vector<1x128xf32> to vector<4x128xf32>
    %139 = arith.mulf %12, %138 : vector<4x128xf32>
    %140 = arith.truncf %137 : vector<4x4xf32> to vector<4x4xbf16>
    %141 = arith.truncf %139 : vector<4x128xf32> to vector<4x128xbf16>
    %cst_40 = arith.constant dense<0.000000e+00> : vector<4x128xf32>
    %142 = tpu.matmul %140, %141, %cst_40 {dimension_numbers = #tpu.dot_dimension_numbers<[1], [0], [0], [1], [0, 0, 1, 1], [], []>} : vector<4x4xbf16>, vector<4x128xbf16>, vector<4x128xf32> -> vector<4x128xf32>
    %143 = arith.addf %117, %142 : vector<4x128xf32>
    %c5 = arith.constant 5 : index
    %c0_41 = arith.constant 0 : index
    %144 = vector.load %arg3[%c5, %c0_41] : memref<8x128xf32, #tpu.memory_space<vmem>>, vector<1x128xf32>
    %145 = vector.broadcast %144 : vector<1x128xf32> to vector<4x128xf32>
    %146 = arith.mulf %10, %145 : vector<4x128xf32>
    %147 = arith.truncf %146 : vector<4x128xf32> to vector<4x128xbf16>
    %148 = arith.truncf %11 : vector<4x128xf32> to vector<4x128xbf16>
    %cst_42 = arith.constant dense<0.000000e+00> : vector<4x4xf32>
    %149 = tpu.matmul %147, %148, %cst_42 {dimension_numbers = #tpu.dot_dimension_numbers<[1], [1], [0], [0], [0, 0, 1, 0], [], []>} : vector<4x128xbf16>, vector<4x128xbf16>, vector<4x4xf32> -> vector<4x4xf32>
    %cst_43 = arith.constant 2.500000e-01 : f32
    %150 = vector.broadcast %cst_43 : f32 to vector<4x4xf32>
    %151 = arith.mulf %149, %150 : vector<4x4xf32>
    %152 = vector.broadcast %3 : vector<1x4xf32> to vector<4x4xf32>
    %153 = arith.addf %151, %152 : vector<4x4xf32>
    %cst_44 = arith.constant dense<0xFF800000> : vector<4xf32>
    %154 = vector.multi_reduction <maximumf>, %153, %cst_44 [1] : vector<4x4xf32> to vector<4xf32>
    %155 = vector.shape_cast %154 : vector<4xf32> to vector<4x1xf32>
    %156 = vector.broadcast %155 : vector<4x1xf32> to vector<4x4xf32>
    %157 = arith.subf %153, %156 : vector<4x4xf32>
    %158 = math.exp %157 : vector<4x4xf32>
    %cst_45 = arith.constant dense<0.000000e+00> : vector<4xf32>
    %159 = vector.multi_reduction <add>, %158, %cst_45 [1] : vector<4x4xf32> to vector<4xf32>
    %160 = vector.shape_cast %159 : vector<4xf32> to vector<4x1xf32>
    %161 = tpu.reciprocal %160 {approx = true} : vector<4x1xf32> -> vector<4x1xf32>
    %162 = vector.broadcast %161 : vector<4x1xf32> to vector<4x4xf32>
    %163 = arith.mulf %158, %162 : vector<4x4xf32>
    %164 = vector.broadcast %144 : vector<1x128xf32> to vector<4x128xf32>
    %165 = arith.mulf %12, %164 : vector<4x128xf32>
    %166 = arith.truncf %163 : vector<4x4xf32> to vector<4x4xbf16>
    %167 = arith.truncf %165 : vector<4x128xf32> to vector<4x128xbf16>
    %cst_46 = arith.constant dense<0.000000e+00> : vector<4x128xf32>
    %168 = tpu.matmul %166, %167, %cst_46 {dimension_numbers = #tpu.dot_dimension_numbers<[1], [0], [0], [1], [0, 0, 1, 1], [], []>} : vector<4x4xbf16>, vector<4x128xbf16>, vector<4x128xf32> -> vector<4x128xf32>
    %169 = arith.addf %143, %168 : vector<4x128xf32>
    %c6 = arith.constant 6 : index
    %c0_47 = arith.constant 0 : index
    %170 = vector.load %arg3[%c6, %c0_47] : memref<8x128xf32, #tpu.memory_space<vmem>>, vector<1x128xf32>
    %171 = vector.broadcast %170 : vector<1x128xf32> to vector<4x128xf32>
    %172 = arith.mulf %10, %171 : vector<4x128xf32>
    %173 = arith.truncf %172 : vector<4x128xf32> to vector<4x128xbf16>
    %174 = arith.truncf %11 : vector<4x128xf32> to vector<4x128xbf16>
    %cst_48 = arith.constant dense<0.000000e+00> : vector<4x4xf32>
    %175 = tpu.matmul %173, %174, %cst_48 {dimension_numbers = #tpu.dot_dimension_numbers<[1], [1], [0], [0], [0, 0, 1, 0], [], []>} : vector<4x128xbf16>, vector<4x128xbf16>, vector<4x4xf32> -> vector<4x4xf32>
    %cst_49 = arith.constant 2.500000e-01 : f32
    %176 = vector.broadcast %cst_49 : f32 to vector<4x4xf32>
    %177 = arith.mulf %175, %176 : vector<4x4xf32>
    %178 = vector.broadcast %3 : vector<1x4xf32> to vector<4x4xf32>
    %179 = arith.addf %177, %178 : vector<4x4xf32>
    %cst_50 = arith.constant dense<0xFF800000> : vector<4xf32>
    %180 = vector.multi_reduction <maximumf>, %179, %cst_50 [1] : vector<4x4xf32> to vector<4xf32>
    %181 = vector.shape_cast %180 : vector<4xf32> to vector<4x1xf32>
    %182 = vector.broadcast %181 : vector<4x1xf32> to vector<4x4xf32>
    %183 = arith.subf %179, %182 : vector<4x4xf32>
    %184 = math.exp %183 : vector<4x4xf32>
    %cst_51 = arith.constant dense<0.000000e+00> : vector<4xf32>
    %185 = vector.multi_reduction <add>, %184, %cst_51 [1] : vector<4x4xf32> to vector<4xf32>
    %186 = vector.shape_cast %185 : vector<4xf32> to vector<4x1xf32>
    %187 = tpu.reciprocal %186 {approx = true} : vector<4x1xf32> -> vector<4x1xf32>
    %188 = vector.broadcast %187 : vector<4x1xf32> to vector<4x4xf32>
    %189 = arith.mulf %184, %188 : vector<4x4xf32>
    %190 = vector.broadcast %170 : vector<1x128xf32> to vector<4x128xf32>
    %191 = arith.mulf %12, %190 : vector<4x128xf32>
    %192 = arith.truncf %189 : vector<4x4xf32> to vector<4x4xbf16>
    %193 = arith.truncf %191 : vector<4x128xf32> to vector<4x128xbf16>
    %cst_52 = arith.constant dense<0.000000e+00> : vector<4x128xf32>
    %194 = tpu.matmul %192, %193, %cst_52 {dimension_numbers = #tpu.dot_dimension_numbers<[1], [0], [0], [1], [0, 0, 1, 1], [], []>} : vector<4x4xbf16>, vector<4x128xbf16>, vector<4x128xf32> -> vector<4x128xf32>
    %195 = arith.addf %169, %194 : vector<4x128xf32>
    %c7 = arith.constant 7 : index
    %c0_53 = arith.constant 0 : index
    %196 = vector.load %arg3[%c7, %c0_53] : memref<8x128xf32, #tpu.memory_space<vmem>>, vector<1x128xf32>
    %197 = vector.broadcast %196 : vector<1x128xf32> to vector<4x128xf32>
    %198 = arith.mulf %10, %197 : vector<4x128xf32>
    %199 = arith.truncf %198 : vector<4x128xf32> to vector<4x128xbf16>
    %200 = arith.truncf %11 : vector<4x128xf32> to vector<4x128xbf16>
    %cst_54 = arith.constant dense<0.000000e+00> : vector<4x4xf32>
    %201 = tpu.matmul %199, %200, %cst_54 {dimension_numbers = #tpu.dot_dimension_numbers<[1], [1], [0], [0], [0, 0, 1, 0], [], []>} : vector<4x128xbf16>, vector<4x128xbf16>, vector<4x4xf32> -> vector<4x4xf32>
    %cst_55 = arith.constant 2.500000e-01 : f32
    %202 = vector.broadcast %cst_55 : f32 to vector<4x4xf32>
    %203 = arith.mulf %201, %202 : vector<4x4xf32>
    %204 = vector.broadcast %3 : vector<1x4xf32> to vector<4x4xf32>
    %205 = arith.addf %203, %204 : vector<4x4xf32>
    %cst_56 = arith.constant dense<0xFF800000> : vector<4xf32>
    %206 = vector.multi_reduction <maximumf>, %205, %cst_56 [1] : vector<4x4xf32> to vector<4xf32>
    %207 = vector.shape_cast %206 : vector<4xf32> to vector<4x1xf32>
    %208 = vector.broadcast %207 : vector<4x1xf32> to vector<4x4xf32>
    %209 = arith.subf %205, %208 : vector<4x4xf32>
    %210 = math.exp %209 : vector<4x4xf32>
    %cst_57 = arith.constant dense<0.000000e+00> : vector<4xf32>
    %211 = vector.multi_reduction <add>, %210, %cst_57 [1] : vector<4x4xf32> to vector<4xf32>
    %212 = vector.shape_cast %211 : vector<4xf32> to vector<4x1xf32>
    %213 = tpu.reciprocal %212 {approx = true} : vector<4x1xf32> -> vector<4x1xf32>
    %214 = vector.broadcast %213 : vector<4x1xf32> to vector<4x4xf32>
    %215 = arith.mulf %210, %214 : vector<4x4xf32>
    %216 = vector.broadcast %196 : vector<1x128xf32> to vector<4x128xf32>
    %217 = arith.mulf %12, %216 : vector<4x128xf32>
    %218 = arith.truncf %215 : vector<4x4xf32> to vector<4x4xbf16>
    %219 = arith.truncf %217 : vector<4x128xf32> to vector<4x128xbf16>
    %cst_58 = arith.constant dense<0.000000e+00> : vector<4x128xf32>
    %220 = tpu.matmul %218, %219, %cst_58 {dimension_numbers = #tpu.dot_dimension_numbers<[1], [0], [0], [1], [0, 0, 1, 1], [], []>} : vector<4x4xbf16>, vector<4x128xbf16>, vector<4x128xf32> -> vector<4x128xf32>
    %221 = arith.addf %195, %220 : vector<4x128xf32>
    %c0_59 = arith.constant 0 : index
    %c0_60 = arith.constant 0 : index
    %222 = vector.load %arg6[%c0_59, %c0_60] : memref<128x128xbf16, #tpu.memory_space<vmem>>, vector<128x128xbf16>
    %223 = arith.truncf %221 : vector<4x128xf32> to vector<4x128xbf16>
    %cst_61 = arith.constant dense<0.000000e+00> : vector<4x128xf32>
    %224 = tpu.matmul %223, %222, %cst_61 {dimension_numbers = #tpu.dot_dimension_numbers<[1], [0], [0], [1], [0, 0, 1, 1], [], []>} : vector<4x128xbf16>, vector<128x128xbf16>, vector<4x128xf32> -> vector<4x128xf32>
    %c0_62 = arith.constant 0 : index
    %c0_63 = arith.constant 0 : index
    %225 = vector.load %arg7[%c0_62, %c0_63] : memref<1x128xf32, #tpu.memory_space<vmem>>, vector<1x128xf32>
    %226 = vector.broadcast %225 : vector<1x128xf32> to vector<4x128xf32>
    %227 = arith.addf %224, %226 : vector<4x128xf32>
    %228 = arith.addf %1, %227 : vector<4x128xf32>
    %c0_64 = arith.constant 0 : index
    %c0_65 = arith.constant 0 : index
    %229 = vector.load %arg12[%c0_64, %c0_65] : memref<1x128xf32, #tpu.memory_space<vmem>>, vector<1x128xf32>
    %c0_66 = arith.constant 0 : index
    %c0_67 = arith.constant 0 : index
    %230 = vector.load %arg13[%c0_66, %c0_67] : memref<1x128xf32, #tpu.memory_space<vmem>>, vector<1x128xf32>
    %cst_68 = arith.constant dense<0.000000e+00> : vector<4xf32>
    %231 = vector.multi_reduction <add>, %228, %cst_68 [1] : vector<4x128xf32> to vector<4xf32>
    %232 = vector.shape_cast %231 : vector<4xf32> to vector<4x1xf32>
    %cst_69 = arith.constant 1.280000e+02 : f32
    %233 = vector.broadcast %cst_69 : f32 to vector<4x1xf32>
    %234 = arith.divf %232, %233 : vector<4x1xf32>
    %235 = vector.broadcast %234 : vector<4x1xf32> to vector<4x128xf32>
    %236 = arith.subf %228, %235 : vector<4x128xf32>
    %237 = arith.mulf %236, %236 : vector<4x128xf32>
    %cst_70 = arith.constant dense<0.000000e+00> : vector<4xf32>
    %238 = vector.multi_reduction <add>, %237, %cst_70 [1] : vector<4x128xf32> to vector<4xf32>
    %239 = vector.shape_cast %238 : vector<4xf32> to vector<4x1xf32>
    %cst_71 = arith.constant 1.280000e+02 : f32
    %240 = vector.broadcast %cst_71 : f32 to vector<4x1xf32>
    %241 = arith.divf %239, %240 : vector<4x1xf32>
    %cst_72 = arith.constant 9.99999974E-6 : f32
    %242 = vector.broadcast %cst_72 : f32 to vector<4x1xf32>
    %243 = arith.addf %241, %242 : vector<4x1xf32>
    %244 = math.rsqrt %243 : vector<4x1xf32>
    %245 = vector.broadcast %244 : vector<4x1xf32> to vector<4x128xf32>
    %246 = arith.mulf %236, %245 : vector<4x128xf32>
    %247 = vector.broadcast %229 : vector<1x128xf32> to vector<4x128xf32>
    %248 = arith.mulf %246, %247 : vector<4x128xf32>
    %249 = vector.broadcast %230 : vector<1x128xf32> to vector<4x128xf32>
    %250 = arith.addf %248, %249 : vector<4x128xf32>
    %c0_73 = arith.constant 0 : index
    %c0_74 = arith.constant 0 : index
    %251 = vector.load %arg8[%c0_73, %c0_74] : memref<128x512xbf16, #tpu.memory_space<vmem>>, vector<128x512xbf16>
    %252 = arith.truncf %250 : vector<4x128xf32> to vector<4x128xbf16>
    %cst_75 = arith.constant dense<0.000000e+00> : vector<4x512xf32>
    %253 = tpu.matmul %252, %251, %cst_75 {dimension_numbers = #tpu.dot_dimension_numbers<[1], [0], [0], [1], [0, 0, 1, 1], [], []>} : vector<4x128xbf16>, vector<128x512xbf16>, vector<4x512xf32> -> vector<4x512xf32>
    %c0_76 = arith.constant 0 : index
    %c0_77 = arith.constant 0 : index
    %254 = vector.load %arg9[%c0_76, %c0_77] : memref<1x512xf32, #tpu.memory_space<vmem>>, vector<1x512xf32>
    %255 = vector.broadcast %254 : vector<1x512xf32> to vector<4x512xf32>
    %256 = arith.addf %253, %255 : vector<4x512xf32>
    %c0_78 = arith.constant 0 : index
    %c0_79 = arith.constant 0 : index
    %257 = vector.load %arg10[%c0_78, %c0_79] : memref<512x128xbf16, #tpu.memory_space<vmem>>, vector<512x128xbf16>
    %258 = arith.truncf %256 : vector<4x512xf32> to vector<4x512xbf16>
    %cst_80 = arith.constant dense<0.000000e+00> : vector<4x128xf32>
    %259 = tpu.matmul %258, %257, %cst_80 {dimension_numbers = #tpu.dot_dimension_numbers<[1], [0], [0], [1], [0, 0, 1, 1], [], []>} : vector<4x512xbf16>, vector<512x128xbf16>, vector<4x128xf32> -> vector<4x128xf32>
    %c0_81 = arith.constant 0 : index
    %c0_82 = arith.constant 0 : index
    %260 = vector.load %arg11[%c0_81, %c0_82] : memref<1x128xf32, #tpu.memory_space<vmem>>, vector<1x128xf32>
    %261 = vector.broadcast %260 : vector<1x128xf32> to vector<4x128xf32>
    %262 = arith.addf %259, %261 : vector<4x128xf32>
    %263 = arith.addf %250, %262 : vector<4x128xf32>
    %c0_83 = arith.constant 0 : index
    %c0_84 = arith.constant 0 : index
    %264 = vector.load %arg14[%c0_83, %c0_84] : memref<1x128xf32, #tpu.memory_space<vmem>>, vector<1x128xf32>
    %c0_85 = arith.constant 0 : index
    %c0_86 = arith.constant 0 : index
    %265 = vector.load %arg15[%c0_85, %c0_86] : memref<1x128xf32, #tpu.memory_space<vmem>>, vector<1x128xf32>
    %cst_87 = arith.constant dense<0.000000e+00> : vector<4xf32>
    %266 = vector.multi_reduction <add>, %263, %cst_87 [1] : vector<4x128xf32> to vector<4xf32>
    %267 = vector.shape_cast %266 : vector<4xf32> to vector<4x1xf32>
    %cst_88 = arith.constant 1.280000e+02 : f32
    %268 = vector.broadcast %cst_88 : f32 to vector<4x1xf32>
    %269 = arith.divf %267, %268 : vector<4x1xf32>
    %270 = vector.broadcast %269 : vector<4x1xf32> to vector<4x128xf32>
    %271 = arith.subf %263, %270 : vector<4x128xf32>
    %272 = arith.mulf %271, %271 : vector<4x128xf32>
    %cst_89 = arith.constant dense<0.000000e+00> : vector<4xf32>
    %273 = vector.multi_reduction <add>, %272, %cst_89 [1] : vector<4x128xf32> to vector<4xf32>
    %274 = vector.shape_cast %273 : vector<4xf32> to vector<4x1xf32>
    %cst_90 = arith.constant 1.280000e+02 : f32
    %275 = vector.broadcast %cst_90 : f32 to vector<4x1xf32>
    %276 = arith.divf %274, %275 : vector<4x1xf32>
    %cst_91 = arith.constant 9.99999974E-6 : f32
    %277 = vector.broadcast %cst_91 : f32 to vector<4x1xf32>
    %278 = arith.addf %276, %277 : vector<4x1xf32>
    %279 = math.rsqrt %278 : vector<4x1xf32>
    %280 = vector.broadcast %279 : vector<4x1xf32> to vector<4x128xf32>
    %281 = arith.mulf %271, %280 : vector<4x128xf32>
    %282 = vector.broadcast %264 : vector<1x128xf32> to vector<4x128xf32>
    %283 = arith.mulf %281, %282 : vector<4x128xf32>
    %284 = vector.broadcast %265 : vector<1x128xf32> to vector<4x128xf32>
    %285 = arith.addf %283, %284 : vector<4x128xf32>
    %c0_92 = arith.constant 0 : index
    %c0_93 = arith.constant 0 : index
    %c0_94 = arith.constant 0 : index
    %286 = vector.load %arg16[%c0_92, %c0_93, %c0_94] : memref<1x4x128xf32, #tpu.memory_space<vmem>>, vector<1x4x128xf32>
    %287 = vector.shape_cast %286 : vector<1x4x128xf32> to vector<4x128xf32>
    %288 = vector.shape_cast %285 : vector<4x128xf32> to vector<1x4x128xf32>
    tpu.vector_store %arg16[%c0_92, %c0_93, %c0_94], %288 {strides = array<i32>} : memref<1x4x128xf32, #tpu.memory_space<vmem>>, vector<1x4x128xf32>,
    return
  }
  func.func @transform_0(%arg0: i32) -> (i32, i32, i32) {
    %c0_i32 = arith.constant 0 : i32
    %c0_i32_0 = arith.constant 0 : i32
    %c0_i32_1 = arith.constant 0 : i32
    return %arg0, %c0_i32, %c0_i32_0 : i32, i32, i32
  }
  func.func @transform_1(%arg0: i32) -> (i32, i32, i32) {
    %c0_i32 = arith.constant 0 : i32
    %c0_i32_0 = arith.constant 0 : i32
    %c0_i32_1 = arith.constant 0 : i32
    return %arg0, %c0_i32, %c0_i32_0 : i32, i32, i32
  }
  func.func @transform_2(%arg0: i32) -> (i32, i32) {
    %c0_i32 = arith.constant 0 : i32
    %c0_i32_0 = arith.constant 0 : i32
    %c0_i32_1 = arith.constant 0 : i32
    return %c0_i32, %c0_i32_0 : i32, i32
  }
  func.func @transform_3(%arg0: i32) -> (i32, i32) {
    %c0_i32 = arith.constant 0 : i32
    %c0_i32_0 = arith.constant 0 : i32
    %c0_i32_1 = arith.constant 0 : i32
    return %c0_i32, %c0_i32_0 : i32, i32
  }
  func.func @transform_4(%arg0: i32) -> (i32, i32) {
    %c0_i32 = arith.constant 0 : i32
    %c0_i32_0 = arith.constant 0 : i32
    %c0_i32_1 = arith.constant 0 : i32
    return %c0_i32, %c0_i32_0 : i32, i32
  }
  func.func @transform_5(%arg0: i32) -> (i32, i32) {
    %c0_i32 = arith.constant 0 : i32
    %c0_i32_0 = arith.constant 0 : i32
    %c0_i32_1 = arith.constant 0 : i32
    return %c0_i32, %c0_i32_0 : i32, i32
  }
  func.func @transform_6(%arg0: i32) -> (i32, i32) {
    %c0_i32 = arith.constant 0 : i32
    %c0_i32_0 = arith.constant 0 : i32
    %c0_i32_1 = arith.constant 0 : i32
    return %c0_i32, %c0_i32_0 : i32, i32
  }
  func.func @transform_7(%arg0: i32) -> (i32, i32) {
    %c0_i32 = arith.constant 0 : i32
    %c0_i32_0 = arith.constant 0 : i32
    %c0_i32_1 = arith.constant 0 : i32
    return %c0_i32, %c0_i32_0 : i32, i32
  }
  func.func @transform_8(%arg0: i32) -> (i32, i32) {
    %c0_i32 = arith.constant 0 : i32
    %c0_i32_0 = arith.constant 0 : i32
    %c0_i32_1 = arith.constant 0 : i32
    return %c0_i32, %c0_i32_0 : i32, i32
  }
  func.func @transform_9(%arg0: i32) -> (i32, i32) {
    %c0_i32 = arith.constant 0 : i32
    %c0_i32_0 = arith.constant 0 : i32
    %c0_i32_1 = arith.constant 0 : i32
    return %c0_i32, %c0_i32_0 : i32, i32
  }
  func.func @transform_10(%arg0: i32) -> (i32, i32) {
    %c0_i32 = arith.constant 0 : i32
    %c0_i32_0 = arith.constant 0 : i32
    %c0_i32_1 = arith.constant 0 : i32
    return %c0_i32, %c0_i32_0 : i32, i32
  }
  func.func @transform_11(%arg0: i32) -> (i32, i32) {
    %c0_i32 = arith.constant 0 : i32
    %c0_i32_0 = arith.constant 0 : i32
    %c0_i32_1 = arith.constant 0 : i32
    return %c0_i32, %c0_i32_0 : i32, i32
  }
  func.func @transform_12(%arg0: i32) -> (i32, i32) {
    %c0_i32 = arith.constant 0 : i32
    %c0_i32_0 = arith.constant 0 : i32
    %c0_i32_1 = arith.constant 0 : i32
    return %c0_i32, %c0_i32_0 : i32, i32
  }
  func.func @transform_13(%arg0: i32) -> (i32, i32) {
    %c0_i32 = arith.constant 0 : i32
    %c0_i32_0 = arith.constant 0 : i32
    %c0_i32_1 = arith.constant 0 : i32
    return %c0_i32, %c0_i32_0 : i32, i32
  }
  func.func @transform_14(%arg0: i32) -> (i32, i32) {
    %c0_i32 = arith.constant 0 : i32
    %c0_i32_0 = arith.constant 0 : i32
    %c0_i32_1 = arith.constant 0 : i32
    return %c0_i32, %c0_i32_0 : i32, i32
  }
  func.func @transform_15(%arg0: i32) -> (i32, i32, i32) {
    %c0_i32 = arith.constant 0 : i32
    %c0_i32_0 = arith.constant 0 : i32
    %c0_i32_1 = arith.constant 0 : i32
    return %arg0, %c0_i32, %c0_i32_0 : i32, i32, i32
  }
}

module attributes {stable_mosaic.version = 11 : i64} {
  func.func @_tail_kernel(%arg0: i32, %arg1: memref<1x4x128xf32, #tpu.memory_space<vmem>>, %arg2: memref<1x16x128xf32, #tpu.memory_space<vmem>>, %arg3: memref<1x1x4xf32, #tpu.memory_space<vmem>>, %arg4: memref<4x128xbf16, #tpu.memory_space<vmem>>, %arg5: memref<1x128xf32, #tpu.memory_space<vmem>>, %arg6: memref<384x128xbf16, #tpu.memory_space<vmem>>, %arg7: memref<1x128xf32, #tpu.memory_space<vmem>>, %arg8: memref<128x4xbf16, #tpu.memory_space<vmem>>, %arg9: memref<1x4xf32, #tpu.memory_space<vmem>>, %arg10: memref<1x1x4xf32, #tpu.memory_space<vmem>>) attributes {dimension_semantics = [#tpu.dimension_semantics<parallel>], iteration_bounds = array<i64: 2>, scalar_prefetch = 0 : i64, scratch_operands = 0 : i64, tpu.core_type = #tpu.core_type<tc>, window_params = [{transform_indices = @transform_0, window_bounds = array<i64: 1, 4, 128>}, {transform_indices = @transform_1, window_bounds = array<i64: 1, 16, 128>}, {transform_indices = @transform_2, window_bounds = array<i64: 1, 1, 4>}, {pipeline_mode = #tpu.pipeline_mode<synchronous>, transform_indices = @transform_3, window_bounds = array<i64: 4, 128>}, {pipeline_mode = #tpu.pipeline_mode<synchronous>, transform_indices = @transform_4, window_bounds = array<i64: 1, 128>}, {pipeline_mode = #tpu.pipeline_mode<synchronous>, transform_indices = @transform_5, window_bounds = array<i64: 384, 128>}, {pipeline_mode = #tpu.pipeline_mode<synchronous>, transform_indices = @transform_6, window_bounds = array<i64: 1, 128>}, {pipeline_mode = #tpu.pipeline_mode<synchronous>, transform_indices = @transform_7, window_bounds = array<i64: 128, 4>}, {pipeline_mode = #tpu.pipeline_mode<synchronous>, transform_indices = @transform_8, window_bounds = array<i64: 1, 4>}, {transform_indices = @transform_9, window_bounds = array<i64: 1, 1, 4>}]} {
    %c0 = arith.constant 0 : index
    %c0_0 = arith.constant 0 : index
    %c0_1 = arith.constant 0 : index
    %0 = vector.load %arg1[%c0, %c0_0, %c0_1] : memref<1x4x128xf32, #tpu.memory_space<vmem>>, vector<1x4x128xf32>
    %1 = vector.shape_cast %0 : vector<1x4x128xf32> to vector<4x128xf32>
    %cst = arith.constant dense<0.000000e+00> : vector<128xf32>
    %2 = vector.multi_reduction <add>, %1, %cst [0] : vector<4x128xf32> to vector<128xf32>
    %3 = vector.shape_cast %2 : vector<128xf32> to vector<1x128xf32>
    %cst_2 = arith.constant 2.500000e-01 : f32
    %4 = vector.broadcast %cst_2 : f32 to vector<1x128xf32>
    %5 = arith.mulf %3, %4 : vector<1x128xf32>
    %c0_3 = arith.constant 0 : index
    %c0_4 = arith.constant 0 : index
    %c0_5 = arith.constant 0 : index
    %6 = vector.load %arg2[%c0_3, %c0_4, %c0_5] : memref<1x16x128xf32, #tpu.memory_space<vmem>>, vector<1x16x128xf32>
    %7 = vector.shape_cast %6 : vector<1x16x128xf32> to vector<16x128xf32>
    %cst_6 = arith.constant dense<0.000000e+00> : vector<128xf32>
    %8 = vector.multi_reduction <add>, %7, %cst_6 [0] : vector<16x128xf32> to vector<128xf32>
    %9 = vector.shape_cast %8 : vector<128xf32> to vector<1x128xf32>
    %cst_7 = arith.constant 6.250000e-02 : f32
    %10 = vector.broadcast %cst_7 : f32 to vector<1x128xf32>
    %11 = arith.mulf %9, %10 : vector<1x128xf32>
    %c0_8 = arith.constant 0 : index
    %c0_9 = arith.constant 0 : index
    %c0_10 = arith.constant 0 : index
    %12 = vector.load %arg3[%c0_8, %c0_9, %c0_10] : memref<1x1x4xf32, #tpu.memory_space<vmem>>, vector<1x1x4xf32>
    %13 = vector.shape_cast %12 : vector<1x1x4xf32> to vector<1x4xf32>
    %c0_11 = arith.constant 0 : index
    %c0_12 = arith.constant 0 : index
    %14 = vector.load %arg4[%c0_11, %c0_12] : memref<4x128xbf16, #tpu.memory_space<vmem>>, vector<4x128xbf16>
    %15 = arith.truncf %13 : vector<1x4xf32> to vector<1x4xbf16>
    %cst_13 = arith.constant dense<0.000000e+00> : vector<1x128xf32>
    %16 = tpu.matmul %15, %14, %cst_13 {dimension_numbers = #tpu.dot_dimension_numbers<[1], [0], [0], [1], [0, 0, 1, 1], [], []>} : vector<1x4xbf16>, vector<4x128xbf16>, vector<1x128xf32> -> vector<1x128xf32>
    %c0_14 = arith.constant 0 : index
    %c0_15 = arith.constant 0 : index
    %17 = vector.load %arg5[%c0_14, %c0_15] : memref<1x128xf32, #tpu.memory_space<vmem>>, vector<1x128xf32>
    %18 = arith.addf %16, %17 : vector<1x128xf32>
    %19 = tpu.concatenate %5, %11, %18 in 1 : vector<1x128xf32>, vector<1x128xf32>, vector<1x128xf32> -> vector<1x384xf32>
    %c0_16 = arith.constant 0 : index
    %c0_17 = arith.constant 0 : index
    %20 = vector.load %arg6[%c0_16, %c0_17] : memref<384x128xbf16, #tpu.memory_space<vmem>>, vector<384x128xbf16>
    %21 = arith.truncf %19 : vector<1x384xf32> to vector<1x384xbf16>
    %cst_18 = arith.constant dense<0.000000e+00> : vector<1x128xf32>
    %22 = tpu.matmul %21, %20, %cst_18 {dimension_numbers = #tpu.dot_dimension_numbers<[1], [0], [0], [1], [0, 0, 1, 1], [], []>} : vector<1x384xbf16>, vector<384x128xbf16>, vector<1x128xf32> -> vector<1x128xf32>
    %c0_19 = arith.constant 0 : index
    %c0_20 = arith.constant 0 : index
    %23 = vector.load %arg7[%c0_19, %c0_20] : memref<1x128xf32, #tpu.memory_space<vmem>>, vector<1x128xf32>
    %24 = arith.addf %22, %23 : vector<1x128xf32>
    %c0_21 = arith.constant 0 : index
    %c0_22 = arith.constant 0 : index
    %25 = vector.load %arg8[%c0_21, %c0_22] : memref<128x4xbf16, #tpu.memory_space<vmem>>, vector<128x4xbf16>
    %26 = arith.truncf %24 : vector<1x128xf32> to vector<1x128xbf16>
    %cst_23 = arith.constant dense<0.000000e+00> : vector<1x4xf32>
    %27 = tpu.matmul %26, %25, %cst_23 {dimension_numbers = #tpu.dot_dimension_numbers<[1], [0], [0], [1], [0, 0, 1, 1], [], []>} : vector<1x128xbf16>, vector<128x4xbf16>, vector<1x4xf32> -> vector<1x4xf32>
    %c0_24 = arith.constant 0 : index
    %c0_25 = arith.constant 0 : index
    %28 = vector.load %arg9[%c0_24, %c0_25] : memref<1x4xf32, #tpu.memory_space<vmem>>, vector<1x4xf32>
    %29 = arith.addf %27, %28 : vector<1x4xf32>
    %c0_26 = arith.constant 0 : index
    %c0_27 = arith.constant 0 : index
    %c0_28 = arith.constant 0 : index
    %30 = vector.load %arg10[%c0_26, %c0_27, %c0_28] : memref<1x1x4xf32, #tpu.memory_space<vmem>>, vector<1x1x4xf32>
    %31 = vector.shape_cast %30 : vector<1x1x4xf32> to vector<1x4xf32>
    %32 = vector.shape_cast %29 : vector<1x4xf32> to vector<1x1x4xf32>
    tpu.vector_store %arg10[%c0_26, %c0_27, %c0_28], %32 {strides = array<i32>} : memref<1x1x4xf32, #tpu.memory_space<vmem>>, vector<1x1x4xf32>,
    return
  }
  func.func @transform_0(%arg0: i32) -> (i32, i32, i32) {
    %c0_i32 = arith.constant 0 : i32
    %c0_i32_0 = arith.constant 0 : i32
    %c0_i32_1 = arith.constant 0 : i32
    return %arg0, %c0_i32, %c0_i32_0 : i32, i32, i32
  }
  func.func @transform_1(%arg0: i32) -> (i32, i32, i32) {
    %c0_i32 = arith.constant 0 : i32
    %c0_i32_0 = arith.constant 0 : i32
    %c0_i32_1 = arith.constant 0 : i32
    return %arg0, %c0_i32, %c0_i32_0 : i32, i32, i32
  }
  func.func @transform_2(%arg0: i32) -> (i32, i32, i32) {
    %c0_i32 = arith.constant 0 : i32
    %c0_i32_0 = arith.constant 0 : i32
    %c0_i32_1 = arith.constant 0 : i32
    return %arg0, %c0_i32, %c0_i32_0 : i32, i32, i32
  }
  func.func @transform_3(%arg0: i32) -> (i32, i32) {
    %c0_i32 = arith.constant 0 : i32
    %c0_i32_0 = arith.constant 0 : i32
    %c0_i32_1 = arith.constant 0 : i32
    return %c0_i32, %c0_i32_0 : i32, i32
  }
  func.func @transform_4(%arg0: i32) -> (i32, i32) {
    %c0_i32 = arith.constant 0 : i32
    %c0_i32_0 = arith.constant 0 : i32
    %c0_i32_1 = arith.constant 0 : i32
    return %c0_i32, %c0_i32_0 : i32, i32
  }
  func.func @transform_5(%arg0: i32) -> (i32, i32) {
    %c0_i32 = arith.constant 0 : i32
    %c0_i32_0 = arith.constant 0 : i32
    %c0_i32_1 = arith.constant 0 : i32
    return %c0_i32, %c0_i32_0 : i32, i32
  }
  func.func @transform_6(%arg0: i32) -> (i32, i32) {
    %c0_i32 = arith.constant 0 : i32
    %c0_i32_0 = arith.constant 0 : i32
    %c0_i32_1 = arith.constant 0 : i32
    return %c0_i32, %c0_i32_0 : i32, i32
  }
  func.func @transform_7(%arg0: i32) -> (i32, i32) {
    %c0_i32 = arith.constant 0 : i32
    %c0_i32_0 = arith.constant 0 : i32
    %c0_i32_1 = arith.constant 0 : i32
    return %c0_i32, %c0_i32_0 : i32, i32
  }
  func.func @transform_8(%arg0: i32) -> (i32, i32) {
    %c0_i32 = arith.constant 0 : i32
    %c0_i32_0 = arith.constant 0 : i32
    %c0_i32_1 = arith.constant 0 : i32
    return %c0_i32, %c0_i32_0 : i32, i32
  }
  func.func @transform_9(%arg0: i32) -> (i32, i32, i32) {
    %c0_i32 = arith.constant 0 : i32
    %c0_i32_0 = arith.constant 0 : i32
    %c0_i32_1 = arith.constant 0 : i32
    return %arg0, %c0_i32, %c0_i32_0 : i32, i32, i32
  }
}

module attributes {stable_mosaic.version = 11 : i64} {
  func.func @_encoder_layer_kernel(%arg0: i32, %arg1: memref<1x16x128xf32, #tpu.memory_space<vmem>>, %arg2: memref<1x1x16xf32, #tpu.memory_space<vmem>>, %arg3: memref<8x128xf32, #tpu.memory_space<vmem>>, %arg4: memref<128x384xbf16, #tpu.memory_space<vmem>>, %arg5: memref<1x384xf32, #tpu.memory_space<vmem>>, %arg6: memref<128x128xbf16, #tpu.memory_space<vmem>>, %arg7: memref<1x128xf32, #tpu.memory_space<vmem>>, %arg8: memref<128x512xbf16, #tpu.memory_space<vmem>>, %arg9: memref<1x512xf32, #tpu.memory_space<vmem>>, %arg10: memref<512x128xbf16, #tpu.memory_space<vmem>>, %arg11: memref<1x128xf32, #tpu.memory_space<vmem>>, %arg12: memref<1x128xf32, #tpu.memory_space<vmem>>, %arg13: memref<1x128xf32, #tpu.memory_space<vmem>>, %arg14: memref<1x128xf32, #tpu.memory_space<vmem>>, %arg15: memref<1x128xf32, #tpu.memory_space<vmem>>, %arg16: memref<1x16x128xf32, #tpu.memory_space<vmem>>) attributes {dimension_semantics = [#tpu.dimension_semantics<parallel>], iteration_bounds = array<i64: 2>, scalar_prefetch = 0 : i64, scratch_operands = 0 : i64, tpu.core_type = #tpu.core_type<tc>, window_params = [{transform_indices = @transform_0, window_bounds = array<i64: 1, 16, 128>}, {transform_indices = @transform_1, window_bounds = array<i64: 1, 1, 16>}, {pipeline_mode = #tpu.pipeline_mode<synchronous>, transform_indices = @transform_2, window_bounds = array<i64: 8, 128>}, {pipeline_mode = #tpu.pipeline_mode<synchronous>, transform_indices = @transform_3, window_bounds = array<i64: 128, 384>}, {pipeline_mode = #tpu.pipeline_mode<synchronous>, transform_indices = @transform_4, window_bounds = array<i64: 1, 384>}, {pipeline_mode = #tpu.pipeline_mode<synchronous>, transform_indices = @transform_5, window_bounds = array<i64: 128, 128>}, {pipeline_mode = #tpu.pipeline_mode<synchronous>, transform_indices = @transform_6, window_bounds = array<i64: 1, 128>}, {pipeline_mode = #tpu.pipeline_mode<synchronous>, transform_indices = @transform_7, window_bounds = array<i64: 128, 512>}, {pipeline_mode = #tpu.pipeline_mode<synchronous>, transform_indices = @transform_8, window_bounds = array<i64: 1, 512>}, {pipeline_mode = #tpu.pipeline_mode<synchronous>, transform_indices = @transform_9, window_bounds = array<i64: 512, 128>}, {pipeline_mode = #tpu.pipeline_mode<synchronous>, transform_indices = @transform_10, window_bounds = array<i64: 1, 128>}, {pipeline_mode = #tpu.pipeline_mode<synchronous>, transform_indices = @transform_11, window_bounds = array<i64: 1, 128>}, {pipeline_mode = #tpu.pipeline_mode<synchronous>, transform_indices = @transform_12, window_bounds = array<i64: 1, 128>}, {pipeline_mode = #tpu.pipeline_mode<synchronous>, transform_indices = @transform_13, window_bounds = array<i64: 1, 128>}, {pipeline_mode = #tpu.pipeline_mode<synchronous>, transform_indices = @transform_14, window_bounds = array<i64: 1, 128>}, {transform_indices = @transform_15, window_bounds = array<i64: 1, 16, 128>}]} {
    %c0 = arith.constant 0 : index
    %c0_0 = arith.constant 0 : index
    %c0_1 = arith.constant 0 : index
    %0 = vector.load %arg1[%c0, %c0_0, %c0_1] : memref<1x16x128xf32, #tpu.memory_space<vmem>>, vector<1x16x128xf32>
    %1 = vector.shape_cast %0 : vector<1x16x128xf32> to vector<16x128xf32>
    %c0_2 = arith.constant 0 : index
    %c0_3 = arith.constant 0 : index
    %c0_4 = arith.constant 0 : index
    %2 = vector.load %arg2[%c0_2, %c0_3, %c0_4] : memref<1x1x16xf32, #tpu.memory_space<vmem>>, vector<1x1x16xf32>
    %3 = vector.shape_cast %2 : vector<1x1x16xf32> to vector<1x16xf32>
    %c0_5 = arith.constant 0 : index
    %c0_6 = arith.constant 0 : index
    %4 = vector.load %arg4[%c0_5, %c0_6] : memref<128x384xbf16, #tpu.memory_space<vmem>>, vector<128x384xbf16>
    %5 = arith.truncf %1 : vector<16x128xf32> to vector<16x128xbf16>
    %cst = arith.constant dense<0.000000e+00> : vector<16x384xf32>
    %6 = tpu.matmul %5, %4, %cst {dimension_numbers = #tpu.dot_dimension_numbers<[1], [0], [0], [1], [0, 0, 1, 1], [], []>} : vector<16x128xbf16>, vector<128x384xbf16>, vector<16x384xf32> -> vector<16x384xf32>
    %c0_7 = arith.constant 0 : index
    %c0_8 = arith.constant 0 : index
    %7 = vector.load %arg5[%c0_7, %c0_8] : memref<1x384xf32, #tpu.memory_space<vmem>>, vector<1x384xf32>
    %8 = vector.broadcast %7 : vector<1x384xf32> to vector<16x384xf32>
    %9 = arith.addf %6, %8 : vector<16x384xf32>
    %10 = vector.extract_strided_slice %9 {offsets = [0, 0], sizes = [16, 128], strides = [1, 1]} : vector<16x384xf32> to vector<16x128xf32>
    %11 = vector.extract_strided_slice %9 {offsets = [0, 128], sizes = [16, 128], strides = [1, 1]} : vector<16x384xf32> to vector<16x128xf32>
    %12 = vector.extract_strided_slice %9 {offsets = [0, 256], sizes = [16, 128], strides = [1, 1]} : vector<16x384xf32> to vector<16x128xf32>
    %cst_9 = arith.constant 0.000000e+00 : f32
    %13 = vector.broadcast %cst_9 : f32 to vector<16x128xf32>
    %c0_10 = arith.constant 0 : index
    %c0_11 = arith.constant 0 : index
    %14 = vector.load %arg3[%c0_10, %c0_11] : memref<8x128xf32, #tpu.memory_space<vmem>>, vector<1x128xf32>
    %15 = vector.broadcast %14 : vector<1x128xf32> to vector<16x128xf32>
    %16 = arith.mulf %10, %15 : vector<16x128xf32>
    %17 = arith.truncf %16 : vector<16x128xf32> to vector<16x128xbf16>
    %18 = arith.truncf %11 : vector<16x128xf32> to vector<16x128xbf16>
    %cst_12 = arith.constant dense<0.000000e+00> : vector<16x16xf32>
    %19 = tpu.matmul %17, %18, %cst_12 {dimension_numbers = #tpu.dot_dimension_numbers<[1], [1], [0], [0], [0, 0, 1, 0], [], []>} : vector<16x128xbf16>, vector<16x128xbf16>, vector<16x16xf32> -> vector<16x16xf32>
    %cst_13 = arith.constant 2.500000e-01 : f32
    %20 = vector.broadcast %cst_13 : f32 to vector<16x16xf32>
    %21 = arith.mulf %19, %20 : vector<16x16xf32>
    %22 = vector.broadcast %3 : vector<1x16xf32> to vector<16x16xf32>
    %23 = arith.addf %21, %22 : vector<16x16xf32>
    %cst_14 = arith.constant dense<0xFF800000> : vector<16xf32>
    %24 = vector.multi_reduction <maximumf>, %23, %cst_14 [1] : vector<16x16xf32> to vector<16xf32>
    %25 = vector.shape_cast %24 : vector<16xf32> to vector<16x1xf32>
    %26 = vector.broadcast %25 : vector<16x1xf32> to vector<16x16xf32>
    %27 = arith.subf %23, %26 : vector<16x16xf32>
    %28 = math.exp %27 : vector<16x16xf32>
    %cst_15 = arith.constant dense<0.000000e+00> : vector<16xf32>
    %29 = vector.multi_reduction <add>, %28, %cst_15 [1] : vector<16x16xf32> to vector<16xf32>
    %30 = vector.shape_cast %29 : vector<16xf32> to vector<16x1xf32>
    %31 = tpu.reciprocal %30 {approx = true} : vector<16x1xf32> -> vector<16x1xf32>
    %32 = vector.broadcast %31 : vector<16x1xf32> to vector<16x16xf32>
    %33 = arith.mulf %28, %32 : vector<16x16xf32>
    %34 = vector.broadcast %14 : vector<1x128xf32> to vector<16x128xf32>
    %35 = arith.mulf %12, %34 : vector<16x128xf32>
    %36 = arith.truncf %33 : vector<16x16xf32> to vector<16x16xbf16>
    %37 = arith.truncf %35 : vector<16x128xf32> to vector<16x128xbf16>
    %cst_16 = arith.constant dense<0.000000e+00> : vector<16x128xf32>
    %38 = tpu.matmul %36, %37, %cst_16 {dimension_numbers = #tpu.dot_dimension_numbers<[1], [0], [0], [1], [0, 0, 1, 1], [], []>} : vector<16x16xbf16>, vector<16x128xbf16>, vector<16x128xf32> -> vector<16x128xf32>
    %39 = arith.addf %13, %38 : vector<16x128xf32>
    %c1 = arith.constant 1 : index
    %c0_17 = arith.constant 0 : index
    %40 = vector.load %arg3[%c1, %c0_17] : memref<8x128xf32, #tpu.memory_space<vmem>>, vector<1x128xf32>
    %41 = vector.broadcast %40 : vector<1x128xf32> to vector<16x128xf32>
    %42 = arith.mulf %10, %41 : vector<16x128xf32>
    %43 = arith.truncf %42 : vector<16x128xf32> to vector<16x128xbf16>
    %44 = arith.truncf %11 : vector<16x128xf32> to vector<16x128xbf16>
    %cst_18 = arith.constant dense<0.000000e+00> : vector<16x16xf32>
    %45 = tpu.matmul %43, %44, %cst_18 {dimension_numbers = #tpu.dot_dimension_numbers<[1], [1], [0], [0], [0, 0, 1, 0], [], []>} : vector<16x128xbf16>, vector<16x128xbf16>, vector<16x16xf32> -> vector<16x16xf32>
    %cst_19 = arith.constant 2.500000e-01 : f32
    %46 = vector.broadcast %cst_19 : f32 to vector<16x16xf32>
    %47 = arith.mulf %45, %46 : vector<16x16xf32>
    %48 = vector.broadcast %3 : vector<1x16xf32> to vector<16x16xf32>
    %49 = arith.addf %47, %48 : vector<16x16xf32>
    %cst_20 = arith.constant dense<0xFF800000> : vector<16xf32>
    %50 = vector.multi_reduction <maximumf>, %49, %cst_20 [1] : vector<16x16xf32> to vector<16xf32>
    %51 = vector.shape_cast %50 : vector<16xf32> to vector<16x1xf32>
    %52 = vector.broadcast %51 : vector<16x1xf32> to vector<16x16xf32>
    %53 = arith.subf %49, %52 : vector<16x16xf32>
    %54 = math.exp %53 : vector<16x16xf32>
    %cst_21 = arith.constant dense<0.000000e+00> : vector<16xf32>
    %55 = vector.multi_reduction <add>, %54, %cst_21 [1] : vector<16x16xf32> to vector<16xf32>
    %56 = vector.shape_cast %55 : vector<16xf32> to vector<16x1xf32>
    %57 = tpu.reciprocal %56 {approx = true} : vector<16x1xf32> -> vector<16x1xf32>
    %58 = vector.broadcast %57 : vector<16x1xf32> to vector<16x16xf32>
    %59 = arith.mulf %54, %58 : vector<16x16xf32>
    %60 = vector.broadcast %40 : vector<1x128xf32> to vector<16x128xf32>
    %61 = arith.mulf %12, %60 : vector<16x128xf32>
    %62 = arith.truncf %59 : vector<16x16xf32> to vector<16x16xbf16>
    %63 = arith.truncf %61 : vector<16x128xf32> to vector<16x128xbf16>
    %cst_22 = arith.constant dense<0.000000e+00> : vector<16x128xf32>
    %64 = tpu.matmul %62, %63, %cst_22 {dimension_numbers = #tpu.dot_dimension_numbers<[1], [0], [0], [1], [0, 0, 1, 1], [], []>} : vector<16x16xbf16>, vector<16x128xbf16>, vector<16x128xf32> -> vector<16x128xf32>
    %65 = arith.addf %39, %64 : vector<16x128xf32>
    %c2 = arith.constant 2 : index
    %c0_23 = arith.constant 0 : index
    %66 = vector.load %arg3[%c2, %c0_23] : memref<8x128xf32, #tpu.memory_space<vmem>>, vector<1x128xf32>
    %67 = vector.broadcast %66 : vector<1x128xf32> to vector<16x128xf32>
    %68 = arith.mulf %10, %67 : vector<16x128xf32>
    %69 = arith.truncf %68 : vector<16x128xf32> to vector<16x128xbf16>
    %70 = arith.truncf %11 : vector<16x128xf32> to vector<16x128xbf16>
    %cst_24 = arith.constant dense<0.000000e+00> : vector<16x16xf32>
    %71 = tpu.matmul %69, %70, %cst_24 {dimension_numbers = #tpu.dot_dimension_numbers<[1], [1], [0], [0], [0, 0, 1, 0], [], []>} : vector<16x128xbf16>, vector<16x128xbf16>, vector<16x16xf32> -> vector<16x16xf32>
    %cst_25 = arith.constant 2.500000e-01 : f32
    %72 = vector.broadcast %cst_25 : f32 to vector<16x16xf32>
    %73 = arith.mulf %71, %72 : vector<16x16xf32>
    %74 = vector.broadcast %3 : vector<1x16xf32> to vector<16x16xf32>
    %75 = arith.addf %73, %74 : vector<16x16xf32>
    %cst_26 = arith.constant dense<0xFF800000> : vector<16xf32>
    %76 = vector.multi_reduction <maximumf>, %75, %cst_26 [1] : vector<16x16xf32> to vector<16xf32>
    %77 = vector.shape_cast %76 : vector<16xf32> to vector<16x1xf32>
    %78 = vector.broadcast %77 : vector<16x1xf32> to vector<16x16xf32>
    %79 = arith.subf %75, %78 : vector<16x16xf32>
    %80 = math.exp %79 : vector<16x16xf32>
    %cst_27 = arith.constant dense<0.000000e+00> : vector<16xf32>
    %81 = vector.multi_reduction <add>, %80, %cst_27 [1] : vector<16x16xf32> to vector<16xf32>
    %82 = vector.shape_cast %81 : vector<16xf32> to vector<16x1xf32>
    %83 = tpu.reciprocal %82 {approx = true} : vector<16x1xf32> -> vector<16x1xf32>
    %84 = vector.broadcast %83 : vector<16x1xf32> to vector<16x16xf32>
    %85 = arith.mulf %80, %84 : vector<16x16xf32>
    %86 = vector.broadcast %66 : vector<1x128xf32> to vector<16x128xf32>
    %87 = arith.mulf %12, %86 : vector<16x128xf32>
    %88 = arith.truncf %85 : vector<16x16xf32> to vector<16x16xbf16>
    %89 = arith.truncf %87 : vector<16x128xf32> to vector<16x128xbf16>
    %cst_28 = arith.constant dense<0.000000e+00> : vector<16x128xf32>
    %90 = tpu.matmul %88, %89, %cst_28 {dimension_numbers = #tpu.dot_dimension_numbers<[1], [0], [0], [1], [0, 0, 1, 1], [], []>} : vector<16x16xbf16>, vector<16x128xbf16>, vector<16x128xf32> -> vector<16x128xf32>
    %91 = arith.addf %65, %90 : vector<16x128xf32>
    %c3 = arith.constant 3 : index
    %c0_29 = arith.constant 0 : index
    %92 = vector.load %arg3[%c3, %c0_29] : memref<8x128xf32, #tpu.memory_space<vmem>>, vector<1x128xf32>
    %93 = vector.broadcast %92 : vector<1x128xf32> to vector<16x128xf32>
    %94 = arith.mulf %10, %93 : vector<16x128xf32>
    %95 = arith.truncf %94 : vector<16x128xf32> to vector<16x128xbf16>
    %96 = arith.truncf %11 : vector<16x128xf32> to vector<16x128xbf16>
    %cst_30 = arith.constant dense<0.000000e+00> : vector<16x16xf32>
    %97 = tpu.matmul %95, %96, %cst_30 {dimension_numbers = #tpu.dot_dimension_numbers<[1], [1], [0], [0], [0, 0, 1, 0], [], []>} : vector<16x128xbf16>, vector<16x128xbf16>, vector<16x16xf32> -> vector<16x16xf32>
    %cst_31 = arith.constant 2.500000e-01 : f32
    %98 = vector.broadcast %cst_31 : f32 to vector<16x16xf32>
    %99 = arith.mulf %97, %98 : vector<16x16xf32>
    %100 = vector.broadcast %3 : vector<1x16xf32> to vector<16x16xf32>
    %101 = arith.addf %99, %100 : vector<16x16xf32>
    %cst_32 = arith.constant dense<0xFF800000> : vector<16xf32>
    %102 = vector.multi_reduction <maximumf>, %101, %cst_32 [1] : vector<16x16xf32> to vector<16xf32>
    %103 = vector.shape_cast %102 : vector<16xf32> to vector<16x1xf32>
    %104 = vector.broadcast %103 : vector<16x1xf32> to vector<16x16xf32>
    %105 = arith.subf %101, %104 : vector<16x16xf32>
    %106 = math.exp %105 : vector<16x16xf32>
    %cst_33 = arith.constant dense<0.000000e+00> : vector<16xf32>
    %107 = vector.multi_reduction <add>, %106, %cst_33 [1] : vector<16x16xf32> to vector<16xf32>
    %108 = vector.shape_cast %107 : vector<16xf32> to vector<16x1xf32>
    %109 = tpu.reciprocal %108 {approx = true} : vector<16x1xf32> -> vector<16x1xf32>
    %110 = vector.broadcast %109 : vector<16x1xf32> to vector<16x16xf32>
    %111 = arith.mulf %106, %110 : vector<16x16xf32>
    %112 = vector.broadcast %92 : vector<1x128xf32> to vector<16x128xf32>
    %113 = arith.mulf %12, %112 : vector<16x128xf32>
    %114 = arith.truncf %111 : vector<16x16xf32> to vector<16x16xbf16>
    %115 = arith.truncf %113 : vector<16x128xf32> to vector<16x128xbf16>
    %cst_34 = arith.constant dense<0.000000e+00> : vector<16x128xf32>
    %116 = tpu.matmul %114, %115, %cst_34 {dimension_numbers = #tpu.dot_dimension_numbers<[1], [0], [0], [1], [0, 0, 1, 1], [], []>} : vector<16x16xbf16>, vector<16x128xbf16>, vector<16x128xf32> -> vector<16x128xf32>
    %117 = arith.addf %91, %116 : vector<16x128xf32>
    %c4 = arith.constant 4 : index
    %c0_35 = arith.constant 0 : index
    %118 = vector.load %arg3[%c4, %c0_35] : memref<8x128xf32, #tpu.memory_space<vmem>>, vector<1x128xf32>
    %119 = vector.broadcast %118 : vector<1x128xf32> to vector<16x128xf32>
    %120 = arith.mulf %10, %119 : vector<16x128xf32>
    %121 = arith.truncf %120 : vector<16x128xf32> to vector<16x128xbf16>
    %122 = arith.truncf %11 : vector<16x128xf32> to vector<16x128xbf16>
    %cst_36 = arith.constant dense<0.000000e+00> : vector<16x16xf32>
    %123 = tpu.matmul %121, %122, %cst_36 {dimension_numbers = #tpu.dot_dimension_numbers<[1], [1], [0], [0], [0, 0, 1, 0], [], []>} : vector<16x128xbf16>, vector<16x128xbf16>, vector<16x16xf32> -> vector<16x16xf32>
    %cst_37 = arith.constant 2.500000e-01 : f32
    %124 = vector.broadcast %cst_37 : f32 to vector<16x16xf32>
    %125 = arith.mulf %123, %124 : vector<16x16xf32>
    %126 = vector.broadcast %3 : vector<1x16xf32> to vector<16x16xf32>
    %127 = arith.addf %125, %126 : vector<16x16xf32>
    %cst_38 = arith.constant dense<0xFF800000> : vector<16xf32>
    %128 = vector.multi_reduction <maximumf>, %127, %cst_38 [1] : vector<16x16xf32> to vector<16xf32>
    %129 = vector.shape_cast %128 : vector<16xf32> to vector<16x1xf32>
    %130 = vector.broadcast %129 : vector<16x1xf32> to vector<16x16xf32>
    %131 = arith.subf %127, %130 : vector<16x16xf32>
    %132 = math.exp %131 : vector<16x16xf32>
    %cst_39 = arith.constant dense<0.000000e+00> : vector<16xf32>
    %133 = vector.multi_reduction <add>, %132, %cst_39 [1] : vector<16x16xf32> to vector<16xf32>
    %134 = vector.shape_cast %133 : vector<16xf32> to vector<16x1xf32>
    %135 = tpu.reciprocal %134 {approx = true} : vector<16x1xf32> -> vector<16x1xf32>
    %136 = vector.broadcast %135 : vector<16x1xf32> to vector<16x16xf32>
    %137 = arith.mulf %132, %136 : vector<16x16xf32>
    %138 = vector.broadcast %118 : vector<1x128xf32> to vector<16x128xf32>
    %139 = arith.mulf %12, %138 : vector<16x128xf32>
    %140 = arith.truncf %137 : vector<16x16xf32> to vector<16x16xbf16>
    %141 = arith.truncf %139 : vector<16x128xf32> to vector<16x128xbf16>
    %cst_40 = arith.constant dense<0.000000e+00> : vector<16x128xf32>
    %142 = tpu.matmul %140, %141, %cst_40 {dimension_numbers = #tpu.dot_dimension_numbers<[1], [0], [0], [1], [0, 0, 1, 1], [], []>} : vector<16x16xbf16>, vector<16x128xbf16>, vector<16x128xf32> -> vector<16x128xf32>
    %143 = arith.addf %117, %142 : vector<16x128xf32>
    %c5 = arith.constant 5 : index
    %c0_41 = arith.constant 0 : index
    %144 = vector.load %arg3[%c5, %c0_41] : memref<8x128xf32, #tpu.memory_space<vmem>>, vector<1x128xf32>
    %145 = vector.broadcast %144 : vector<1x128xf32> to vector<16x128xf32>
    %146 = arith.mulf %10, %145 : vector<16x128xf32>
    %147 = arith.truncf %146 : vector<16x128xf32> to vector<16x128xbf16>
    %148 = arith.truncf %11 : vector<16x128xf32> to vector<16x128xbf16>
    %cst_42 = arith.constant dense<0.000000e+00> : vector<16x16xf32>
    %149 = tpu.matmul %147, %148, %cst_42 {dimension_numbers = #tpu.dot_dimension_numbers<[1], [1], [0], [0], [0, 0, 1, 0], [], []>} : vector<16x128xbf16>, vector<16x128xbf16>, vector<16x16xf32> -> vector<16x16xf32>
    %cst_43 = arith.constant 2.500000e-01 : f32
    %150 = vector.broadcast %cst_43 : f32 to vector<16x16xf32>
    %151 = arith.mulf %149, %150 : vector<16x16xf32>
    %152 = vector.broadcast %3 : vector<1x16xf32> to vector<16x16xf32>
    %153 = arith.addf %151, %152 : vector<16x16xf32>
    %cst_44 = arith.constant dense<0xFF800000> : vector<16xf32>
    %154 = vector.multi_reduction <maximumf>, %153, %cst_44 [1] : vector<16x16xf32> to vector<16xf32>
    %155 = vector.shape_cast %154 : vector<16xf32> to vector<16x1xf32>
    %156 = vector.broadcast %155 : vector<16x1xf32> to vector<16x16xf32>
    %157 = arith.subf %153, %156 : vector<16x16xf32>
    %158 = math.exp %157 : vector<16x16xf32>
    %cst_45 = arith.constant dense<0.000000e+00> : vector<16xf32>
    %159 = vector.multi_reduction <add>, %158, %cst_45 [1] : vector<16x16xf32> to vector<16xf32>
    %160 = vector.shape_cast %159 : vector<16xf32> to vector<16x1xf32>
    %161 = tpu.reciprocal %160 {approx = true} : vector<16x1xf32> -> vector<16x1xf32>
    %162 = vector.broadcast %161 : vector<16x1xf32> to vector<16x16xf32>
    %163 = arith.mulf %158, %162 : vector<16x16xf32>
    %164 = vector.broadcast %144 : vector<1x128xf32> to vector<16x128xf32>
    %165 = arith.mulf %12, %164 : vector<16x128xf32>
    %166 = arith.truncf %163 : vector<16x16xf32> to vector<16x16xbf16>
    %167 = arith.truncf %165 : vector<16x128xf32> to vector<16x128xbf16>
    %cst_46 = arith.constant dense<0.000000e+00> : vector<16x128xf32>
    %168 = tpu.matmul %166, %167, %cst_46 {dimension_numbers = #tpu.dot_dimension_numbers<[1], [0], [0], [1], [0, 0, 1, 1], [], []>} : vector<16x16xbf16>, vector<16x128xbf16>, vector<16x128xf32> -> vector<16x128xf32>
    %169 = arith.addf %143, %168 : vector<16x128xf32>
    %c6 = arith.constant 6 : index
    %c0_47 = arith.constant 0 : index
    %170 = vector.load %arg3[%c6, %c0_47] : memref<8x128xf32, #tpu.memory_space<vmem>>, vector<1x128xf32>
    %171 = vector.broadcast %170 : vector<1x128xf32> to vector<16x128xf32>
    %172 = arith.mulf %10, %171 : vector<16x128xf32>
    %173 = arith.truncf %172 : vector<16x128xf32> to vector<16x128xbf16>
    %174 = arith.truncf %11 : vector<16x128xf32> to vector<16x128xbf16>
    %cst_48 = arith.constant dense<0.000000e+00> : vector<16x16xf32>
    %175 = tpu.matmul %173, %174, %cst_48 {dimension_numbers = #tpu.dot_dimension_numbers<[1], [1], [0], [0], [0, 0, 1, 0], [], []>} : vector<16x128xbf16>, vector<16x128xbf16>, vector<16x16xf32> -> vector<16x16xf32>
    %cst_49 = arith.constant 2.500000e-01 : f32
    %176 = vector.broadcast %cst_49 : f32 to vector<16x16xf32>
    %177 = arith.mulf %175, %176 : vector<16x16xf32>
    %178 = vector.broadcast %3 : vector<1x16xf32> to vector<16x16xf32>
    %179 = arith.addf %177, %178 : vector<16x16xf32>
    %cst_50 = arith.constant dense<0xFF800000> : vector<16xf32>
    %180 = vector.multi_reduction <maximumf>, %179, %cst_50 [1] : vector<16x16xf32> to vector<16xf32>
    %181 = vector.shape_cast %180 : vector<16xf32> to vector<16x1xf32>
    %182 = vector.broadcast %181 : vector<16x1xf32> to vector<16x16xf32>
    %183 = arith.subf %179, %182 : vector<16x16xf32>
    %184 = math.exp %183 : vector<16x16xf32>
    %cst_51 = arith.constant dense<0.000000e+00> : vector<16xf32>
    %185 = vector.multi_reduction <add>, %184, %cst_51 [1] : vector<16x16xf32> to vector<16xf32>
    %186 = vector.shape_cast %185 : vector<16xf32> to vector<16x1xf32>
    %187 = tpu.reciprocal %186 {approx = true} : vector<16x1xf32> -> vector<16x1xf32>
    %188 = vector.broadcast %187 : vector<16x1xf32> to vector<16x16xf32>
    %189 = arith.mulf %184, %188 : vector<16x16xf32>
    %190 = vector.broadcast %170 : vector<1x128xf32> to vector<16x128xf32>
    %191 = arith.mulf %12, %190 : vector<16x128xf32>
    %192 = arith.truncf %189 : vector<16x16xf32> to vector<16x16xbf16>
    %193 = arith.truncf %191 : vector<16x128xf32> to vector<16x128xbf16>
    %cst_52 = arith.constant dense<0.000000e+00> : vector<16x128xf32>
    %194 = tpu.matmul %192, %193, %cst_52 {dimension_numbers = #tpu.dot_dimension_numbers<[1], [0], [0], [1], [0, 0, 1, 1], [], []>} : vector<16x16xbf16>, vector<16x128xbf16>, vector<16x128xf32> -> vector<16x128xf32>
    %195 = arith.addf %169, %194 : vector<16x128xf32>
    %c7 = arith.constant 7 : index
    %c0_53 = arith.constant 0 : index
    %196 = vector.load %arg3[%c7, %c0_53] : memref<8x128xf32, #tpu.memory_space<vmem>>, vector<1x128xf32>
    %197 = vector.broadcast %196 : vector<1x128xf32> to vector<16x128xf32>
    %198 = arith.mulf %10, %197 : vector<16x128xf32>
    %199 = arith.truncf %198 : vector<16x128xf32> to vector<16x128xbf16>
    %200 = arith.truncf %11 : vector<16x128xf32> to vector<16x128xbf16>
    %cst_54 = arith.constant dense<0.000000e+00> : vector<16x16xf32>
    %201 = tpu.matmul %199, %200, %cst_54 {dimension_numbers = #tpu.dot_dimension_numbers<[1], [1], [0], [0], [0, 0, 1, 0], [], []>} : vector<16x128xbf16>, vector<16x128xbf16>, vector<16x16xf32> -> vector<16x16xf32>
    %cst_55 = arith.constant 2.500000e-01 : f32
    %202 = vector.broadcast %cst_55 : f32 to vector<16x16xf32>
    %203 = arith.mulf %201, %202 : vector<16x16xf32>
    %204 = vector.broadcast %3 : vector<1x16xf32> to vector<16x16xf32>
    %205 = arith.addf %203, %204 : vector<16x16xf32>
    %cst_56 = arith.constant dense<0xFF800000> : vector<16xf32>
    %206 = vector.multi_reduction <maximumf>, %205, %cst_56 [1] : vector<16x16xf32> to vector<16xf32>
    %207 = vector.shape_cast %206 : vector<16xf32> to vector<16x1xf32>
    %208 = vector.broadcast %207 : vector<16x1xf32> to vector<16x16xf32>
    %209 = arith.subf %205, %208 : vector<16x16xf32>
    %210 = math.exp %209 : vector<16x16xf32>
    %cst_57 = arith.constant dense<0.000000e+00> : vector<16xf32>
    %211 = vector.multi_reduction <add>, %210, %cst_57 [1] : vector<16x16xf32> to vector<16xf32>
    %212 = vector.shape_cast %211 : vector<16xf32> to vector<16x1xf32>
    %213 = tpu.reciprocal %212 {approx = true} : vector<16x1xf32> -> vector<16x1xf32>
    %214 = vector.broadcast %213 : vector<16x1xf32> to vector<16x16xf32>
    %215 = arith.mulf %210, %214 : vector<16x16xf32>
    %216 = vector.broadcast %196 : vector<1x128xf32> to vector<16x128xf32>
    %217 = arith.mulf %12, %216 : vector<16x128xf32>
    %218 = arith.truncf %215 : vector<16x16xf32> to vector<16x16xbf16>
    %219 = arith.truncf %217 : vector<16x128xf32> to vector<16x128xbf16>
    %cst_58 = arith.constant dense<0.000000e+00> : vector<16x128xf32>
    %220 = tpu.matmul %218, %219, %cst_58 {dimension_numbers = #tpu.dot_dimension_numbers<[1], [0], [0], [1], [0, 0, 1, 1], [], []>} : vector<16x16xbf16>, vector<16x128xbf16>, vector<16x128xf32> -> vector<16x128xf32>
    %221 = arith.addf %195, %220 : vector<16x128xf32>
    %c0_59 = arith.constant 0 : index
    %c0_60 = arith.constant 0 : index
    %222 = vector.load %arg6[%c0_59, %c0_60] : memref<128x128xbf16, #tpu.memory_space<vmem>>, vector<128x128xbf16>
    %223 = arith.truncf %221 : vector<16x128xf32> to vector<16x128xbf16>
    %cst_61 = arith.constant dense<0.000000e+00> : vector<16x128xf32>
    %224 = tpu.matmul %223, %222, %cst_61 {dimension_numbers = #tpu.dot_dimension_numbers<[1], [0], [0], [1], [0, 0, 1, 1], [], []>} : vector<16x128xbf16>, vector<128x128xbf16>, vector<16x128xf32> -> vector<16x128xf32>
    %c0_62 = arith.constant 0 : index
    %c0_63 = arith.constant 0 : index
    %225 = vector.load %arg7[%c0_62, %c0_63] : memref<1x128xf32, #tpu.memory_space<vmem>>, vector<1x128xf32>
    %226 = vector.broadcast %225 : vector<1x128xf32> to vector<16x128xf32>
    %227 = arith.addf %224, %226 : vector<16x128xf32>
    %228 = arith.addf %1, %227 : vector<16x128xf32>
    %c0_64 = arith.constant 0 : index
    %c0_65 = arith.constant 0 : index
    %229 = vector.load %arg12[%c0_64, %c0_65] : memref<1x128xf32, #tpu.memory_space<vmem>>, vector<1x128xf32>
    %c0_66 = arith.constant 0 : index
    %c0_67 = arith.constant 0 : index
    %230 = vector.load %arg13[%c0_66, %c0_67] : memref<1x128xf32, #tpu.memory_space<vmem>>, vector<1x128xf32>
    %cst_68 = arith.constant dense<0.000000e+00> : vector<16xf32>
    %231 = vector.multi_reduction <add>, %228, %cst_68 [1] : vector<16x128xf32> to vector<16xf32>
    %232 = vector.shape_cast %231 : vector<16xf32> to vector<16x1xf32>
    %cst_69 = arith.constant 1.280000e+02 : f32
    %233 = vector.broadcast %cst_69 : f32 to vector<16x1xf32>
    %234 = arith.divf %232, %233 : vector<16x1xf32>
    %235 = vector.broadcast %234 : vector<16x1xf32> to vector<16x128xf32>
    %236 = arith.subf %228, %235 : vector<16x128xf32>
    %237 = arith.mulf %236, %236 : vector<16x128xf32>
    %cst_70 = arith.constant dense<0.000000e+00> : vector<16xf32>
    %238 = vector.multi_reduction <add>, %237, %cst_70 [1] : vector<16x128xf32> to vector<16xf32>
    %239 = vector.shape_cast %238 : vector<16xf32> to vector<16x1xf32>
    %cst_71 = arith.constant 1.280000e+02 : f32
    %240 = vector.broadcast %cst_71 : f32 to vector<16x1xf32>
    %241 = arith.divf %239, %240 : vector<16x1xf32>
    %cst_72 = arith.constant 9.99999974E-6 : f32
    %242 = vector.broadcast %cst_72 : f32 to vector<16x1xf32>
    %243 = arith.addf %241, %242 : vector<16x1xf32>
    %244 = math.rsqrt %243 : vector<16x1xf32>
    %245 = vector.broadcast %244 : vector<16x1xf32> to vector<16x128xf32>
    %246 = arith.mulf %236, %245 : vector<16x128xf32>
    %247 = vector.broadcast %229 : vector<1x128xf32> to vector<16x128xf32>
    %248 = arith.mulf %246, %247 : vector<16x128xf32>
    %249 = vector.broadcast %230 : vector<1x128xf32> to vector<16x128xf32>
    %250 = arith.addf %248, %249 : vector<16x128xf32>
    %c0_73 = arith.constant 0 : index
    %c0_74 = arith.constant 0 : index
    %251 = vector.load %arg8[%c0_73, %c0_74] : memref<128x512xbf16, #tpu.memory_space<vmem>>, vector<128x512xbf16>
    %252 = arith.truncf %250 : vector<16x128xf32> to vector<16x128xbf16>
    %cst_75 = arith.constant dense<0.000000e+00> : vector<16x512xf32>
    %253 = tpu.matmul %252, %251, %cst_75 {dimension_numbers = #tpu.dot_dimension_numbers<[1], [0], [0], [1], [0, 0, 1, 1], [], []>} : vector<16x128xbf16>, vector<128x512xbf16>, vector<16x512xf32> -> vector<16x512xf32>
    %c0_76 = arith.constant 0 : index
    %c0_77 = arith.constant 0 : index
    %254 = vector.load %arg9[%c0_76, %c0_77] : memref<1x512xf32, #tpu.memory_space<vmem>>, vector<1x512xf32>
    %255 = vector.broadcast %254 : vector<1x512xf32> to vector<16x512xf32>
    %256 = arith.addf %253, %255 : vector<16x512xf32>
    %c0_78 = arith.constant 0 : index
    %c0_79 = arith.constant 0 : index
    %257 = vector.load %arg10[%c0_78, %c0_79] : memref<512x128xbf16, #tpu.memory_space<vmem>>, vector<512x128xbf16>
    %258 = arith.truncf %256 : vector<16x512xf32> to vector<16x512xbf16>
    %cst_80 = arith.constant dense<0.000000e+00> : vector<16x128xf32>
    %259 = tpu.matmul %258, %257, %cst_80 {dimension_numbers = #tpu.dot_dimension_numbers<[1], [0], [0], [1], [0, 0, 1, 1], [], []>} : vector<16x512xbf16>, vector<512x128xbf16>, vector<16x128xf32> -> vector<16x128xf32>
    %c0_81 = arith.constant 0 : index
    %c0_82 = arith.constant 0 : index
    %260 = vector.load %arg11[%c0_81, %c0_82] : memref<1x128xf32, #tpu.memory_space<vmem>>, vector<1x128xf32>
    %261 = vector.broadcast %260 : vector<1x128xf32> to vector<16x128xf32>
    %262 = arith.addf %259, %261 : vector<16x128xf32>
    %263 = arith.addf %250, %262 : vector<16x128xf32>
    %c0_83 = arith.constant 0 : index
    %c0_84 = arith.constant 0 : index
    %264 = vector.load %arg14[%c0_83, %c0_84] : memref<1x128xf32, #tpu.memory_space<vmem>>, vector<1x128xf32>
    %c0_85 = arith.constant 0 : index
    %c0_86 = arith.constant 0 : index
    %265 = vector.load %arg15[%c0_85, %c0_86] : memref<1x128xf32, #tpu.memory_space<vmem>>, vector<1x128xf32>
    %cst_87 = arith.constant dense<0.000000e+00> : vector<16xf32>
    %266 = vector.multi_reduction <add>, %263, %cst_87 [1] : vector<16x128xf32> to vector<16xf32>
    %267 = vector.shape_cast %266 : vector<16xf32> to vector<16x1xf32>
    %cst_88 = arith.constant 1.280000e+02 : f32
    %268 = vector.broadcast %cst_88 : f32 to vector<16x1xf32>
    %269 = arith.divf %267, %268 : vector<16x1xf32>
    %270 = vector.broadcast %269 : vector<16x1xf32> to vector<16x128xf32>
    %271 = arith.subf %263, %270 : vector<16x128xf32>
    %272 = arith.mulf %271, %271 : vector<16x128xf32>
    %cst_89 = arith.constant dense<0.000000e+00> : vector<16xf32>
    %273 = vector.multi_reduction <add>, %272, %cst_89 [1] : vector<16x128xf32> to vector<16xf32>
    %274 = vector.shape_cast %273 : vector<16xf32> to vector<16x1xf32>
    %cst_90 = arith.constant 1.280000e+02 : f32
    %275 = vector.broadcast %cst_90 : f32 to vector<16x1xf32>
    %276 = arith.divf %274, %275 : vector<16x1xf32>
    %cst_91 = arith.constant 9.99999974E-6 : f32
    %277 = vector.broadcast %cst_91 : f32 to vector<16x1xf32>
    %278 = arith.addf %276, %277 : vector<16x1xf32>
    %279 = math.rsqrt %278 : vector<16x1xf32>
    %280 = vector.broadcast %279 : vector<16x1xf32> to vector<16x128xf32>
    %281 = arith.mulf %271, %280 : vector<16x128xf32>
    %282 = vector.broadcast %264 : vector<1x128xf32> to vector<16x128xf32>
    %283 = arith.mulf %281, %282 : vector<16x128xf32>
    %284 = vector.broadcast %265 : vector<1x128xf32> to vector<16x128xf32>
    %285 = arith.addf %283, %284 : vector<16x128xf32>
    %c0_92 = arith.constant 0 : index
    %c0_93 = arith.constant 0 : index
    %c0_94 = arith.constant 0 : index
    %286 = vector.load %arg16[%c0_92, %c0_93, %c0_94] : memref<1x16x128xf32, #tpu.memory_space<vmem>>, vector<1x16x128xf32>
    %287 = vector.shape_cast %286 : vector<1x16x128xf32> to vector<16x128xf32>
    %288 = vector.shape_cast %285 : vector<16x128xf32> to vector<1x16x128xf32>
    tpu.vector_store %arg16[%c0_92, %c0_93, %c0_94], %288 {strides = array<i32>} : memref<1x16x128xf32, #tpu.memory_space<vmem>>, vector<1x16x128xf32>,
    return
  }
  func.func @transform_0(%arg0: i32) -> (i32, i32, i32) {
    %c0_i32 = arith.constant 0 : i32
    %c0_i32_0 = arith.constant 0 : i32
    %c0_i32_1 = arith.constant 0 : i32
    return %arg0, %c0_i32, %c0_i32_0 : i32, i32, i32
  }
  func.func @transform_1(%arg0: i32) -> (i32, i32, i32) {
    %c0_i32 = arith.constant 0 : i32
    %c0_i32_0 = arith.constant 0 : i32
    %c0_i32_1 = arith.constant 0 : i32
    return %arg0, %c0_i32, %c0_i32_0 : i32, i32, i32
  }
  func.func @transform_2(%arg0: i32) -> (i32, i32) {
    %c0_i32 = arith.constant 0 : i32
    %c0_i32_0 = arith.constant 0 : i32
    %c0_i32_1 = arith.constant 0 : i32
    return %c0_i32, %c0_i32_0 : i32, i32
  }
  func.func @transform_3(%arg0: i32) -> (i32, i32) {
    %c0_i32 = arith.constant 0 : i32
    %c0_i32_0 = arith.constant 0 : i32
    %c0_i32_1 = arith.constant 0 : i32
    return %c0_i32, %c0_i32_0 : i32, i32
  }
  func.func @transform_4(%arg0: i32) -> (i32, i32) {
    %c0_i32 = arith.constant 0 : i32
    %c0_i32_0 = arith.constant 0 : i32
    %c0_i32_1 = arith.constant 0 : i32
    return %c0_i32, %c0_i32_0 : i32, i32
  }
  func.func @transform_5(%arg0: i32) -> (i32, i32) {
    %c0_i32 = arith.constant 0 : i32
    %c0_i32_0 = arith.constant 0 : i32
    %c0_i32_1 = arith.constant 0 : i32
    return %c0_i32, %c0_i32_0 : i32, i32
  }
  func.func @transform_6(%arg0: i32) -> (i32, i32) {
    %c0_i32 = arith.constant 0 : i32
    %c0_i32_0 = arith.constant 0 : i32
    %c0_i32_1 = arith.constant 0 : i32
    return %c0_i32, %c0_i32_0 : i32, i32
  }
  func.func @transform_7(%arg0: i32) -> (i32, i32) {
    %c0_i32 = arith.constant 0 : i32
    %c0_i32_0 = arith.constant 0 : i32
    %c0_i32_1 = arith.constant 0 : i32
    return %c0_i32, %c0_i32_0 : i32, i32
  }
  func.func @transform_8(%arg0: i32) -> (i32, i32) {
    %c0_i32 = arith.constant 0 : i32
    %c0_i32_0 = arith.constant 0 : i32
    %c0_i32_1 = arith.constant 0 : i32
    return %c0_i32, %c0_i32_0 : i32, i32
  }
  func.func @transform_9(%arg0: i32) -> (i32, i32) {
    %c0_i32 = arith.constant 0 : i32
    %c0_i32_0 = arith.constant 0 : i32
    %c0_i32_1 = arith.constant 0 : i32
    return %c0_i32, %c0_i32_0 : i32, i32
  }
  func.func @transform_10(%arg0: i32) -> (i32, i32) {
    %c0_i32 = arith.constant 0 : i32
    %c0_i32_0 = arith.constant 0 : i32
    %c0_i32_1 = arith.constant 0 : i32
    return %c0_i32, %c0_i32_0 : i32, i32
  }
  func.func @transform_11(%arg0: i32) -> (i32, i32) {
    %c0_i32 = arith.constant 0 : i32
    %c0_i32_0 = arith.constant 0 : i32
    %c0_i32_1 = arith.constant 0 : i32
    return %c0_i32, %c0_i32_0 : i32, i32
  }
  func.func @transform_12(%arg0: i32) -> (i32, i32) {
    %c0_i32 = arith.constant 0 : i32
    %c0_i32_0 = arith.constant 0 : i32
    %c0_i32_1 = arith.constant 0 : i32
    return %c0_i32, %c0_i32_0 : i32, i32
  }
  func.func @transform_13(%arg0: i32) -> (i32, i32) {
    %c0_i32 = arith.constant 0 : i32
    %c0_i32_0 = arith.constant 0 : i32
    %c0_i32_1 = arith.constant 0 : i32
    return %c0_i32, %c0_i32_0 : i32, i32
  }
  func.func @transform_14(%arg0: i32) -> (i32, i32) {
    %c0_i32 = arith.constant 0 : i32
    %c0_i32_0 = arith.constant 0 : i32
    %c0_i32_1 = arith.constant 0 : i32
    return %c0_i32, %c0_i32_0 : i32, i32
  }
  func.func @transform_15(%arg0: i32) -> (i32, i32, i32) {
    %c0_i32 = arith.constant 0 : i32
    %c0_i32_0 = arith.constant 0 : i32
    %c0_i32_1 = arith.constant 0 : i32
    return %arg0, %c0_i32, %c0_i32_0 : i32, i32, i32
  }
}

</mosaic_0001>

<bundles_post_ra>
// kernel: collection_status_forward.8
= control target key start
LH: loop header
LB: loop body
LE: loop exit
PB: predicated region body
PF: predicated region fallthrough
CT: control target
= control target key end

     0   :  { %s959_s12 = smov 0   ;;  %s1105_s0 = inlined_call_operand.vmem [shape: f32[2,18,34], index: 0, kind: input, shape index: {}]   ;;  %s1106_s1 = inlined_call_operand.vmem [shape: bf16[3,34,512], index: 1, kind: input, shape index: {}]   ;;  %s1107_s2 = inlined_call_operand.vmem [shape: f32[1,512], index: 2, kind: input, shape index: {}]   ;;  %s1108_s3 = inlined_call_operand.vmem [shape: f32[2,16,512], index: 3, kind: output, shape index: {}]  }
   0x1 LB: > { %s777_s13 = sadd.s32 4294967295, %s936_s12   ;;  %p781_p0 = scmp.ge.s32.totalorder %s936_s12, 1  ;;  %s936_s12 = sphi %s959_s12, %s13_s12  }
   0x2   : > { %p137_p1 = scmp.lt.s32.totalorder %s936_s12, 3 }
   0x4   : > { %p138_p2 = pnand %p781_p0, %p137_p1 }
   0x5   : > { %v882_v0 = vld [vmem:[%s1106_s1 + $0x54] ss:$16 sps:$4 sm:$0xff] (!%p138_p2)   ;;  %v884_v1 = vld [vmem:[%s1106_s1 + $0x5c] ss:$16 sps:$4 sm:$0xff] (!%p138_p2)   ;;  %v938_v2 = vmov (!%p138_p2), 0   ;;  %p161_p3 = scmp.lt.s32.totalorder (!%p138_p2), %s777_s13, 1  ;;  %v678_v58 = vlaneseq (!%p138_p2) }
   0x6   : > { %141 = sbr.rel (%p138_p2) target bundleno = 264 (0x108), region = 32  ;;  %298 = vmatprep.mubr.bf16.mxu0 (!%p138_p2), %v938_v2  ;;  %341 = vmatprep.mubr.bf16.mxu1 (!%p138_p2), %v938_v2  ;;  %v886_v3 = vld [vmem:[%s1106_s1 + $0x50] ss:$16 sps:$4 sm:$0xff] (!%p138_p2)   ;;  %v887_v4 = vld [vmem:[%s1106_s1 + $0x58] ss:$16 sps:$4 sm:$0xff] (!%p138_p2)   ;;  %vm253_vm0 = vcmask (!%p138_p2), 1040384  }
   0x7   : > { %266 = vmatprep.subr.bf16.mxu0 (!%p138_p2), %v882_v0  ;;  %309 = vmatprep.subr.bf16.mxu1 (!%p138_p2), %v884_v1  ;;  %v888_v5 = vld [vmem:[%s1106_s1 + $0x74] ss:$16 sps:$4 sm:$0xff] (!%p138_p2)   ;;  %v890_v6 = vld [vmem:[%s1106_s1 + $0x7c] ss:$16 sps:$4 sm:$0xff] (!%p138_p2)   ;;  %v892_v7 = vld [vmem:[%s1106_s1 + $0x70] ss:$16 sps:$4 sm:$0xff] (!%p138_p2)  }
   0x8   : > { %267 = vmatpush1.bf16.msra.mxu0 (!%p138_p2), %v886_v3  ;;  %310 = vmatpush1.bf16.msra.mxu1 (!%p138_p2), %v887_v4  ;;  %v893_v8 = vld [vmem:[%s1106_s1 + $0x78] ss:$16 sps:$4 sm:$0xff] (!%p138_p2)   ;;  %v793_v9 = vld [vmem:[%s1106_s1 + $0x90] sm:$0x11] (!%p138_p2)  ;;  %v903_v16 = vld [vmem:[%s1106_s1 + $0xc] ss:$16 sps:$4 sm:$0xff] (!%p138_p2)  }
   0x9   : > { %268 = vmatprep.subr.bf16.mxu0 (!%p138_p2), %v888_v5  ;;  %v794_v10 = vld [vmem:[%s1106_s1 + $0x98] sm:$0x11] (!%p138_p2)  ;;  %311 = vmatprep.subr.bf16.mxu1 (!%p138_p2), %v890_v6  ;;  %v804_v11 = vcombine.high (!%p138_p2), %v793_v9, %v793_v9  ;;  %v803_v13 = vcombine.low (!%p138_p2), %v793_v9, %v793_v9  ;;  %v900_v15 = vld [vmem:[%s1106_s1 + $0x4] ss:$16 sps:$4 sm:$0xff] (!%p138_p2)   ;;  %vm249_vm1 = vcmask (!%p138_p2), 277504   ;;  %v679_v59 = vshrl.u32 (!%p138_p2), %v678_v58, 7 }
   0xa   : > { %v806_v12 = vcombine.high (!%p138_p2), %v794_v10, %v794_v10  ;;  %v805_v14 = vcombine.low (!%p138_p2), %v794_v10, %v794_v10  ;;  %v898_v22 = vld [vmem:[%s1106_s1] ss:$16 sps:$4 sm:$0xff] (!%p138_p2)   ;;  %v901_v23 = vld [vmem:[%s1106_s1 + $0x8] ss:$16 sps:$4 sm:$0xff] (!%p138_p2)   ;;  %v906_v24 = vld [vmem:[%s1106_s1 + $0x24] ss:$16 sps:$4 sm:$0xff] (!%p138_p2)  }
   0xb   : > { %v255_v17 = vsel (!%p138_p2), %vm253_vm0, %v803_v13, 0  ;;  %v909_v25 = vld [vmem:[%s1106_s1 + $0x2c] ss:$16 sps:$4 sm:$0xff] (!%p138_p2)   ;;  %v182_v26 = vld [vmem:[%s1106_s1 + $0x40] sm:$0x11] (!%p138_p2)  ;;  %v680_v60 = vsub.s32 (!%p138_p2), 0, %v679_v59 }
   0xc   : > { %269 = vmatpush1.bf16.msra.mxu0 (!%p138_p2), %v892_v7  ;;  %312 = vmatpush1.bf16.msra.mxu1 (!%p138_p2), %v893_v8  ;;  %v261_v18 = vsel (!%p138_p2), %vm253_vm0, %v805_v14, 0  ;;  %v183_v27 = vld [vmem:[%s1106_s1 + $0x48] sm:$0x11] (!%p138_p2)  ;;  %v904_v28 = vld [vmem:[%s1106_s1 + $0x20] ss:$16 sps:$4 sm:$0xff] (!%p138_p2)   ;;  %v820_v30 = vcombine.high (!%p138_p2), %v182_v26, %v182_v26  ;;  %v819_v32 = vcombine.low (!%p138_p2), %v182_v26, %v182_v26  ;;  %v688_v61 = vsub.s32 (!%p138_p2), 2, %v679_v59 }
   0xd   : > { %s1110_s13 = smov (!%p161_p3, %s777_s13), 1  ;;  %807 = vmatprep.subr.msk.bf16.mxu0 %vm253_vm0, %v804_v11  ;;  %809 = vmatprep.subr.msk.bf16.mxu1 %vm253_vm0, %v806_v12  ;;  %v907_v29 = vld [vmem:[%s1106_s1 + $0x28] ss:$16 sps:$4 sm:$0xff]   ;;  %v822_v31 = vcombine.high %v183_v27, %v183_v27  ;;  %v821_v33 = vcombine.low %v183_v27, %v183_v27  ;;  %v916_v38 = vld [vmem:[%s1106_s1 + $0xa4] ss:$16 sps:$4 sm:$0xff]   ;;  %v684_v63 = vsub.s32 1, %v679_v59 }
   0xe   : > { %s872_s7 = smul.u32 24, %s1110_s13  ;;  %v406_v36 = vsel %vm253_vm0, %v819_v32, 0  ;;  %v919_v39 = vld [vmem:[%s1106_s1 + $0xac] ss:$16 sps:$4 sm:$0xff]   ;;  %v914_v41 = vld [vmem:[%s1106_s1 + $0xa0] ss:$16 sps:$4 sm:$0xff]  }
   0xf   : > { %v412_v37 = vsel %vm253_vm0, %v821_v33, 0  ;;  %v917_v42 = vld [vmem:[%s1106_s1 + $0xa8] ss:$16 sps:$4 sm:$0xff]   ;;  %v922_v43 = vld [vmem:[%s1106_s1 + $0xc4] ss:$16 sps:$4 sm:$0xff]   ;;  %v692_v0 = vsub.s32 3, %v679_v59 }
  0x10   : > { %s1005_s10 = scalar_lea.vmem %s1105_s0, %s872_s7  ;;  %271 = vmatpush1.bf16.msra.mxu0 %v255_v17  ;;  %314 = vmatpush1.bf16.msra.mxu1 %v261_v18  ;;  %v925_v44 = vld [vmem:[%s1106_s1 + $0xcc] ss:$16 sps:$4 sm:$0xff]   ;;  %v835_v45 = vld [vmem:[%s1106_s1 + $0xe0] sm:$0x11]  ;;  %v923_v48 = vld [vmem:[%s1106_s1 + $0xc8] ss:$16 sps:$4 sm:$0xff]  }
  0x11   : > { %v185_v19 = vld [vmem:[%s1005_s10 + $0x1] sm:$0xff]  ;;  %v186_v20 = vld [vmem:[%s1005_s10 + $0x9] sm:$0xff]  ;;  %417 = vmatprep.subr.bf16.mxu0 %v900_v15  ;;  %460 = vmatprep.subr.bf16.mxu1 %v903_v16  ;;  %v846_v49 = vcombine.high %v835_v45, %v835_v45  ;;  %v845_v51 = vcombine.low %v835_v45, %v835_v45  ;;  %s855_s30 = sshll.u32 %s1110_s13, 6 }
  0x12   : > { %v198_v21 = vpack.c.bf16 %v186_v20, %v185_v19  ;;  %v172_v34 = vld [vmem:[%s1005_s10] sm:$0xff]  ;;  %v173_v35 = vld [vmem:[%s1005_s10 + $0x8] sm:$0xff]  ;;  %s170_s6 = scalar_lea.vmem %s1108_s3, %s855_s30 }
  0x13   : > { %v184_v40 = vpack.c.bf16 %v173_v35, %v172_v34  ;;  %v836_v46 = vld [vmem:[%s1106_s1 + $0xe8] sm:$0x11]  ;;  %v920_v47 = vld [vmem:[%s1106_s1 + $0xc0] ss:$16 sps:$4 sm:$0xff]   ;;  %v571_v55 = vsel %vm253_vm0, %v845_v51, 0 }
  0x14   : > { %808 = vmatmul.mubr.msk.bf16.vlgmr.msra.gmra.mrb[0].mxu0 %vm249_vm1, %v198_v21  ;;  %810 = vmatmul.mubr.msk.bf16.vlgmr.msra.gmra.mrb[0].mxu1 %vm249_vm1, %v198_v21  ;;  %v848_v50 = vcombine.high %v836_v46, %v836_v46  ;;  %v847_v52 = vcombine.low %v836_v46, %v836_v46  ;;  %v503_v53 = vld [vmem:[%s1005_s10 + $0x2] sm:$0xff]  ;;  %v504_v54 = vld [vmem:[%s1005_s10 + $0xa] sm:$0xff] }
  0x15   : > { %418 = vmatpush1.bf16.msra.mxu0 %v898_v22  ;;  %461 = vmatpush1.bf16.msra.mxu1 %v901_v23  ;;  %v516_v57 = vpack.c.bf16 %v504_v54, %v503_v53  ;;  %v676_v62 = vld [vmem:[%s1107_s2] sm:$0xf] }
  0x16   : > { %419 = vmatprep.subr.bf16.mxu0 %v906_v24  ;;  %462 = vmatprep.subr.bf16.mxu1 %v909_v25  ;;  %v577_v56 = vsel %vm253_vm0, %v847_v52, 0  ;;  %v681_v1 = vrot.slane %v676_v62, %v680_v60  ;;  %v685_v3 = vrot.slane %v676_v62, %v684_v63  ;;  %v693_v4 = vrot.slane %v676_v62, %v692_v0 }
  0x17   : > { %449 = vmatprep.mubr.bf16.mxu0 %v938_v2  ;;  %492 = vmatprep.mubr.bf16.mxu1 %v938_v2 }
  0x19   : > { %420 = vmatpush1.bf16.msra.mxu0 %v904_v28  ;;  %463 = vmatpush1.bf16.msra.mxu1 %v907_v29 }
  0x1a   : > { %823 = vmatprep.subr.msk.bf16.mxu0 %vm253_vm0, %v820_v30  ;;  %825 = vmatprep.subr.msk.bf16.mxu1 %vm253_vm0, %v822_v31 }
  0x1d   : > { %422 = vmatpush1.bf16.msra.mxu0 %v406_v36  ;;  %465 = vmatpush1.bf16.msra.mxu1 %v412_v37 }
  0x1e   : > { %582 = vmatprep.subr.bf16.mxu0 %v916_v38  ;;  %625 = vmatprep.subr.bf16.mxu1 %v919_v39 }
  0x20   : > { %824 = vmatmul.mubr.msk.bf16.vlgmr.msra.gmra.mrb[0].mxu0 %vm249_vm1, %v184_v40  ;;  %826 = vmatmul.mubr.msk.bf16.vlgmr.msra.gmra.mrb[0].mxu1 %vm249_vm1, %v184_v40 }
  0x21   : > { %583 = vmatpush1.bf16.msra.mxu0 %v914_v41  ;;  %626 = vmatpush1.bf16.msra.mxu1 %v917_v42 }
  0x22   : > { %584 = vmatprep.subr.bf16.mxu0 %v922_v43  ;;  %627 = vmatprep.subr.bf16.mxu1 %v925_v44 }
  0x23   : > { %614 = vmatprep.mubr.bf16.mxu0 %v938_v2  ;;  %657 = vmatprep.mubr.bf16.mxu1 %v938_v2  ;;  %v689_v2 = vrot.slane %v676_v62, %v688_v61 }
  0x25   : > { %585 = vmatpush1.bf16.msra.mxu0 %v920_v47  ;;  %628 = vmatpush1.bf16.msra.mxu1 %v923_v48 }
  0x26   : > { %849 = vmatprep.subr.msk.bf16.mxu0 %vm253_vm0, %v846_v49  ;;  %851 = vmatprep.subr.msk.bf16.mxu1 %vm253_vm0, %v848_v50 }
  0x29   : > { %587 = vmatpush1.bf16.msra.mxu0 %v571_v55  ;;  %630 = vmatpush1.bf16.msra.mxu1 %v577_v56 }
  0x2c   : > { %850 = vmatmul.mubr.msk.bf16.vlgmr.msra.gmra.mrb[0].mxu0 %vm249_vm1, %v516_v57  ;;  %852 = vmatmul.mubr.msk.bf16.vlgmr.msra.gmra.mrb[0].mxu1 %vm249_vm1, %v516_v57 }
  0xff   : > { %v616_v5 = vpop.f32.mrb[0].mxu0  ;;  %v659_v6 = vpop.f32.mrb[0].mxu1 }
 0x100   : > { %v698_v7 = vadd.f32 %v681_v1, %v616_v5  ;;  %v700_v8 = vadd.f32 %v689_v2, %v659_v6  ;;  %v618_v9 = vpop.f32.mrb[1].mxu0  ;;  %v661_v10 = vpop.f32.mrb[1].mxu1 }
 0x101   : > { %v699_v11 = vadd.f32 %v685_v3, %v618_v9  ;;  %v701_v12 = vadd.f32 %v693_v4, %v661_v10  ;;  %v620_v13 = vpop.f32.mrb[2].mxu0  ;;  %v663_v14 = vpop.f32.mrb[2].mxu1 }
 0x102   : > { %v706_v15 = vmax.f32 %v698_v7, 0.0  ;;  %v708_v16 = vmax.f32 %v700_v8, 0.0  ;;  %v702_v17 = vadd.f32 %v681_v1, %v620_v13  ;;  %v704_v18 = vadd.f32 %v689_v2, %v663_v14  ;;  %v622_v19 = vpop.f32.mrb[3].mxu0  ;;  %v665_v20 = vpop.f32.mrb[3].mxu1 }
 0x103   : > { %v707_v21 = vmax.f32 %v699_v11, 0.0  ;;  %v709_v22 = vmax.f32 %v701_v12, 0.0  ;;  %v703_v23 = vadd.f32 %v685_v3, %v622_v19  ;;  %v705_v24 = vadd.f32 %v693_v4, %v665_v20 }
 0x104   : > { %714 = vst [vmem:[%s170_s6] sm:$0xff] %v706_v15  ;;  %716 = vst [vmem:[%s170_s6 + $0x10] sm:$0xff] %v708_v16  ;;  %v710_v25 = vmax.f32 %v702_v17, 0.0  ;;  %v712_v26 = vmax.f32 %v704_v18, 0.0 }
 0x105   : > { %715 = vst [vmem:[%s170_s6 + $0x8] sm:$0xff] %v707_v21  ;;  %717 = vst [vmem:[%s170_s6 + $0x18] sm:$0xff] %v709_v22  ;;  %v711_v27 = vmax.f32 %v703_v23, 0.0  ;;  %v713_v28 = vmax.f32 %v705_v24, 0.0 }
 0x106   : > { %718 = vst [vmem:[%s170_s6 + $0x20] sm:$0xff] %v710_v25  ;;  %720 = vst [vmem:[%s170_s6 + $0x30] sm:$0xff] %v712_v26 }
 0x107   : > { %719 = vst [vmem:[%s170_s6 + $0x28] sm:$0xff] %v711_v27  ;;  %721 = vst [vmem:[%s170_s6 + $0x38] sm:$0xff] %v713_v28 }
 0x108 PF: > { %s13_s12 = sadd.s32 1, %s936_s12  }
 0x109   : > { %p10_p4 = scmp.ge.s32.totalorder %s13_s12, 4  }
 0x10b   :  { %12 = sbr.rel (!%p10_p4) target bundleno = 1 (0x1), region = 64 }

// kernel: collection_status_forward.9
= control target key start
LH: loop header
LB: loop body
LE: loop exit
PB: predicated region body
PF: predicated region fallthrough
CT: control target
= control target key end

     0   :  { %s2860_s12 = smov 0   ;;  %s3573_s0 = inlined_call_operand.vmem [shape: f32[2,10,288], index: 0, kind: input, shape index: {}]   ;;  %s3574_s1 = inlined_call_operand.vmem [shape: bf16[3,288,512], index: 1, kind: input, shape index: {}]   ;;  %s3575_s2 = inlined_call_operand.vmem [shape: f32[1,512], index: 2, kind: input, shape index: {}]   ;;  %s3576_s3 = inlined_call_operand.vmem [shape: f32[2,8,512], index: 3, kind: output, shape index: {}]  }
   0x1 LB: > { %s2120_s13 = sadd.s32 4294967295, %s2837_s12   ;;  %p2124_p0 = scmp.ge.s32.totalorder %s2837_s12, 1  ;;  %s2837_s12 = sphi %s2860_s12, %s13_s12  }
   0x2   : > { %p137_p1 = scmp.lt.s32.totalorder %s2837_s12, 3 }
   0x4   : > { %p138_p2 = pnand %p2124_p0, %p137_p1 }
   0x5   : > { %v2507_v0 = vld [vmem:[%s3574_s1 + $0x244] ss:$16 sps:$4 sm:$0xff] (!%p138_p2)   ;;  %p161_p3 = scmp.lt.s32.totalorder (!%p138_p2), %s2120_s13, 1  ;;  %v2509_v1 = vld [vmem:[%s3574_s1 + $0x240] ss:$16 sps:$4 sm:$0xff] (!%p138_p2)   ;;  %v2839_v2 = vmov (!%p138_p2), 0  }
   0x6   : > { %141 = sbr.rel (%p138_p2) target bundleno = 456 (0x1c8), region = 32  ;;  %792 = vmatprep.mubr.bf16.mxu1 (!%p138_p2), %v2839_v2  ;;  %719 = vmatprep.subr.bf16.mxu0 (!%p138_p2), %v2507_v0  ;;  %v2510_v3 = vld [vmem:[%s3574_s1 + $0x264] ss:$16 sps:$4 sm:$0xff] (!%p138_p2)   ;;  %v2514_v5 = vld [vmem:[%s3574_s1 + $0x260] ss:$16 sps:$4 sm:$0xff] (!%p138_p2)   ;;  %vm715_vm0 = vcmask (!%p138_p2), 261120  }
   0x7   : > { %720 = vmatpush1.bf16.msra.mxu0 (!%p138_p2), %v2509_v1  ;;  %v2512_v4 = vld [vmem:[%s3574_s1 + $0x444] ss:$16 sps:$4 sm:$0xff] (!%p138_p2)   ;;  %v2515_v6 = vld [vmem:[%s3574_s1 + $0x440] ss:$16 sps:$4 sm:$0xff] (!%p138_p2)   ;;  %v2526_v12 = vld [vmem:[%s3574_s1 + $0x24c] ss:$16 sps:$4 sm:$0xff] (!%p138_p2)  }
   0x8   : > { %721 = vmatprep.subr.bf16.mxu0 (!%p138_p2), %v2510_v3  ;;  %v2516_v7 = vld [vmem:[%s3574_s1 + $0x284] ss:$16 sps:$4 sm:$0xff] (!%p138_p2)   ;;  %760 = vmatprep.subr.bf16.mxu1 (!%p138_p2), %v2512_v4  ;;  %v2521_v9 = vld [vmem:[%s3574_s1 + $0x460] ss:$16 sps:$4 sm:$0xff] (!%p138_p2)   ;;  %v2524_v20 = vld [vmem:[%s3574_s1 + $0x248] ss:$16 sps:$4 sm:$0xff] (!%p138_p2)  }
   0x9   : > { %v2518_v8 = vld [vmem:[%s3574_s1 + $0x464] ss:$16 sps:$4 sm:$0xff] (!%p138_p2)   ;;  %761 = vmatpush1.bf16.msra.mxu1 (!%p138_p2), %v2515_v6  ;;  %v2520_v10 = vld [vmem:[%s3574_s1 + $0x280] ss:$16 sps:$4 sm:$0xff] (!%p138_p2)   ;;  %v2532_v22 = vld [vmem:[%s3574_s1 + $0x26c] ss:$16 sps:$4 sm:$0xff] (!%p138_p2)  }
   0xa   : > { %762 = vmatprep.subr.bf16.mxu1 (!%p138_p2), %v2518_v8  ;;  %v2522_v11 = vld [vmem:[%s3574_s1 + $0x2a4] ss:$16 sps:$4 sm:$0xff] (!%p138_p2)   ;;  %v2527_v16 = vld [vmem:[%s3574_s1 + $0x2a0] ss:$16 sps:$4 sm:$0xff] (!%p138_p2)   ;;  %v2530_v26 = vld [vmem:[%s3574_s1 + $0x268] ss:$16 sps:$4 sm:$0xff] (!%p138_p2)  }
   0xb   : > { %722 = vmatpush1.bf16.msra.mxu0 (!%p138_p2), %v2514_v5  ;;  %v2528_v19 = vld [vmem:[%s3574_s1 + $0x2c4] ss:$16 sps:$4 sm:$0xff] (!%p138_p2)   ;;  %v2533_v23 = vld [vmem:[%s3574_s1 + $0x2c0] ss:$16 sps:$4 sm:$0xff] (!%p138_p2)   ;;  %v2538_v28 = vld [vmem:[%s3574_s1 + $0x28c] ss:$16 sps:$4 sm:$0xff] (!%p138_p2)  }
   0xc   : > { %723 = vmatprep.subr.bf16.mxu0 (!%p138_p2), %v2516_v7  ;;  %v2534_v25 = vld [vmem:[%s3574_s1 + $0x2e4] ss:$16 sps:$4 sm:$0xff] (!%p138_p2)   ;;  %v2539_v27 = vld [vmem:[%s3574_s1 + $0x2e0] ss:$16 sps:$4 sm:$0xff] (!%p138_p2)   ;;  %v2536_v30 = vld [vmem:[%s3574_s1 + $0x288] ss:$16 sps:$4 sm:$0xff] (!%p138_p2)  }
   0xd   : > { %s3578_s13 = smov (!%p161_p3, %s2120_s13), 1  ;;  %763 = vmatpush1.bf16.msra.mxu1 %v2521_v9  ;;  %v2540_v29 = vld [vmem:[%s3574_s1 + $0x304] ss:$16 sps:$4 sm:$0xff]   ;;  %v2544_v31 = vld [vmem:[%s3574_s1 + $0x2ac] ss:$16 sps:$4 sm:$0xff]  }
   0xe   : > { %s2497_s28 = smul.u32 48, %s3578_s13  ;;  %801 = vmatprep.subr.bf16.mxu1 %v2526_v12  ;;  %v2545_v32 = vld [vmem:[%s3574_s1 + $0x300] ss:$16 sps:$4 sm:$0xff]   ;;  %v2546_v33 = vld [vmem:[%s3574_s1 + $0x324] ss:$16 sps:$4 sm:$0xff]   ;;  %s2496_s17 = sshll.u32 %s3578_s13, 5 }
   0xf   : > { %724 = vmatpush1.bf16.msra.mxu0 %v2520_v10  ;;  %v2542_v34 = vld [vmem:[%s3574_s1 + $0x2a8] ss:$16 sps:$4 sm:$0xff]   ;;  %v2551_v35 = vld [vmem:[%s3574_s1 + $0x320] ss:$16 sps:$4 sm:$0xff]   ;;  %v2550_v36 = vld [vmem:[%s3574_s1 + $0x2cc] ss:$16 sps:$4 sm:$0xff]   ;;  %s170_s20 = scalar_lea.vmem %s3576_s3, %s2496_s17 }
  0x10   : > { %s2902_s8 = scalar_lea.vmem %s3573_s0, %s2497_s28  ;;  %725 = vmatprep.subr.bf16.mxu0 %v2522_v11  ;;  %v2552_v37 = vld [vmem:[%s3574_s1 + $0x344] ss:$16 sps:$4 sm:$0xff]   ;;  %v2548_v38 = vld [vmem:[%s3574_s1 + $0x2c8] ss:$16 sps:$4 sm:$0xff]   ;;  %v2556_v39 = vld [vmem:[%s3574_s1 + $0x2ec] ss:$16 sps:$4 sm:$0xff]  }
  0x11   : > { %v252_v13 = vld [vmem:[%s2902_s8 + $0x10] sm:$0xfe]  ;;  %v255_v14 = vld [vmem:[%s2902_s8 + $0x28] sm:$0x1]  ;;  %v2562_v44 = vld [vmem:[%s3574_s1 + $0x30c] ss:$16 sps:$4 sm:$0xff]  }
  0x12   : > { %v331_v15 = vpack.c.bf16 %v255_v14, %v252_v13  ;;  %v2557_v40 = vld [vmem:[%s3574_s1 + $0x340] ss:$16 sps:$4 sm:$0xff]   ;;  %v2558_v41 = vld [vmem:[%s3574_s1 + $0x364] ss:$16 sps:$4 sm:$0xff]   ;;  %v2554_v42 = vld [vmem:[%s3574_s1 + $0x2e8] ss:$16 sps:$4 sm:$0xff]  }
  0x13   : > { %726 = vmatpush1.bf16.msra.mxu0 %v2527_v16  ;;  %v2563_v43 = vld [vmem:[%s3574_s1 + $0x360] ss:$16 sps:$4 sm:$0xff]   ;;  %v2564_v45 = vld [vmem:[%s3574_s1 + $0x384] ss:$16 sps:$4 sm:$0xff]   ;;  %v2560_v46 = vld [vmem:[%s3574_s1 + $0x308] ss:$16 sps:$4 sm:$0xff]  }
  0x14   : > { %v347_v17 = vshrl.u32 %v331_v15, 16  ;;  %v349_v18 = vshll.u32 %v331_v15, 16  ;;  %727 = vmatprep.subr.bf16.mxu0 %v2528_v19  ;;  %v2568_v47 = vld [vmem:[%s3574_s1 + $0x32c] ss:$16 sps:$4 sm:$0xff]   ;;  %v2569_v48 = vld [vmem:[%s3574_s1 + $0x380] ss:$16 sps:$4 sm:$0xff]  }
  0x15   : > { %v2570_v49 = vld [vmem:[%s3574_s1 + $0x3a4] ss:$16 sps:$4 sm:$0xff]   ;;  %v251_v50 = vld [vmem:[%s2902_s8 + $0x8] sm:$0xfe]  ;;  %v254_v51 = vld [vmem:[%s2902_s8 + $0x20] sm:$0x1] }
  0x16   : > { %v351_v21 = vrot.slane %v349_v18, 1  ;;  %v2566_v52 = vld [vmem:[%s3574_s1 + $0x328] ss:$16 sps:$4 sm:$0xff]   ;;  %v2575_v53 = vld [vmem:[%s3574_s1 + $0x3a0] ss:$16 sps:$4 sm:$0xff]   ;;  %v330_v54 = vpack.c.bf16 %v254_v51, %v251_v50 }
  0x17   : > { %728 = vmatpush1.bf16.msra.mxu0 %v2533_v23  ;;  %v2574_v55 = vld [vmem:[%s3574_s1 + $0x34c] ss:$16 sps:$4 sm:$0xff]   ;;  %v2576_v56 = vld [vmem:[%s3574_s1 + $0x3c4] ss:$16 sps:$4 sm:$0xff]   ;;  %v2572_v57 = vld [vmem:[%s3574_s1 + $0x348] ss:$16 sps:$4 sm:$0xff]  }
  0x18   : > { %v2930_v24 = vor.u32 %v351_v21, %v347_v17  ;;  %729 = vmatprep.subr.bf16.mxu0 %v2534_v25  ;;  %v340_v58 = vshrl.u32 %v330_v54, 16  ;;  %v342_v59 = vshll.u32 %v330_v54, 16  ;;  %v2581_v60 = vld [vmem:[%s3574_s1 + $0x3c0] ss:$16 sps:$4 sm:$0xff]   ;;  %v253_v63 = vld [vmem:[%s2902_s8 + $0x18] sm:$0x1] }
  0x19   : > { %v250_v62 = vld [vmem:[%s2902_s8] sm:$0xfe]  ;;  %v2580_v0 = vld [vmem:[%s3574_s1 + $0x36c] ss:$16 sps:$4 sm:$0xff]   ;;  %v2578_v5 = vld [vmem:[%s3574_s1 + $0x368] ss:$16 sps:$4 sm:$0xff]  }
  0x1a   : > { %2272 = vmatmul.mubr.msk.bf16.vlgmr.msra.gmra.mrb[0].mxu1 %vm715_vm0, %v2930_v24  ;;  %v344_v61 = vrot.slane %v342_v59, 1  ;;  %v2582_v1 = vld [vmem:[%s3574_s1 + $0x3e4] ss:$16 sps:$4 sm:$0xff]   ;;  %v329_v4 = vpack.c.bf16 %v253_v63, %v250_v62  ;;  %v2587_v6 = vld [vmem:[%s3574_s1 + $0x3e0] ss:$16 sps:$4 sm:$0xff]  }
  0x1b   : > { %802 = vmatpush1.bf16.msra.mxu1 %v2524_v20  ;;  %730 = vmatpush1.bf16.msra.mxu0 %v2539_v27  ;;  %v2586_v7 = vld [vmem:[%s3574_s1 + $0x38c] ss:$16 sps:$4 sm:$0xff]   ;;  %v2588_v8 = vld [vmem:[%s3574_s1 + $0x404] ss:$16 sps:$4 sm:$0xff]   ;;  %v2584_v10 = vld [vmem:[%s3574_s1 + $0x388] ss:$16 sps:$4 sm:$0xff]  }
  0x1c   : > { %803 = vmatprep.subr.bf16.mxu1 %v2532_v22  ;;  %731 = vmatprep.subr.bf16.mxu0 %v2540_v29  ;;  %v345_v3 = vor.u32 %v344_v61, %v340_v58  ;;  %v335_v9 = vshll.u32 %v329_v4, 16  ;;  %v2593_v11 = vld [vmem:[%s3574_s1 + $0x400] ss:$16 sps:$4 sm:$0xff]   ;;  %v2592_v12 = vld [vmem:[%s3574_s1 + $0x3ac] ss:$16 sps:$4 sm:$0xff]   ;;  %v333_v15 = vshrl.u32 %v329_v4, 16 }
  0x1d   : > { %v2594_v13 = vld [vmem:[%s3574_s1 + $0x424] ss:$16 sps:$4 sm:$0xff]   ;;  %v2590_v14 = vld [vmem:[%s3574_s1 + $0x3a8] ss:$16 sps:$4 sm:$0xff]   ;;  %v2598_v17 = vld [vmem:[%s3574_s1 + $0x3cc] ss:$16 sps:$4 sm:$0xff]  }
  0x1e   : > { %751 = vmatprep.mubr.bf16.mxu0 %v345_v3  ;;  %833 = vmatprep.mubr.bf16.mxu1 %v345_v3  ;;  %v337_v16 = vrot.slane %v335_v9, 1  ;;  %v2599_v18 = vld [vmem:[%s3574_s1 + $0x420] ss:$16 sps:$4 sm:$0xff]   ;;  %v2605_v19 = vld [vmem:[%s3574_s1 + $0x44c] ss:$16 sps:$4 sm:$0xff]  }
  0x1f   : > { %804 = vmatpush1.bf16.msra.mxu1 %v2530_v26  ;;  %732 = vmatpush1.bf16.msra.mxu0 %v2545_v32  ;;  %v2596_v20 = vld [vmem:[%s3574_s1 + $0x3c8] ss:$16 sps:$4 sm:$0xff]   ;;  %v2602_v22 = vld [vmem:[%s3574_s1 + $0x3ec] ss:$16 sps:$4 sm:$0xff]   ;;  %v2617_v29 = vld [vmem:[%s3574_s1 + $0x4] ss:$16 sps:$4 sm:$0xff]  }
  0x20   : > { %805 = vmatprep.subr.bf16.mxu1 %v2538_v28  ;;  %733 = vmatprep.subr.bf16.mxu0 %v2546_v33  ;;  %v338_v21 = vor.u32 %v337_v16, %v333_v15  ;;  %v2603_v23 = vld [vmem:[%s3574_s1 + $0x448] ss:$16 sps:$4 sm:$0xff]   ;;  %v2611_v25 = vld [vmem:[%s3574_s1 + $0x46c] ss:$16 sps:$4 sm:$0xff]   ;;  %v2615_v32 = vld [vmem:[%s3574_s1] ss:$16 sps:$4 sm:$0xff]  }
  0x21   : > { %v2600_v26 = vld [vmem:[%s3574_s1 + $0x3e8] ss:$16 sps:$4 sm:$0xff]   ;;  %v2608_v27 = vld [vmem:[%s3574_s1 + $0x40c] ss:$16 sps:$4 sm:$0xff]   ;;  %v2620_v33 = vld [vmem:[%s3574_s1 + $0x24] ss:$16 sps:$4 sm:$0xff]  }
  0x22   : > { %v2609_v28 = vld [vmem:[%s3574_s1 + $0x468] ss:$16 sps:$4 sm:$0xff]   ;;  %v2644_v50 = vld [vmem:[%s3574_s1 + $0xa4] ss:$16 sps:$4 sm:$0xff]   ;;  %v2648_v58 = vld [vmem:[%s3574_s1 + $0xc0] ss:$16 sps:$4 sm:$0xff]  }
  0x23   : > { %806 = vmatpush1.bf16.msra.mxu1 %v2536_v30  ;;  %734 = vmatpush1.bf16.msra.mxu0 %v2551_v35  ;;  %v2606_v30 = vld [vmem:[%s3574_s1 + $0x408] ss:$16 sps:$4 sm:$0xff]   ;;  %v2618_v35 = vld [vmem:[%s3574_s1 + $0x20] ss:$16 sps:$4 sm:$0xff]   ;;  %v2650_v54 = vld [vmem:[%s3574_s1 + $0xc4] ss:$16 sps:$4 sm:$0xff]  }
  0x24   : > { %807 = vmatprep.subr.bf16.mxu1 %v2544_v31  ;;  %735 = vmatprep.subr.bf16.mxu0 %v2552_v37  ;;  %v2614_v31 = vld [vmem:[%s3574_s1 + $0x42c] ss:$16 sps:$4 sm:$0xff]   ;;  %v2626_v37 = vld [vmem:[%s3574_s1 + $0x44] ss:$16 sps:$4 sm:$0xff]   ;;  %v2639_v51 = vld [vmem:[%s3574_s1 + $0x28] ss:$16 sps:$4 sm:$0xff]  }
  0x25   : > { %v2653_v59 = vld [vmem:[%s3574_s1 + $0x6c] ss:$16 sps:$4 sm:$0xff]   ;;  %v2651_v61 = vld [vmem:[%s3574_s1 + $0x68] ss:$16 sps:$4 sm:$0xff]   ;;  %v2654_v62 = vld [vmem:[%s3574_s1 + $0xe0] ss:$16 sps:$4 sm:$0xff]  }
  0x26   : > { %v2659_v63 = vld [vmem:[%s3574_s1 + $0x8c] ss:$16 sps:$4 sm:$0xff]   ;;  %v2660_v3 = vld [vmem:[%s3574_s1 + $0x100] ss:$16 sps:$4 sm:$0xff]   ;;  %v2674_v9 = vld [vmem:[%s3574_s1 + $0x144] ss:$16 sps:$4 sm:$0xff]  }
  0x27   : > { %808 = vmatpush1.bf16.msra.mxu1 %v2542_v34  ;;  %736 = vmatpush1.bf16.msra.mxu0 %v2557_v40  ;;  %v2612_v34 = vld [vmem:[%s3574_s1 + $0x428] ss:$16 sps:$4 sm:$0xff]   ;;  %v2632_v40 = vld [vmem:[%s3574_s1 + $0x64] ss:$16 sps:$4 sm:$0xff]   ;;  %v2665_v4 = vld [vmem:[%s3574_s1 + $0xac] ss:$16 sps:$4 sm:$0xff]  }
  0x28   : > { %809 = vmatprep.subr.bf16.mxu1 %v2550_v36  ;;  %737 = vmatprep.subr.bf16.mxu0 %v2558_v41  ;;  %v2623_v36 = vld [vmem:[%s3574_s1 + $0x204] ss:$16 sps:$4 sm:$0xff]   ;;  %v2627_v41 = vld [vmem:[%s3574_s1 + $0x220] ss:$16 sps:$4 sm:$0xff]   ;;  %v2683_v16 = vld [vmem:[%s3574_s1 + $0x10c] ss:$16 sps:$4 sm:$0xff]  }
  0x29   : > { %v2678_v15 = vld [vmem:[%s3574_s1 + $0x160] ss:$16 sps:$4 sm:$0xff]  }
  0x2b   : > { %810 = vmatpush1.bf16.msra.mxu1 %v2548_v38  ;;  %738 = vmatpush1.bf16.msra.mxu0 %v2563_v43  ;;  %v2624_v38 = vld [vmem:[%s3574_s1 + $0x40] ss:$16 sps:$4 sm:$0xff]  }
  0x2c   : > { %811 = vmatprep.subr.bf16.mxu1 %v2556_v39  ;;  %739 = vmatprep.subr.bf16.mxu0 %v2564_v45  ;;  %v2629_v39 = vld [vmem:[%s3574_s1 + $0x224] ss:$16 sps:$4 sm:$0xff]  }
  0x2d   : > { %v174_v43 = vld [vmem:[%s2902_s8 + $0x10] sm:$0xff] }
  0x2e   : > { %v2638_v45 = vld [vmem:[%s3574_s1 + $0x84] ss:$16 sps:$4 sm:$0xff]  }
  0x2f   : > { %812 = vmatpush1.bf16.msra.mxu1 %v2554_v42  ;;  %740 = vmatpush1.bf16.msra.mxu0 %v2569_v48  ;;  %v2630_v42 = vld [vmem:[%s3574_s1 + $0x60] ss:$16 sps:$4 sm:$0xff]  }
  0x30   : > { %813 = vmatprep.subr.bf16.mxu1 %v2562_v44  ;;  %741 = vmatprep.subr.bf16.mxu0 %v2570_v49  ;;  %v2635_v44 = vld [vmem:[%s3574_s1 + $0xc] ss:$16 sps:$4 sm:$0xff]   ;;  %v2636_v48 = vld [vmem:[%s3574_s1 + $0x80] ss:$16 sps:$4 sm:$0xff]  }
  0x31   : > { %v2641_v49 = vld [vmem:[%s3574_s1 + $0x2c] ss:$16 sps:$4 sm:$0xff]  }
  0x33   : > { %814 = vmatpush1.bf16.msra.mxu1 %v2560_v46  ;;  %742 = vmatpush1.bf16.msra.mxu0 %v2575_v53  ;;  %v3150_v46 = vpack.c.bf16 %v174_v43, %v174_v43  ;;  %v2647_v53 = vld [vmem:[%s3574_s1 + $0x4c] ss:$16 sps:$4 sm:$0xff]   ;;  %v2725_v43 = vld [vmem:[%s3574_s1 + $0x484] ss:$16 sps:$4 sm:$0xff]  }
  0x34   : > { %815 = vmatprep.subr.bf16.mxu1 %v2568_v47  ;;  %743 = vmatprep.subr.bf16.mxu0 %v2576_v56  ;;  %v2633_v47 = vld [vmem:[%s3574_s1 + $0x8] ss:$16 sps:$4 sm:$0xff]  }
  0x37   : > { %816 = vmatpush1.bf16.msra.mxu1 %v2566_v52  ;;  %744 = vmatpush1.bf16.msra.mxu0 %v2581_v60  ;;  %v2642_v52 = vld [vmem:[%s3574_s1 + $0xa0] ss:$16 sps:$4 sm:$0xff]   ;;  %v2656_v60 = vld [vmem:[%s3574_s1 + $0xe4] ss:$16 sps:$4 sm:$0xff]  }
  0x38   : > { %817 = vmatprep.subr.bf16.mxu1 %v2574_v55  ;;  %745 = vmatprep.subr.bf16.mxu0 %v2582_v1  ;;  %v173_v55 = vld [vmem:[%s2902_s8 + $0x8] sm:$0xff] }
  0x39   : > { %v248_v56 = vpack.c.bf16 %v173_v55, %v173_v55  ;;  %v2657_v1 = vld [vmem:[%s3574_s1 + $0x88] ss:$16 sps:$4 sm:$0xff]   ;;  %v2731_v55 = vld [vmem:[%s3574_s1 + $0x684] ss:$16 sps:$4 sm:$0xff]  }
  0x3b   : > { %818 = vmatpush1.bf16.msra.mxu1 %v2572_v57  ;;  %746 = vmatpush1.bf16.msra.mxu0 %v2587_v6  ;;  %v2645_v57 = vld [vmem:[%s3574_s1 + $0x48] ss:$16 sps:$4 sm:$0xff]  }
  0x3c   : > { %819 = vmatprep.subr.bf16.mxu1 %v2580_v0  ;;  %747 = vmatprep.subr.bf16.mxu0 %v2588_v8  ;;  %v2662_v0 = vld [vmem:[%s3574_s1 + $0x104] ss:$16 sps:$4 sm:$0xff]   ;;  %v2663_v6 = vld [vmem:[%s3574_s1 + $0xa8] ss:$16 sps:$4 sm:$0xff]   ;;  %v2671_v8 = vld [vmem:[%s3574_s1 + $0xcc] ss:$16 sps:$4 sm:$0xff]  }
  0x3f   : > { %820 = vmatpush1.bf16.msra.mxu1 %v2578_v5  ;;  %748 = vmatpush1.bf16.msra.mxu0 %v2593_v11  ;;  %v2668_v5 = vld [vmem:[%s3574_s1 + $0x124] ss:$16 sps:$4 sm:$0xff]   ;;  %v2672_v11 = vld [vmem:[%s3574_s1 + $0x140] ss:$16 sps:$4 sm:$0xff]  }
  0x40   : > { %821 = vmatprep.subr.bf16.mxu1 %v2586_v7  ;;  %749 = vmatprep.subr.bf16.mxu0 %v2594_v13  ;;  %v2666_v7 = vld [vmem:[%s3574_s1 + $0x120] ss:$16 sps:$4 sm:$0xff]   ;;  %v2680_v13 = vld [vmem:[%s3574_s1 + $0x164] ss:$16 sps:$4 sm:$0xff]  }
  0x43   : > { %822 = vmatpush1.bf16.msra.mxu1 %v2584_v10  ;;  %750 = vmatpush1.bf16.msra.mxu0 %v2599_v18  ;;  %v2669_v10 = vld [vmem:[%s3574_s1 + $0xc8] ss:$16 sps:$4 sm:$0xff]  }
  0x44   : > { %823 = vmatprep.subr.bf16.mxu1 %v2592_v12  ;;  %842 = vmatprep.subr.bf16.mxu0 %v2605_v19  ;;  %v2677_v12 = vld [vmem:[%s3574_s1 + $0xec] ss:$16 sps:$4 sm:$0xff]   ;;  %v2681_v18 = vld [vmem:[%s3574_s1 + $0x108] ss:$16 sps:$4 sm:$0xff]   ;;  %v2684_v19 = vld [vmem:[%s3574_s1 + $0x180] ss:$16 sps:$4 sm:$0xff]  }
  0x46   : > { %752 = vmatmul.mubr.bf16.vlgmr.msra.gmra.mrb[0].mxu0 %v338_v21 }
  0x47   : > { %824 = vmatpush1.bf16.msra.mxu1 %v2590_v14  ;;  %843 = vmatpush1.bf16.msra.mxu0 %v2603_v23  ;;  %v2675_v14 = vld [vmem:[%s3574_s1 + $0xe8] ss:$16 sps:$4 sm:$0xff]   ;;  %v2690_v23 = vld [vmem:[%s3574_s1 + $0x1a0] ss:$16 sps:$4 sm:$0xff]  }
  0x48   : > { %825 = vmatprep.subr.bf16.mxu1 %v2598_v17  ;;  %844 = vmatprep.subr.bf16.mxu0 %v2611_v25  ;;  %v2686_v17 = vld [vmem:[%s3574_s1 + $0x184] ss:$16 sps:$4 sm:$0xff]   ;;  %v2695_v25 = vld [vmem:[%s3574_s1 + $0x14c] ss:$16 sps:$4 sm:$0xff]  }
  0x49   : > { %874 = vmatprep.mubr.bf16.mxu0 %v2839_v2 }
  0x4b   : > { %826 = vmatpush1.bf16.msra.mxu1 %v2596_v20  ;;  %845 = vmatpush1.bf16.msra.mxu0 %v2609_v28  ;;  %v2689_v20 = vld [vmem:[%s3574_s1 + $0x12c] ss:$16 sps:$4 sm:$0xff]   ;;  %v2696_v28 = vld [vmem:[%s3574_s1 + $0x1c0] ss:$16 sps:$4 sm:$0xff]  }
  0x4c   : > { %827 = vmatprep.subr.bf16.mxu1 %v2602_v22  ;;  %1246 = vmatprep.subr.bf16.mxu0 %v2617_v29  ;;  %v2687_v22 = vld [vmem:[%s3574_s1 + $0x128] ss:$16 sps:$4 sm:$0xff]   ;;  %v2701_v29 = vld [vmem:[%s3574_s1 + $0x16c] ss:$16 sps:$4 sm:$0xff]  }
  0x4e   : > { %2273 = vmatmul.mubr.msk.bf16.vlgmr.msra.gmra.mrb[4].mxu0 %vm715_vm0, %v2930_v24  ;;  %v2621_v24 = vld [vmem:[%s3574_s1 + $0x200] ss:$16 sps:$4 sm:$0xff]  }
  0x4f   : > { %828 = vmatpush1.bf16.msra.mxu1 %v2600_v26  ;;  %1247 = vmatpush1.bf16.msra.mxu0 %v2615_v32  ;;  %v2698_v26 = vld [vmem:[%s3574_s1 + $0x1c4] ss:$16 sps:$4 sm:$0xff]   ;;  %v2702_v32 = vld [vmem:[%s3574_s1 + $0x1e0] ss:$16 sps:$4 sm:$0xff]  }
  0x50   : > { %829 = vmatprep.subr.bf16.mxu1 %v2608_v27  ;;  %1248 = vmatprep.subr.bf16.mxu0 %v2620_v33  ;;  %v2693_v27 = vld [vmem:[%s3574_s1 + $0x148] ss:$16 sps:$4 sm:$0xff]   ;;  %v2707_v33 = vld [vmem:[%s3574_s1 + $0x18c] ss:$16 sps:$4 sm:$0xff]  }
  0x51   : > { %1278 = vmatprep.mubr.bf16.mxu0 %v248_v56 }
  0x53   : > { %830 = vmatpush1.bf16.msra.mxu1 %v2606_v30  ;;  %1249 = vmatpush1.bf16.msra.mxu0 %v2618_v35  ;;  %v2704_v30 = vld [vmem:[%s3574_s1 + $0x1e4] ss:$16 sps:$4 sm:$0xff]   ;;  %v2713_v35 = vld [vmem:[%s3574_s1 + $0x20c] ss:$16 sps:$4 sm:$0xff]  }
  0x54   : > { %831 = vmatprep.subr.bf16.mxu1 %v2614_v31  ;;  %1250 = vmatprep.subr.bf16.mxu0 %v2626_v37  ;;  %v2699_v31 = vld [vmem:[%s3574_s1 + $0x168] ss:$16 sps:$4 sm:$0xff]  }
  0x57   : > { %832 = vmatpush1.bf16.msra.mxu1 %v2612_v34  ;;  %1251 = vmatpush1.bf16.msra.mxu0 %v2624_v38  ;;  %v172_v34 = vld [vmem:[%s2902_s8] sm:$0xff]  ;;  %v2711_v38 = vld [vmem:[%s3574_s1 + $0x208] ss:$16 sps:$4 sm:$0xff]  }
  0x58   : > { %1287 = vmatprep.subr.bf16.mxu1 %v2623_v36  ;;  %1252 = vmatprep.subr.bf16.mxu0 %v2632_v40  ;;  %v2705_v36 = vld [vmem:[%s3574_s1 + $0x188] ss:$16 sps:$4 sm:$0xff]   ;;  %v247_v37 = vpack.c.bf16 %v172_v34, %v172_v34 }
  0x59   : > { %v2708_v40 = vld [vmem:[%s3574_s1 + $0x1a8] ss:$16 sps:$4 sm:$0xff]  }
  0x5a   : > { %834 = vmatmul.mubr.bf16.vlgmr.msra.gmra.mrb[4].mxu1 %v338_v21  ;;  %v2692_v21 = vld [vmem:[%s3574_s1 + $0x1a4] ss:$16 sps:$4 sm:$0xff]   ;;  %v2783_v34 = vld [vmem:[%s3574_s1 + $0x568] ss:$16 sps:$4 sm:$0xff]  }
  0x5b   : > { %1288 = vmatpush1.bf16.msra.mxu1 %v2621_v24  ;;  %1319 = vmatprep.mubr.bf16.mxu1 %v2839_v2  ;;  %v2710_v24 = vld [vmem:[%s3574_s1 + $0x1ac] ss:$16 sps:$4 sm:$0xff]  }
  0x5c   : > { %1289 = vmatprep.subr.bf16.mxu1 %v2629_v39  ;;  %1253 = vmatpush1.bf16.msra.mxu0 %v2630_v42  ;;  %v2719_v39 = vld [vmem:[%s3574_s1 + $0x22c] ss:$16 sps:$4 sm:$0xff]   ;;  %v2717_v42 = vld [vmem:[%s3574_s1 + $0x228] ss:$16 sps:$4 sm:$0xff]  }
  0x5d   : > { %1254 = vmatprep.subr.bf16.mxu0 %v2638_v45  ;;  %v1414_v45 = vld [vmem:[%s2902_s8 + $0x20] sm:$0x3] }
  0x5f   : > { %1290 = vmatpush1.bf16.msra.mxu1 %v2627_v41  ;;  %v2716_v41 = vld [vmem:[%s3574_s1 + $0x1cc] ss:$16 sps:$4 sm:$0xff]  }
  0x60   : > { %1328 = vmatprep.subr.bf16.mxu1 %v2635_v44  ;;  %1255 = vmatpush1.bf16.msra.mxu0 %v2636_v48  ;;  %v1411_v44 = vld [vmem:[%s2902_s8 + $0x8] sm:$0xfc] }
  0x61   : > { %1256 = vmatprep.subr.bf16.mxu0 %v2644_v50  ;;  %v1490_v48 = vpack.c.bf16 %v1414_v45, %v1411_v44  ;;  %v2723_v50 = vld [vmem:[%s3574_s1 + $0x480] ss:$16 sps:$4 sm:$0xff]   ;;  %v2806_v44 = vld [vmem:[%s3574_s1 + $0x644] ss:$16 sps:$4 sm:$0xff]   ;;  %v2801_v45 = vld [vmem:[%s3574_s1 + $0x5c8] ss:$16 sps:$4 sm:$0xff]  }
  0x62   : > { %2346 = vmatmul.mubr.msk.bf16.vlgmr.msra.gmra.mrb[8].mxu1 %vm715_vm0, %v3150_v46 }
  0x63   : > { %1329 = vmatpush1.bf16.msra.mxu1 %v2633_v47  ;;  %1360 = vmatprep.mubr.bf16.mxu1 %v248_v56  ;;  %v2714_v47 = vld [vmem:[%s3574_s1 + $0x1c8] ss:$16 sps:$4 sm:$0xff]   ;;  %v2734_v56 = vld [vmem:[%s3574_s1 + $0x4c4] ss:$16 sps:$4 sm:$0xff]  }
  0x64   : > { %1330 = vmatprep.subr.bf16.mxu1 %v2641_v49  ;;  %1257 = vmatpush1.bf16.msra.mxu0 %v2642_v52  ;;  %v2722_v49 = vld [vmem:[%s3574_s1 + $0x1ec] ss:$16 sps:$4 sm:$0xff]   ;;  %v1496_v52 = vrot.slane %v1490_v48, 1  ;;  %v1410_v48 = vld [vmem:[%s2902_s8] sm:$0xfc] }
  0x65   : > { %1258 = vmatprep.subr.bf16.mxu0 %v2650_v54  ;;  %v2726_v54 = vld [vmem:[%s3574_s1 + $0x4a0] ss:$16 sps:$4 sm:$0xff]  }
  0x67   : > { %1331 = vmatpush1.bf16.msra.mxu1 %v2639_v51  ;;  %v2728_v51 = vld [vmem:[%s3574_s1 + $0x4a4] ss:$16 sps:$4 sm:$0xff]  }
  0x68   : > { %1332 = vmatprep.subr.bf16.mxu1 %v2647_v53  ;;  %1259 = vmatpush1.bf16.msra.mxu0 %v2648_v58  ;;  %v2720_v53 = vld [vmem:[%s3574_s1 + $0x1e8] ss:$16 sps:$4 sm:$0xff]   ;;  %v1412_v58 = vld [vmem:[%s2902_s8 + $0x10] sm:$0xfc] }
  0x69   : > { %1260 = vmatprep.subr.bf16.mxu0 %v2656_v60  ;;  %v2737_v60 = vld [vmem:[%s3574_s1 + $0x6a4] ss:$16 sps:$4 sm:$0xff]  }
  0x6b   : > { %1333 = vmatpush1.bf16.msra.mxu1 %v2645_v57  ;;  %v2732_v57 = vld [vmem:[%s3574_s1 + $0x4c0] ss:$16 sps:$4 sm:$0xff]  }
  0x6c   : > { %1334 = vmatprep.subr.bf16.mxu1 %v2653_v59  ;;  %1261 = vmatpush1.bf16.msra.mxu0 %v2654_v62  ;;  %v1415_v59 = vld [vmem:[%s2902_s8 + $0x28] sm:$0x3] }
  0x6d   : > { %1262 = vmatprep.subr.bf16.mxu0 %v2662_v0  ;;  %v1491_v62 = vpack.c.bf16 %v1415_v59, %v1412_v58  ;;  %v2738_v0 = vld [vmem:[%s3574_s1 + $0x4e0] ss:$16 sps:$4 sm:$0xff]   ;;  %v2819_v58 = vld [vmem:[%s3574_s1 + $0x688] ss:$16 sps:$4 sm:$0xff]   ;;  %v2818_v59 = vld [vmem:[%s3574_s1 + $0x62c] ss:$16 sps:$4 sm:$0xff]  }
  0x6f   : > { %1335 = vmatpush1.bf16.msra.mxu1 %v2651_v61  ;;  %v2740_v61 = vld [vmem:[%s3574_s1 + $0x4e4] ss:$16 sps:$4 sm:$0xff]  }
  0x70   : > { %1336 = vmatprep.subr.bf16.mxu1 %v2659_v63  ;;  %1263 = vmatpush1.bf16.msra.mxu0 %v2660_v3  ;;  %v2735_v63 = vld [vmem:[%s3574_s1 + $0x6a0] ss:$16 sps:$4 sm:$0xff]   ;;  %v2746_v3 = vld [vmem:[%s3574_s1 + $0x504] ss:$16 sps:$4 sm:$0xff]  }
  0x71   : > { %1264 = vmatprep.subr.bf16.mxu0 %v2668_v5  ;;  %v2741_v5 = vld [vmem:[%s3574_s1 + $0x488] ss:$16 sps:$4 sm:$0xff]  }
  0x73   : > { %1337 = vmatpush1.bf16.msra.mxu1 %v2657_v1  ;;  %v2743_v1 = vld [vmem:[%s3574_s1 + $0x48c] ss:$16 sps:$4 sm:$0xff]  }
  0x74   : > { %1338 = vmatprep.subr.bf16.mxu1 %v2665_v4  ;;  %1265 = vmatpush1.bf16.msra.mxu0 %v2666_v7  ;;  %v3380_v4 = vrot.slane %v1491_v62, 1  ;;  %v2749_v7 = vld [vmem:[%s3574_s1 + $0x4ac] ss:$16 sps:$4 sm:$0xff]   ;;  %v2825_v62 = vld [vmem:[%s3574_s1 + $0x6a8] ss:$16 sps:$4 sm:$0xff]  }
  0x75   : > { %1266 = vmatprep.subr.bf16.mxu0 %v2674_v9  ;;  %v2747_v9 = vld [vmem:[%s3574_s1 + $0x4a8] ss:$16 sps:$4 sm:$0xff]  }
  0x77   : > { %1339 = vmatpush1.bf16.msra.mxu1 %v2663_v6  ;;  %v2744_v6 = vld [vmem:[%s3574_s1 + $0x500] ss:$16 sps:$4 sm:$0xff]  }
  0x78   : > { %1340 = vmatprep.subr.bf16.mxu1 %v2671_v8  ;;  %1267 = vmatpush1.bf16.msra.mxu0 %v2672_v11  ;;  %v2752_v8 = vld [vmem:[%s3574_s1 + $0x524] ss:$16 sps:$4 sm:$0xff]   ;;  %v2755_v11 = vld [vmem:[%s3574_s1 + $0x4cc] ss:$16 sps:$4 sm:$0xff]  }
  0x79   : > { %1268 = vmatprep.subr.bf16.mxu0 %v2680_v13  ;;  %v2753_v13 = vld [vmem:[%s3574_s1 + $0x4c8] ss:$16 sps:$4 sm:$0xff]  }
  0x7b   : > { %1341 = vmatpush1.bf16.msra.mxu1 %v2669_v10  ;;  %v2750_v10 = vld [vmem:[%s3574_s1 + $0x520] ss:$16 sps:$4 sm:$0xff]  }
  0x7c   : > { %1342 = vmatprep.subr.bf16.mxu1 %v2677_v12  ;;  %1269 = vmatpush1.bf16.msra.mxu0 %v2678_v15  ;;  %v2758_v12 = vld [vmem:[%s3574_s1 + $0x544] ss:$16 sps:$4 sm:$0xff]   ;;  %v2761_v15 = vld [vmem:[%s3574_s1 + $0x4ec] ss:$16 sps:$4 sm:$0xff]  }
  0x7d   : > { %1270 = vmatprep.subr.bf16.mxu0 %v2686_v17  ;;  %v2759_v17 = vld [vmem:[%s3574_s1 + $0x4e8] ss:$16 sps:$4 sm:$0xff]  }
  0x7f   : > { %1343 = vmatpush1.bf16.msra.mxu1 %v2675_v14  ;;  %v2756_v14 = vld [vmem:[%s3574_s1 + $0x540] ss:$16 sps:$4 sm:$0xff]  }
  0x80   : > { %1344 = vmatprep.subr.bf16.mxu1 %v2683_v16  ;;  %1271 = vmatpush1.bf16.msra.mxu0 %v2684_v19  ;;  %v2764_v16 = vld [vmem:[%s3574_s1 + $0x564] ss:$16 sps:$4 sm:$0xff]   ;;  %v2767_v19 = vld [vmem:[%s3574_s1 + $0x50c] ss:$16 sps:$4 sm:$0xff]  }
  0x81   : > { %1272 = vmatprep.subr.bf16.mxu0 %v2692_v21  ;;  %v2765_v21 = vld [vmem:[%s3574_s1 + $0x508] ss:$16 sps:$4 sm:$0xff]  }
  0x83   : > { %1345 = vmatpush1.bf16.msra.mxu1 %v2681_v18  ;;  %v2762_v18 = vld [vmem:[%s3574_s1 + $0x560] ss:$16 sps:$4 sm:$0xff]  }
  0x84   : > { %1346 = vmatprep.subr.bf16.mxu1 %v2689_v20  ;;  %1273 = vmatpush1.bf16.msra.mxu0 %v2690_v23  ;;  %v2770_v20 = vld [vmem:[%s3574_s1 + $0x584] ss:$16 sps:$4 sm:$0xff]   ;;  %v2773_v23 = vld [vmem:[%s3574_s1 + $0x52c] ss:$16 sps:$4 sm:$0xff]  }
  0x85   : > { %1274 = vmatprep.subr.bf16.mxu0 %v2698_v26  ;;  %v2771_v26 = vld [vmem:[%s3574_s1 + $0x528] ss:$16 sps:$4 sm:$0xff]  }
  0x87   : > { %1347 = vmatpush1.bf16.msra.mxu1 %v2687_v22  ;;  %v2768_v22 = vld [vmem:[%s3574_s1 + $0x580] ss:$16 sps:$4 sm:$0xff]  }
  0x88   : > { %1348 = vmatprep.subr.bf16.mxu1 %v2695_v25  ;;  %1275 = vmatpush1.bf16.msra.mxu0 %v2696_v28  ;;  %v2776_v25 = vld [vmem:[%s3574_s1 + $0x5a4] ss:$16 sps:$4 sm:$0xff]   ;;  %v2779_v28 = vld [vmem:[%s3574_s1 + $0x54c] ss:$16 sps:$4 sm:$0xff]  }
  0x89   : > { %1276 = vmatprep.subr.bf16.mxu0 %v2704_v30  ;;  %v2777_v30 = vld [vmem:[%s3574_s1 + $0x548] ss:$16 sps:$4 sm:$0xff]  }
  0x8b   : > { %1349 = vmatpush1.bf16.msra.mxu1 %v2693_v27  ;;  %v2774_v27 = vld [vmem:[%s3574_s1 + $0x5a0] ss:$16 sps:$4 sm:$0xff]  }
  0x8c   : > { %1350 = vmatprep.subr.bf16.mxu1 %v2701_v29  ;;  %1277 = vmatpush1.bf16.msra.mxu0 %v2702_v32  ;;  %v2782_v29 = vld [vmem:[%s3574_s1 + $0x5c4] ss:$16 sps:$4 sm:$0xff]   ;;  %v2785_v32 = vld [vmem:[%s3574_s1 + $0x56c] ss:$16 sps:$4 sm:$0xff]  }
  0x8d   : > { %1369 = vmatprep.subr.bf16.mxu0 %v2713_v35  ;;  %v2786_v35 = vld [vmem:[%s3574_s1 + $0x5e0] ss:$16 sps:$4 sm:$0xff]  }
  0x8f   : > { %1351 = vmatpush1.bf16.msra.mxu1 %v2699_v31  ;;  %1279 = vmatmul.mubr.bf16.vlgmr.msra.gmra.mrb[8].mxu0 %v247_v37  ;;  %v2780_v31 = vld [vmem:[%s3574_s1 + $0x5c0] ss:$16 sps:$4 sm:$0xff]  }
  0x90   : > { %1352 = vmatprep.subr.bf16.mxu1 %v2707_v33  ;;  %1370 = vmatpush1.bf16.msra.mxu0 %v2711_v38  ;;  %v2788_v33 = vld [vmem:[%s3574_s1 + $0x5e4] ss:$16 sps:$4 sm:$0xff]   ;;  %v2792_v38 = vld [vmem:[%s3574_s1 + $0x600] ss:$16 sps:$4 sm:$0xff]  }
  0x91   : > { %1371 = vmatprep.subr.bf16.mxu0 %v2719_v39  ;;  %1401 = vmatprep.mubr.bf16.mxu0 %v2839_v2  ;;  %v2797_v39 = vld [vmem:[%s3574_s1 + $0x5ac] ss:$16 sps:$4 sm:$0xff]  }
  0x93   : > { %1353 = vmatpush1.bf16.msra.mxu1 %v2705_v36  ;;  %v2791_v36 = vld [vmem:[%s3574_s1 + $0x58c] ss:$16 sps:$4 sm:$0xff]  }
  0x94   : > { %1354 = vmatprep.subr.bf16.mxu1 %v2710_v24  ;;  %1372 = vmatpush1.bf16.msra.mxu0 %v2717_v42  ;;  %v2789_v24 = vld [vmem:[%s3574_s1 + $0x588] ss:$16 sps:$4 sm:$0xff]   ;;  %v2798_v42 = vld [vmem:[%s3574_s1 + $0x620] ss:$16 sps:$4 sm:$0xff]  }
  0x95   : > { %1863 = vmatprep.subr.bf16.mxu0 %v2725_v43  ;;  %v2803_v43 = vld [vmem:[%s3574_s1 + $0x5cc] ss:$16 sps:$4 sm:$0xff]  }
  0x97   : > { %1355 = vmatpush1.bf16.msra.mxu1 %v2708_v40  ;;  %2347 = vmatmul.mubr.msk.bf16.vlgmr.msra.gmra.mrb[12].mxu0 %vm715_vm0, %v3150_v46  ;;  %v2729_v46 = vld [vmem:[%s3574_s1 + $0x680] ss:$16 sps:$4 sm:$0xff]   ;;  %v2800_v40 = vld [vmem:[%s3574_s1 + $0x624] ss:$16 sps:$4 sm:$0xff]  }
  0x98   : > { %1356 = vmatprep.subr.bf16.mxu1 %v2716_v41  ;;  %1864 = vmatpush1.bf16.msra.mxu0 %v2723_v50  ;;  %v2795_v41 = vld [vmem:[%s3574_s1 + $0x5a8] ss:$16 sps:$4 sm:$0xff]   ;;  %v2809_v50 = vld [vmem:[%s3574_s1 + $0x5ec] ss:$16 sps:$4 sm:$0xff]  }
  0x99   : > { %1865 = vmatprep.subr.bf16.mxu0 %v2728_v51  ;;  %1895 = vmatprep.mubr.bf16.mxu0 %v1496_v52  ;;  %v2812_v51 = vld [vmem:[%s3574_s1 + $0x664] ss:$16 sps:$4 sm:$0xff]  }
  0x9b   : > { %1357 = vmatpush1.bf16.msra.mxu1 %v2714_v47  ;;  %v2804_v47 = vld [vmem:[%s3574_s1 + $0x640] ss:$16 sps:$4 sm:$0xff]  }
  0x9c   : > { %1358 = vmatprep.subr.bf16.mxu1 %v2722_v49  ;;  %1866 = vmatpush1.bf16.msra.mxu0 %v2726_v54  ;;  %v1413_v49 = vld [vmem:[%s2902_s8 + $0x18] sm:$0x3]  ;;  %v2810_v54 = vld [vmem:[%s3574_s1 + $0x660] ss:$16 sps:$4 sm:$0xff]  }
  0x9d   : > { %1867 = vmatprep.subr.bf16.mxu0 %v2734_v56  ;;  %v2821_v56 = vld [vmem:[%s3574_s1 + $0x68c] ss:$16 sps:$4 sm:$0xff]  }
  0x9f   : > { %1359 = vmatpush1.bf16.msra.mxu1 %v2720_v53  ;;  %v2807_v53 = vld [vmem:[%s3574_s1 + $0x5e8] ss:$16 sps:$4 sm:$0xff]  }
  0xa0   : > { %1904 = vmatprep.subr.bf16.mxu1 %v2731_v55  ;;  %1868 = vmatpush1.bf16.msra.mxu0 %v2732_v57  ;;  %v2815_v55 = vld [vmem:[%s3574_s1 + $0x60c] ss:$16 sps:$4 sm:$0xff]   ;;  %v2813_v57 = vld [vmem:[%s3574_s1 + $0x608] ss:$16 sps:$4 sm:$0xff]  }
  0xa1   : > { %1869 = vmatprep.subr.bf16.mxu0 %v2740_v61  ;;  %v2816_v61 = vld [vmem:[%s3574_s1 + $0x628] ss:$16 sps:$4 sm:$0xff]  }
  0xa2   : > { %1361 = vmatmul.mubr.bf16.vlgmr.msra.gmra.mrb[12].mxu1 %v247_v37  ;;  %v2794_v37 = vld [vmem:[%s3574_s1 + $0x604] ss:$16 sps:$4 sm:$0xff]  }
  0xa3   : > { %1905 = vmatpush1.bf16.msra.mxu1 %v2729_v46  ;;  %1936 = vmatprep.mubr.bf16.mxu1 %v2839_v2 }
  0xa4   : > { %1906 = vmatprep.subr.bf16.mxu1 %v2737_v60  ;;  %1870 = vmatpush1.bf16.msra.mxu0 %v2738_v0  ;;  %v2827_v60 = vld [vmem:[%s3574_s1 + $0x6ac] ss:$16 sps:$4 sm:$0xff]   ;;  %v2822_v0 = vld [vmem:[%s3574_s1 + $0x648] ss:$16 sps:$4 sm:$0xff]  }
  0xa5   : > { %1871 = vmatprep.subr.bf16.mxu0 %v2746_v3  ;;  %v2828_v3 = vld [vmem:[%s3574_s1 + $0x668] ss:$16 sps:$4 sm:$0xff]  }
  0xa7   : > { %1907 = vmatpush1.bf16.msra.mxu1 %v2735_v63  ;;  %v2824_v63 = vld [vmem:[%s3574_s1 + $0x64c] ss:$16 sps:$4 sm:$0xff]  }
  0xa8   : > { %1945 = vmatprep.subr.bf16.mxu1 %v2743_v1  ;;  %1872 = vmatpush1.bf16.msra.mxu0 %v2744_v6  ;;  %v2830_v1 = vld [vmem:[%s3574_s1 + $0x66c] ss:$16 sps:$4 sm:$0xff]  }
  0xa9   : > { %1873 = vmatprep.subr.bf16.mxu0 %v2752_v8 }
  0xaa   : > { %2492 = vmatmul.mubr.msk.bf16.vlgmr.msra.gmra.mrb[16].mxu1 %vm715_vm0, %v3380_v4 }
  0xab   : > { %1946 = vmatpush1.bf16.msra.mxu1 %v2741_v5  ;;  %1977 = vmatprep.mubr.bf16.mxu1 %v1496_v52  ;;  %v1489_v52 = vpack.c.bf16 %v1413_v49, %v1410_v48 }
  0xac   : > { %1947 = vmatprep.subr.bf16.mxu1 %v2749_v7  ;;  %1874 = vmatpush1.bf16.msra.mxu0 %v2750_v10 }
  0xad   : > { %1875 = vmatprep.subr.bf16.mxu0 %v2758_v12  ;;  %v1495_v46 = vrot.slane %v1489_v52, 1  ;;  %v2033_v52 = vlaneseq }
  0xaf   : > { %1948 = vmatpush1.bf16.msra.mxu1 %v2747_v9 }
  0xb0   : > { %1949 = vmatprep.subr.bf16.mxu1 %v2755_v11  ;;  %1876 = vmatpush1.bf16.msra.mxu0 %v2756_v14 }
  0xb1   : > { %1877 = vmatprep.subr.bf16.mxu0 %v2764_v16 }
  0xb3   : > { %1950 = vmatpush1.bf16.msra.mxu1 %v2753_v13 }
  0xb4   : > { %1951 = vmatprep.subr.bf16.mxu1 %v2761_v15  ;;  %1878 = vmatpush1.bf16.msra.mxu0 %v2762_v18 }
  0xb5   : > { %1879 = vmatprep.subr.bf16.mxu0 %v2770_v20 }
  0xb7   : > { %1952 = vmatpush1.bf16.msra.mxu1 %v2759_v17 }
  0xb8   : > { %1953 = vmatprep.subr.bf16.mxu1 %v2767_v19  ;;  %1880 = vmatpush1.bf16.msra.mxu0 %v2768_v22 }
  0xb9   : > { %1881 = vmatprep.subr.bf16.mxu0 %v2776_v25 }
  0xbb   : > { %1954 = vmatpush1.bf16.msra.mxu1 %v2765_v21 }
  0xbc   : > { %1955 = vmatprep.subr.bf16.mxu1 %v2773_v23  ;;  %1882 = vmatpush1.bf16.msra.mxu0 %v2774_v27 }
  0xbd   : > { %1883 = vmatprep.subr.bf16.mxu0 %v2782_v29 }
  0xbf   : > { %1956 = vmatpush1.bf16.msra.mxu1 %v2771_v26 }
  0xc0   : > { %1957 = vmatprep.subr.bf16.mxu1 %v2779_v28  ;;  %1884 = vmatpush1.bf16.msra.mxu0 %v2780_v31 }
  0xc1   : > { %1885 = vmatprep.subr.bf16.mxu0 %v2788_v33 }
  0xc3   : > { %1958 = vmatpush1.bf16.msra.mxu1 %v2777_v30 }
  0xc4   : > { %1959 = vmatprep.subr.bf16.mxu1 %v2785_v32  ;;  %1886 = vmatpush1.bf16.msra.mxu0 %v2786_v35 }
  0xc5   : > { %1887 = vmatprep.subr.bf16.mxu0 %v2794_v37 }
  0xc7   : > { %1960 = vmatpush1.bf16.msra.mxu1 %v2783_v34 }
  0xc8   : > { %1961 = vmatprep.subr.bf16.mxu1 %v2791_v36  ;;  %1888 = vmatpush1.bf16.msra.mxu0 %v2792_v38 }
  0xc9   : > { %1889 = vmatprep.subr.bf16.mxu0 %v2800_v40 }
  0xcb   : > { %1962 = vmatpush1.bf16.msra.mxu1 %v2789_v24 }
  0xcc   : > { %1963 = vmatprep.subr.bf16.mxu1 %v2797_v39  ;;  %1890 = vmatpush1.bf16.msra.mxu0 %v2798_v42 }
  0xcd   : > { %1891 = vmatprep.subr.bf16.mxu0 %v2806_v44 }
  0xcf   : > { %1964 = vmatpush1.bf16.msra.mxu1 %v2795_v41 }
  0xd0   : > { %1965 = vmatprep.subr.bf16.mxu1 %v2803_v43  ;;  %1892 = vmatpush1.bf16.msra.mxu0 %v2804_v47 }
  0xd1   : > { %1893 = vmatprep.subr.bf16.mxu0 %v2812_v51 }
  0xd3   : > { %1966 = vmatpush1.bf16.msra.mxu1 %v2801_v45 }
  0xd4   : > { %1967 = vmatprep.subr.bf16.mxu1 %v2809_v50  ;;  %1894 = vmatpush1.bf16.msra.mxu0 %v2810_v54 }
  0xd5   : > { %1986 = vmatprep.subr.bf16.mxu0 %v2821_v56 }
  0xd7   : > { %1968 = vmatpush1.bf16.msra.mxu1 %v2807_v53  ;;  %1896 = vmatmul.mubr.bf16.vlgmr.msra.gmra.mrb[16].mxu0 %v1495_v46  ;;  %v2034_v53 = vshrl.u32 %v2033_v52, 7 }
  0xd8   : > { %1969 = vmatprep.subr.bf16.mxu1 %v2815_v55  ;;  %1987 = vmatpush1.bf16.msra.mxu0 %v2819_v58  ;;  %v2031_v55 = vld [vmem:[%s3575_s2] sm:$0xf] }
  0xd9   : > { %1988 = vmatprep.subr.bf16.mxu0 %v2827_v60  ;;  %2018 = vmatprep.mubr.bf16.mxu0 %v2839_v2  ;;  %v2035_v54 = vsub.s32 0, %v2034_v53  ;;  %v2039_v56 = vsub.s32 1, %v2034_v53 }
  0xdb   : > { %1970 = vmatpush1.bf16.msra.mxu1 %v2813_v57  ;;  %v2036_v58 = vrot.slane %v2031_v55, %v2035_v54 }
  0xdc   : > { %1971 = vmatprep.subr.bf16.mxu1 %v2818_v59  ;;  %1989 = vmatpush1.bf16.msra.mxu0 %v2825_v62 }
  0xdf   : > { %1972 = vmatpush1.bf16.msra.mxu1 %v2816_v61  ;;  %2493 = vmatmul.mubr.msk.bf16.vlgmr.msra.gmra.mrb[20].mxu0 %vm715_vm0, %v3380_v4  ;;  %v2040_v61 = vrot.slane %v2031_v55, %v2039_v56 }
  0xe0   : > { %1973 = vmatprep.subr.bf16.mxu1 %v2824_v63 }
  0xe3   : > { %1974 = vmatpush1.bf16.msra.mxu1 %v2822_v0 }
  0xe4   : > { %1975 = vmatprep.subr.bf16.mxu1 %v2830_v1 }
  0xe7   : > { %1976 = vmatpush1.bf16.msra.mxu1 %v2828_v3 }
  0xea   : > { %1978 = vmatmul.mubr.bf16.vlgmr.msra.gmra.mrb[20].mxu1 %v1495_v46 }
  0xed   : > { %v794_v2 = vpop.f32.mrb[0].mxu1 }
  0xee   : > { %v796_v5 = vpop.f32.mrb[1].mxu1 }
  0xef   : > { %v798_v6 = vpop.f32.mrb[2].mxu1 }
  0xf0   : > { %v799_v7 = vpop.f32.mrb[3].mxu1 }
 0x119   : > { %v753_v8 = vpop.f32.mrb[0].mxu0 }
 0x11a   : > { %v795_v9 = vadd.f32 %v794_v2, %v753_v8  ;;  %v755_v10 = vpop.f32.mrb[1].mxu0 }
 0x11b   : > { %v797_v11 = vadd.f32 %v796_v5, %v755_v10  ;;  %v757_v12 = vpop.f32.mrb[2].mxu0 }
 0x11c   : > { %v758_v13 = vpop.f32.mrb[3].mxu0  ;;  %v2047_v12 = vsub.s32 3, %v2034_v53 }
 0x121   : > { %v876_v14 = vpop.f32.mrb[4].mxu0 }
 0x122   : > { %v878_v4 = vpop.f32.mrb[5].mxu0 }
 0x123   : > { %v880_v15 = vpop.f32.mrb[6].mxu0 }
 0x124   : > { %v881_v16 = vpop.f32.mrb[7].mxu0 }
 0x12d   : > { %v835_v17 = vpop.f32.mrb[4].mxu1 }
 0x12e   : > { %v877_v18 = vadd.f32 %v876_v14, %v835_v17  ;;  %v837_v19 = vpop.f32.mrb[5].mxu1  ;;  %v2048_v17 = vrot.slane %v2031_v55, %v2047_v12 }
 0x12f   : > { %v879_v20 = vadd.f32 %v878_v4, %v837_v19  ;;  %v839_v21 = vpop.f32.mrb[6].mxu1 }
 0x130   : > { %v840_v22 = vpop.f32.mrb[7].mxu1 }
 0x135   : > { %v1321_v23 = vpop.f32.mrb[8].mxu1 }
 0x136   : > { %v1323_v25 = vpop.f32.mrb[9].mxu1 }
 0x137   : > { %v1325_v26 = vpop.f32.mrb[10].mxu1 }
 0x138   : > { %v1326_v27 = vpop.f32.mrb[11].mxu1 }
 0x162   : > { %v1280_v28 = vpop.f32.mrb[8].mxu0 }
 0x163   : > { %v1281_v29 = vadd.f32 %v1280_v28, %v795_v9  ;;  %v1282_v30 = vpop.f32.mrb[9].mxu0 }
 0x164   : > { %v1283_v31 = vadd.f32 %v1282_v30, %v797_v11  ;;  %v1284_v32 = vpop.f32.mrb[10].mxu0  ;;  %v2043_v11 = vsub.s32 2, %v2034_v53 }
 0x165   : > { %v1322_v33 = vadd.f32 %v1321_v23, %v1281_v29  ;;  %v1285_v34 = vpop.f32.mrb[11].mxu0 }
 0x166   : > { %v1324_v35 = vadd.f32 %v1323_v25, %v1283_v31  ;;  %v2044_v4 = vrot.slane %v2031_v55, %v2043_v11 }
 0x16a   : > { %v1403_v36 = vpop.f32.mrb[12].mxu0 }
 0x16b   : > { %v1405_v37 = vpop.f32.mrb[13].mxu0 }
 0x16c   : > { %v1407_v24 = vpop.f32.mrb[14].mxu0 }
 0x16d   : > { %v1408_v38 = vpop.f32.mrb[15].mxu0 }
 0x175   : > { %v1362_v39 = vpop.f32.mrb[12].mxu1 }
 0x176   : > { %v1363_v40 = vadd.f32 %v1362_v39, %v877_v18  ;;  %v1364_v41 = vpop.f32.mrb[13].mxu1 }
 0x177   : > { %v1365_v42 = vadd.f32 %v1364_v41, %v879_v20  ;;  %v1366_v43 = vpop.f32.mrb[14].mxu1 }
 0x178   : > { %v1404_v44 = vadd.f32 %v1403_v36, %v1363_v40  ;;  %v1367_v45 = vpop.f32.mrb[15].mxu1 }
 0x179   : > { %v1406_v47 = vadd.f32 %v1405_v37, %v1365_v42 }
 0x17d   : > { %v1938_v48 = vpop.f32.mrb[16].mxu1 }
 0x17e   : > { %v1940_v49 = vpop.f32.mrb[17].mxu1 }
 0x17f   : > { %v1942_v50 = vpop.f32.mrb[18].mxu1 }
 0x180   : > { %v1943_v51 = vpop.f32.mrb[19].mxu1 }
 0x1aa   : > { %v1897_v46 = vpop.f32.mrb[16].mxu0 }
 0x1ab   : > { %v1939_v57 = vadd.f32 %v1938_v48, %v1897_v46  ;;  %v1899_v59 = vpop.f32.mrb[17].mxu0 }
 0x1ac   : > { %v1941_v60 = vadd.f32 %v1940_v49, %v1899_v59  ;;  %v1901_v62 = vpop.f32.mrb[18].mxu0 }
 0x1ad   : > { %v2027_v63 = vadd.f32 %v1939_v57, %v1322_v33  ;;  %v1902_v0 = vpop.f32.mrb[19].mxu0 }
 0x1ae   : > { %v2028_v1 = vadd.f32 %v1941_v60, %v1324_v35 }
 0x1af   : > { %v2053_v3 = vadd.f32 %v2036_v58, %v2027_v63 }
 0x1b0   : > { %v2054_v2 = vadd.f32 %v2040_v61, %v2028_v1 }
 0x1b1   : > { %v2057_v5 = vmax.f32 %v2053_v3, 0.0 }
 0x1b2   : > { %v2058_v6 = vmax.f32 %v2054_v2, 0.0  ;;  %v2020_v7 = vpop.f32.mrb[20].mxu0 }
 0x1b3   : > { %2061 = vst [vmem:[%s170_s20] sm:$0xff] %v2057_v5  ;;  %v2022_v8 = vpop.f32.mrb[21].mxu0 }
 0x1b4   : > { %2062 = vst [vmem:[%s170_s20 + $0x8] sm:$0xff] %v2058_v6  ;;  %v2024_v9 = vpop.f32.mrb[22].mxu0 }
 0x1b5   : > { %v2025_v10 = vpop.f32.mrb[23].mxu0 }
 0x1bd   : > { %v1979_v13 = vpop.f32.mrb[20].mxu1 }
 0x1be   : > { %v2021_v14 = vadd.f32 %v2020_v7, %v1979_v13  ;;  %v1981_v15 = vpop.f32.mrb[21].mxu1 }
 0x1bf   : > { %v2023_v16 = vadd.f32 %v2022_v8, %v1981_v15  ;;  %v1983_v18 = vpop.f32.mrb[22].mxu1 }
 0x1c0   : > { %v2029_v19 = vadd.f32 %v2021_v14, %v1404_v44  ;;  %v1984_v20 = vpop.f32.mrb[23].mxu1 }
 0x1c1   : > { %v2030_v21 = vadd.f32 %v2023_v16, %v1406_v47 }
 0x1c2   : > { %v2055_v22 = vadd.f32 %v2044_v4, %v2029_v19 }
 0x1c3   : > { %v2056_v23 = vadd.f32 %v2048_v17, %v2030_v21 }
 0x1c4   : > { %v2059_v25 = vmax.f32 %v2055_v22, 0.0 }
 0x1c5   : > { %v2060_v26 = vmax.f32 %v2056_v23, 0.0 }
 0x1c6   : > { %2063 = vst [vmem:[%s170_s20 + $0x10] sm:$0xff] %v2059_v25 }
 0x1c7   : > { %2064 = vst [vmem:[%s170_s20 + $0x18] sm:$0xff] %v2060_v26 }
 0x1c8 PF: > { %s13_s12 = sadd.s32 1, %s2837_s12  }
 0x1c9   : > { %p10_p4 = scmp.ge.s32.totalorder %s13_s12, 4  }
 0x1cb   :  { %12 = sbr.rel (!%p10_p4) target bundleno = 1 (0x1), region = 64 }

// kernel: collection_status_forward.10
= control target key start
LH: loop header
LB: loop body
LE: loop exit
PB: predicated region body
PF: predicated region fallthrough
CT: control target
= control target key end

     0   :  { %s542_s15 = smov 0   ;;  %s617_s0 = inlined_call_operand.vmem [shape: f32[2,4,256], index: 0, kind: input, shape index: {}]   ;;  %s618_s1 = inlined_call_operand.vmem [shape: bf16[256,128], index: 1, kind: input, shape index: {}]   ;;  %s619_s2 = inlined_call_operand.vmem [shape: f32[1,128], index: 2, kind: input, shape index: {}]   ;;  %s620_s3 = inlined_call_operand.vmem [shape: f32[1,4,128], index: 3, kind: input, shape index: {}]   ;;  %s621_s4 = inlined_call_operand.vmem [shape: f32[2,4,128], index: 4, kind: output, shape index: {}]  }
   0x1 LB: > { %s434_s16 = sadd.s32 4294967295, %s515_s15   ;;  %p438_p0 = scmp.ge.s32.totalorder %s515_s15, 1  ;;  %s515_s15 = sphi %s542_s15, %s14_s15  }
   0x2   : > { %p162_p1 = scmp.lt.s32.totalorder %s515_s15, 3 }
   0x4   : > { %p163_p2 = pnand %p438_p0, %p162_p1 }
   0x5   : > { %v492_v0 = vld [vmem:[%s618_s1 + $0x40] sm:$0xff] (!%p163_p2)   ;;  %v494_v2 = vld [vmem:[%s618_s1 + $0x48] sm:$0xff] (!%p163_p2)   ;;  %p187_p3 = scmp.lt.s32.totalorder (!%p163_p2), %s434_s16, 1  ;;  %v496_v4 = vld [vmem:[%s618_s1 + $0x50] sm:$0xff] (!%p163_p2)  }
   0x6   : > { %166 = sbr.rel (%p163_p2) target bundleno = 258 (0x102), region = 36  ;;  %v493_v1 = vld [vmem:[%s618_s1] sm:$0xff] (!%p163_p2)   ;;  %462 = vmatprep.subr.bf16.mxu0 (!%p163_p2), %v492_v0  ;;  %v495_v3 = vld [vmem:[%s618_s1 + $0x8] sm:$0xff] (!%p163_p2)   ;;  %v497_v5 = vld [vmem:[%s618_s1 + $0x10] sm:$0xff] (!%p163_p2)  }
   0x7   : > { %463 = vmatpush3.bf16.msra.mxu0 (!%p163_p2), %v493_v1  ;;  %v498_v6 = vld [vmem:[%s618_s1 + $0x58] sm:$0xff] (!%p163_p2)   ;;  %v500_v8 = vld [vmem:[%s618_s1 + $0x60] sm:$0xff] (!%p163_p2)   ;;  %v502_v10 = vld [vmem:[%s618_s1 + $0x68] sm:$0xff] (!%p163_p2)  }
   0x8   : > { %464 = vmatprep.subr.bf16.mxu0 (!%p163_p2), %v494_v2  ;;  %v499_v7 = vld [vmem:[%s618_s1 + $0x18] sm:$0xff] (!%p163_p2)   ;;  %v501_v9 = vld [vmem:[%s618_s1 + $0x20] sm:$0xff] (!%p163_p2)   ;;  %v503_v13 = vld [vmem:[%s618_s1 + $0x28] sm:$0xff] (!%p163_p2)  }
   0x9   : > { %v504_v15 = vld [vmem:[%s618_s1 + $0x70] sm:$0xff] (!%p163_p2)   ;;  %v506_v17 = vld [vmem:[%s618_s1 + $0x78] sm:$0xff] (!%p163_p2)   ;;  %v442_v21 = vld [vmem:[%s619_s2] ss:$0 sm:$0xff] (!%p163_p2) }
   0xa   : > { %v505_v16 = vld [vmem:[%s618_s1 + $0x30] sm:$0xff] (!%p163_p2)   ;;  %v507_v18 = vld [vmem:[%s618_s1 + $0x38] sm:$0xff] (!%p163_p2)   ;;  %v378_v25 = vld [vmem:[%s620_s3] sm:$0xf] (!%p163_p2) }
   0xb   : > { %465 = vmatpush3.bf16.msra.mxu0 (!%p163_p2), %v495_v3 }
   0xc   : > { %466 = vmatprep.subr.bf16.mxu0 (!%p163_p2), %v496_v4 }
   0xd   : > { %s623_s16 = smov (!%p187_p3, %s434_s16), 1 }
   0xe   : > { %s461_s5 = sshll.u32 %s623_s16, 3 }
   0xf   : > { %467 = vmatpush3.bf16.msra.mxu0 %v497_v5  ;;  %s191_s12 = scalar_lea.vmem %s617_s0, %s461_s5  ;;  %s441_s5 = sshll.u32 %s623_s16, 2 }
  0x10   : > { %468 = vmatprep.subr.bf16.mxu0 %v498_v6  ;;  %v197_v11 = vld [vmem:[%s191_s12] sm:$0xff]  ;;  %s195_s10 = scalar_lea.vmem %s621_s4, %s441_s5 }
  0x11   : > { %v231_v12 = vcombine.high %v197_v11, %v197_v11  ;;  %v233_v19 = vpack.c.bf16 %v197_v11, %v197_v11 }
  0x13   : > { %469 = vmatpush3.bf16.msra.mxu0 %v499_v7  ;;  %v234_v14 = vpack.c.bf16 %v231_v12, %v231_v12 }
  0x14   : > { %470 = vmatprep.subr.bf16.mxu0 %v500_v8 }
  0x15   : > { %370 = vmatprep.mubr.bf16.mxu0 %v234_v14 }
  0x17   : > { %471 = vmatpush3.bf16.msra.mxu0 %v501_v9 }
  0x18   : > { %472 = vmatprep.subr.bf16.mxu0 %v502_v10 }
  0x1b   : > { %473 = vmatpush3.bf16.msra.mxu0 %v503_v13 }
  0x1c   : > { %474 = vmatprep.subr.bf16.mxu0 %v504_v15 }
  0x1f   : > { %475 = vmatpush3.bf16.msra.mxu0 %v505_v16 }
  0x20   : > { %476 = vmatprep.subr.bf16.mxu0 %v506_v17 }
  0x23   : > { %477 = vmatpush3.bf16.msra.mxu0 %v507_v18 }
  0x26   : > { %371 = vmatmul.mubr.bf16.vlgmr.msra.gmra.mrb[0].mxu0 %v233_v19 }
  0xf9   : > { %v478_v20 = vpop.f32.mrb[0].mxu0 }
  0xfa   : > { %v479_v22 = vpop.f32.mrb[1].mxu0 }
  0xfb   : > { %v480_v23 = vadd.f32 %v479_v22, %v478_v20  ;;  %v481_v24 = vpop.f32.mrb[2].mxu0 }
  0xfc   : > { %v482_v26 = vpop.f32.mrb[3].mxu0 }
  0xfd   : > { %v373_v27 = vadd.f32 %v480_v23, %v442_v21 }
  0xff   : > { %v379_v28 = vadd.f32 %v378_v25, %v373_v27 }
 0x101   : > { %380 = vst [vmem:[%s195_s10] sm:$0xf] %v379_v28 }
 0x102 PF: > { %s14_s15 = sadd.s32 1, %s515_s15  }
 0x103   : > { %p11_p4 = scmp.ge.s32.totalorder %s14_s15, 4  }
 0x105   :  { %13 = sbr.rel (!%p11_p4) target bundleno = 1 (0x1), region = 66 }

// kernel: collection_status_forward.15
= control target key start
LH: loop header
LB: loop body
LE: loop exit
PB: predicated region body
PF: predicated region fallthrough
CT: control target
= control target key end

     0   :  { %s1471_s0 = inlined_call_operand.vmem [shape: f32[2,4,128], index: 0, kind: input, shape index: {}]   ;;  %s1472_s1 = inlined_call_operand.vmem [shape: f32[2,16,128], index: 1, kind: input, shape index: {}]   ;;  %s1473_s2 = inlined_call_operand.vmem [shape: f32[2,1,4], index: 2, kind: input, shape index: {}]   ;;  %s1474_s3 = inlined_call_operand.vmem [shape: bf16[4,128], index: 3, kind: input, shape index: {}]   ;;  %s1475_s4 = inlined_call_operand.vmem [shape: f32[1,128], index: 4, kind: input, shape index: {}]   ;;  %s1476_s5 = inlined_call_operand.vmem [shape: bf16[384,128], index: 5, kind: input, shape index: {}]   ;;  %s1477_s6 = inlined_call_operand.vmem [shape: f32[1,128], index: 6, kind: input, shape index: {}]   ;;  %s1478_s7 = inlined_call_operand.vmem [shape: bf16[128,4], index: 7, kind: input, shape index: {}]   ;;  %s1479_s8 = inlined_call_operand.vmem [shape: f32[1,4], index: 8, kind: input, shape index: {}]   ;;  %s1480_s9 = inlined_call_operand.hbm [shape: f32[2,1,4], index: 9, kind: output, shape index: {}]  }
   0x1   :  { %1481 = sst [smem:[#allocation5_spill]] %s1473_s2 }
   0x2   :  { %1482 = sst [smem:[#allocation6_spill]] %s1474_s3 }
   0x3   :  { %14 = vsyncpa [#allocation3], 0 }
   0x4   :  { %16 = vsyncpa [#allocation3 + $0x1], 0  ;;  %s1229_s30 = smov 0   ;;  %s1231_s10 = smov 0  }
   0x5   :  { %s1233_s11 = smov 0   ;;  %s1235_s12 = smov 0  }
   0x6 LB: > { %s1250_s13 = sadd.s32 4294967295, %s1174_s12   ;;  %s907_s14 = sadd.s32 4294967294, %s1174_s12   ;;  %s1174_s12 = sphi %s1235_s12, %s1490_s12   ;;  %s1170_s11 = sphi %s1233_s11, %s1489_s11   ;;  %s1166_s10 = sphi %s1231_s10, %s1488_s10   ;;  %s1162_s30 = sphi %s1229_s30, %s1487_s30  }
   0x7   : > { %s1254_s15 = sadd.s32 1, %s1174_s12   ;;  %s233_s16 = sadd.s32 1, %s1170_s11 }
   0x8   : > { %s230_s17 = ssub.s32 %s1174_s12, %s1254_s15  ;;  %p243_p0 = scmp.ne.s32.totalorder %s1170_s11, %s1166_s10 }
   0x9   : > { %p231_p1 = scmp.eq.s32.totalorder %s230_s17, 0  ;;  %p244_p2 = scmp.eq.s32.totalorder %s1250_s13, 1 }
   0xa   : > { %p249_p3 = scmp.ne.s32.totalorder %s1166_s10, %s1162_s30  ;;  %p250_p4 = scmp.eq.s32.totalorder %s907_s14, 1 }
   0xb   : > { %s1265_s18 = scalar_select %p231_p1, %s1170_s11, %s233_s16  }
   0xc   : > { %p1267_p5 = por %p244_p2, %p243_p0  ;;  %p1271_p6 = por %p250_p4, %p249_p3 }
   0xd   : > { %p910_p7 = scmp.ge.s32.totalorder %s1174_s12, 1  ;;  %p307_p8 = scmp.lt.s32.totalorder %s1174_s12, 3 }
   0xf   : > { %p308_p9 = pnand %p910_p7, %p307_p8 }
  0x10   : > { %s1485_s3 = sld [smem:[#allocation6_spill]] (!%p308_p9)  ;;  %vm390_vm0 = vcmask (!%p308_p9), 1041408   ;;  %p349_p10 = scmp.lt.s32.totalorder (!%p308_p9), %s1250_s13, 1  ;;  %v1176_v1 = vmov (!%p308_p9), 0.0   ;;  %vm1177_vm1 = vmmov (!%p308_p9), 0   ;;  %v1080_v3 = vld [vmem:[%s1476_s5 + $0x40] sm:$0xff] (!%p308_p9)  }
  0x11   : > { %311 = sbr.rel (%p308_p9) target bundleno = 690 (0x2b2), region = 56  ;;  %993 = vmatprep.subr.bf16.mxu0 (!%p308_p9), %v1176_v1  ;;  %995 = vmatprep.mubr.msk.bf16.mxu0 (!%p308_p9), %vm1177_vm1, %v1176_v1  ;;  %v1081_v4 = vld [vmem:[%s1476_s5] sm:$0xff] (!%p308_p9)   ;;  %s1486_s2 = sld [smem:[#allocation5_spill]] (!%p308_p9)  ;;  %v1082_v5 = vld [vmem:[%s1476_s5 + $0x48] sm:$0xff] (!%p308_p9)   ;;  %vm386_vm2 = vcmask (!%p308_p9), 31744   ;;  %v1084_v9 = vld [vmem:[%s1476_s5 + $0x50] sm:$0xff] (!%p308_p9)  }
  0x12   : > { %953 = vmatprep.subr.bf16.mxu1 (!%p308_p9), %v1080_v3  ;;  %v1083_v7 = vld [vmem:[%s1476_s5 + $0x8] sm:$0xff] (!%p308_p9)   ;;  %v1086_v10 = vld [vmem:[%s1476_s5 + $0x80] sm:$0xff] (!%p308_p9)   ;;  %v1085_v11 = vld [vmem:[%s1476_s5 + $0x10] sm:$0xff] (!%p308_p9)   ;;  %vm363_vm3 = vcmask (!%p308_p9), 1043456   ;;  %s947_s29 = sshll.u32 (!%p308_p9), %s1250_s13, 4  ;;  %vm816_vm4 = vcmask (!%p308_p9), 24576  }
  0x13   : > { %954 = vmatpush3.bf16.msra.mxu1 (!%p308_p9), %v1081_v4  ;;  %v1087_v12 = vld [vmem:[%s1476_s5 + $0x58] sm:$0xff] (!%p308_p9)   ;;  %v1089_v13 = vld [vmem:[%s1476_s5 + $0x88] sm:$0xff] (!%p308_p9)   ;;  %v1090_v15 = vld [vmem:[%s1476_s5 + $0x60] sm:$0xff] (!%p308_p9)  }
  0x14   : > { %955 = vmatprep.subr.bf16.mxu1 (!%p308_p9), %v1082_v5  ;;  %v1088_v14 = vld [vmem:[%s1476_s5 + $0x18] sm:$0xff] (!%p308_p9)   ;;  %v1092_v16 = vld [vmem:[%s1476_s5 + $0x90] sm:$0xff] (!%p308_p9)   ;;  %v1091_v17 = vld [vmem:[%s1476_s5 + $0x20] sm:$0xff] (!%p308_p9)  }
  0x15   : > { %v1093_v18 = vld [vmem:[%s1476_s5 + $0x68] sm:$0xff] (!%p308_p9)   ;;  %v1095_v19 = vld [vmem:[%s1476_s5 + $0x98] sm:$0xff] (!%p308_p9)   ;;  %v1096_v21 = vld [vmem:[%s1476_s5 + $0x70] sm:$0xff] (!%p308_p9)  }
  0x16   : > { %v383_v0 = vld [vmem:[%s1485_s3] sm:$0x3] (!%p308_p9)  ;;  %v1094_v20 = vld [vmem:[%s1476_s5 + $0x28] sm:$0xff] (!%p308_p9)   ;;  %v1097_v26 = vld [vmem:[%s1476_s5 + $0x30] sm:$0xff] (!%p308_p9)   ;;  %s347_s3 = sand.u32 (!%p308_p9), 1, %s1166_s10  }
  0x17   : > { %v392_v2 = vsel (!%p308_p9), %vm390_vm0, %v383_v0, 0  ;;  %956 = vmatpush3.bf16.msra.mxu1 (!%p308_p9), %v1083_v7  ;;  %v1098_v22 = vld [vmem:[%s1476_s5 + $0xa0] sm:$0xff] (!%p308_p9)   ;;  %v1099_v27 = vld [vmem:[%s1476_s5 + $0x78] sm:$0xff] (!%p308_p9)   ;;  %v1101_v30 = vld [vmem:[%s1476_s5 + $0xa8] sm:$0xff] (!%p308_p9)  }
  0x18   : > { %994 = vmatpush3.bf16.msra.mxu0 %v392_v2  ;;  %s1285_s23 = scalar_select %p349_p10, %s1250_s13, 1  ;;  %957 = vmatprep.subr.bf16.mxu1 %v1084_v9  ;;  %v1100_v32 = vld [vmem:[%s1476_s5 + $0x38] sm:$0xff]   ;;  %v1102_v37 = vld [vmem:[%s1476_s5 + $0xb0] sm:$0xff]   ;;  %v1104_v50 = vld [vmem:[%s1478_s7] sm:$0xff]  }
  0x19   : > { %999 = vmatprep.subr.bf16.mxu0 %v1176_v1  ;;  %v1103_v49 = vld [vmem:[%s1476_s5 + $0xb8] sm:$0xff]   ;;  %v1105_v51 = vld [vmem:[%s1478_s7 + $0x8] sm:$0xff]   ;;  %v1106_v52 = vld [vmem:[%s1478_s7 + $0x10] sm:$0xff]   ;;  %s819_s13 = scalar_lea.sflag [#allocation3], %s347_s3 }
  0x1a   : > { %s360_s14 = scalar_lea.vmem %s1486_s2, %s1285_s23  ;;  %s950_s21 = sshll.u32 %s1285_s23, 4  ;;  %v1107_v53 = vld [vmem:[%s1478_s7 + $0x18] sm:$0xff]   ;;  %v1108_v54 = vld [vmem:[%s1478_s7 + $0x20] sm:$0xff]   ;;  %v1109_v55 = vld [vmem:[%s1478_s7 + $0x28] sm:$0xff]  }
  0x1b   : > { %v382_v6 = vld [vmem:[%s360_s14] sm:$0x1]  ;;  %958 = vmatpush3.bf16.msra.mxu1 %v1085_v11  ;;  %s911_s25 = sshll.u32 %s1285_s23, 2  ;;  %s357_s14 = scalar_lea.vmem %s1472_s1, %s950_s21  ;;  %v1110_v56 = vld [vmem:[%s1478_s7 + $0x30] sm:$0xff]  }
  0x1c   : > { %v384_v8 = vpack.c.bf16 %v382_v6, %v382_v6  ;;  %959 = vmatprep.subr.bf16.mxu1 %v1087_v12  ;;  %s352_s22 = scalar_lea.vmem %s1471_s0, %s911_s25  ;;  %v372_v23 = vld [vmem:[%s357_s14] sm:$0xff]  ;;  %v373_v24 = vld [vmem:[%s357_s14 + $0x8] sm:$0xff]  ;;  %s348_s14 = scalar_lea.vmem [#allocation2], %s347_s3 }
  0x1d   : > { %v362_v25 = vld [vmem:[%s352_s22] sm:$0xf]  ;;  %v374_v28 = vadd.f32 %v373_v24, %v372_v23  ;;  %s831_s16 = sshll.u32 %s348_s14, 4  ;;  %s1429_s23 = scalar_lea.hbm %s1480_s9, %s947_s29  ;;  %s1431_s16 = int_to_ptr.vmem [resolvable:$true] %s831_s16 }
  0x1e   : > { %996 = vmatmul.mubr.msk.bf16.vlgmr.msra.gmra.mrb[0].mxu0 %vm386_vm2, %v384_v8  ;;  %v364_v29 = vsel %vm363_vm3, %v362_v25, 0.0  ;;  %v385_v57 = vld [vmem:[%s1475_s4] sm:$0x1]  ;;  %s1112_s24 = scalar_lea.vmem %s1431_s16, 16  ;;  %s1178_s21 = smov [#allocation2]  }
  0x1f   : > { %1015 = vmatprep.mubr.msk.bf16.mxu0 %vm1177_vm1, %v1176_v1  ;;  %1000 = vmatpush3.bf16.msra.mxu0 %v1086_v10  ;;  %v365_v31 = vrot.slane %v364_v29, 4  ;;  %v375_v33 = vrot.slane %v374_v28, 4  ;;  %v485_v6 = vld [vmem:[%s1477_s6] sm:$0x1]  ;;  %p1113_p11 = scmp.ne.s32.totalorder %s1431_s16, %s1112_s24  ;;  %s1116_s26 = sshll.u32 %s1178_s21, 4  ;;  %s1117_s26 = int_to_ptr.vmem [resolvable:$false] %s1116_s26 }
  0x20   : > { %1001 = vmatprep.subr.bf16.mxu0 %v1176_v1  ;;  %960 = vmatpush3.bf16.msra.mxu1 %v1088_v14  ;;  %v727_v14 = vld [vmem:[%s1479_s8] sm:$0x1]  ;;  %s1118_s27 = scalar_lea.vmem %s1117_s26, 32  ;;  %p1119_p0 = scmp.lt.s32.totalorder %s1431_s16, %s1117_s26 }
  0x21   : > { %961 = vmatprep.subr.bf16.mxu1 %v1090_v15  ;;  %v366_v34 = vadd.f32 %v365_v31, %v364_v29  ;;  %v376_v35 = vadd.f32 %v375_v33, %v374_v28  ;;  %p1114_p12 = pnand %p1113_p11, %p1267_p5  ;;  %p1120_p1 = scmp.lt.s32.totalorder %s1118_s27, %s1112_s24 }
  0x23   : > { %1002 = vmatpush3.bf16.msra.mxu0 %v1089_v13  ;;  %v367_v36 = vrot.slane %v366_v34, 2  ;;  %v377_v38 = vrot.slane %v376_v35, 2  ;;  %p1115_p13 = pneg %p1114_p12  ;;  %p1121_p2 = por %p1120_p1, %p1119_p0 }
  0x24   : > { %1003 = vmatprep.subr.bf16.mxu0 %v1176_v1  ;;  %962 = vmatpush3.bf16.msra.mxu1 %v1091_v17 }
  0x25   : > { %963 = vmatprep.subr.bf16.mxu1 %v1093_v18  ;;  %v368_v39 = vadd.f32 %v367_v36, %v366_v34  ;;  %v378_v40 = vadd.f32 %v377_v38, %v376_v35  ;;  %p1122_p3 = pnand %p1121_p2, %p1115_p13 }
  0x27   : > { %1004 = vmatpush3.bf16.msra.mxu0 %v1092_v16  ;;  %v369_v41 = vrot.slane %v368_v39, 1  ;;  %v379_v42 = vrot.slane %v378_v40, 1 }
  0x28   : > { %1005 = vmatprep.subr.bf16.mxu0 %v1176_v1  ;;  %964 = vmatpush3.bf16.msra.mxu1 %v1094_v20 }
  0x29   : > { %965 = vmatprep.subr.bf16.mxu1 %v1096_v21  ;;  %v370_v43 = vadd.f32 %v369_v41, %v368_v39  ;;  %v380_v44 = vadd.f32 %v379_v42, %v378_v40 }
  0x2b   : > { %1006 = vmatpush3.bf16.msra.mxu0 %v1095_v19  ;;  %v371_v45 = vmul.f32 0.25, %v370_v43  ;;  %v381_v46 = vmul.f32 0.0625, %v380_v44 }
  0x2c   : > { %1007 = vmatprep.subr.bf16.mxu0 %v1176_v1  ;;  %966 = vmatpush3.bf16.msra.mxu1 %v1097_v26 }
  0x2d   : > { %967 = vmatprep.subr.bf16.mxu1 %v1099_v27  ;;  %v482_v47 = vpack.c.bf16 %v371_v45, %v371_v45  ;;  %v483_v48 = vpack.c.bf16 %v381_v46, %v381_v46 }
  0x2f   : > { %1008 = vmatpush3.bf16.msra.mxu0 %v1098_v22  ;;  %662 = vmatprep.mubr.bf16.mxu1 %v483_v48 }
  0x30   : > { %1009 = vmatprep.subr.bf16.mxu0 %v1176_v1  ;;  %968 = vmatpush3.bf16.msra.mxu1 %v1100_v32 }
  0x31   : > { %1019 = vmatprep.subr.bf16.mxu1 %v1176_v1 }
  0x33   : > { %1010 = vmatpush3.bf16.msra.mxu0 %v1101_v30  ;;  %663 = vmatmul.mubr.bf16.vlgmr.msra.gmra.mrb[0].mxu1 %v482_v47 }
  0x34   : > { %1011 = vmatprep.subr.bf16.mxu0 %v1176_v1  ;;  %1035 = vmatprep.mubr.msk.bf16.mxu1 %vm1177_vm1, %v1176_v1 }
  0x35   : > { %1020 = vmatpush3.bf16.msra.mxu1 %v1104_v50 }
  0x36   : > { %1021 = vmatprep.subr.bf16.mxu1 %v1176_v1 }
  0x37   : > { %1012 = vmatpush3.bf16.msra.mxu0 %v1102_v37 }
  0x38   : > { %1013 = vmatprep.subr.bf16.mxu0 %v1176_v1 }
  0x39   : > { %1022 = vmatpush3.bf16.msra.mxu1 %v1105_v51 }
  0x3a   : > { %1023 = vmatprep.subr.bf16.mxu1 %v1176_v1 }
  0x3b   : > { %1014 = vmatpush3.bf16.msra.mxu0 %v1103_v49 }
  0x3d   : > { %1024 = vmatpush3.bf16.msra.mxu1 %v1106_v52 }
  0x3e   : > { %1025 = vmatprep.subr.bf16.mxu1 %v1176_v1 }
  0x41   : > { %1026 = vmatpush3.bf16.msra.mxu1 %v1107_v53 }
  0x42   : > { %1027 = vmatprep.subr.bf16.mxu1 %v1176_v1 }
  0x45   : > { %1028 = vmatpush3.bf16.msra.mxu1 %v1108_v54 }
  0x46   : > { %1029 = vmatprep.subr.bf16.mxu1 %v1176_v1 }
  0x49   : > { %1030 = vmatpush3.bf16.msra.mxu1 %v1109_v55 }
  0x4a   : > { %1031 = vmatprep.subr.bf16.mxu1 %v1176_v1 }
  0x4d   : > { %1032 = vmatpush3.bf16.msra.mxu1 %v1110_v56 }
  0x4e   : > { %1033 = vmatprep.subr.bf16.mxu1 %v1176_v1  ;;  %v1111_v1 = vld [vmem:[%s1478_s7 + $0x38] sm:$0xff]  }
  0x51   : > { %1034 = vmatpush3.bf16.msra.mxu1 %v1111_v1 }
  0xf1   : > { %v428_v58 = vpop.f32.mrb[0].mxu0 }
  0xf2   : > { %v429_v59 = vadd.f32 %v428_v58, %v385_v57  ;;  %v997_v60 = vpop.f32.mrb[1].mxu0 }
  0xf3   : > { %v431_v61 = vpop.f32.mrb[2].mxu0 }
  0xf4   : > { %v484_v62 = vpack.c.bf16 %v429_v59, %v429_v59  ;;  %v998_v63 = vpop.f32.mrb[3].mxu0 }
  0xf6   : > { %1016 = vmatmul.mubr.bf16.vlgmr.msra.gmra.mrb[4].mxu0 %v484_v62 }
 0x106   : > { %v969_v0 = vpop.f32.mrb[0].mxu1 }
 0x107   : > { %v970_v2 = vpop.f32.mrb[1].mxu1 }
 0x108   : > { %v971_v3 = vadd.f32 %v970_v2, %v969_v0  ;;  %v972_v4 = vpop.f32.mrb[2].mxu1 }
 0x109   : > { %v973_v5 = vpop.f32.mrb[3].mxu1 }
 0x10a   : > { %v665_v7 = vadd.f32 %v971_v3, %v485_v6 }
 0x1c9   : > { %v704_v8 = vpop.f32.mrb[4].mxu0 }
 0x1ca   : > { %v705_v9 = vadd.f32 %v704_v8, %v665_v7  ;;  %v1017_v10 = vpop.f32.mrb[5].mxu0 }
 0x1cb   : > { %v707_v11 = vpop.f32.mrb[6].mxu0 }
 0x1cc   : > { %v726_v12 = vpack.c.bf16 %v705_v9, %v705_v9  ;;  %v1018_v13 = vpop.f32.mrb[7].mxu0 }
 0x1ce   : > { %1036 = vmatmul.mubr.bf16.vlgmr.msra.gmra.mrb[4].mxu1 %v726_v12 }
 0x2a1   : > { %v810_v15 = vpop.f32.mrb[4].mxu1 }
 0x2a2   : > { %v811_v16 = vadd.f32 %v810_v15, %v727_v14  ;;  %v1037_v17 = vpop.f32.mrb[5].mxu1 }
 0x2a3   : > { %v813_v18 = vpop.f32.mrb[6].mxu1 }
 0x2a4   : > { %v1038_v19 = vpop.f32.mrb[7].mxu1  ;;  %817 = vst.msk [vmem:[%s348_s14] sm:$0x1] %vm816_vm4, %v811_v16 }
 0x2a5   : > { %1125 = shalt.err (!%p1122_p3)
}
 0x2a6   : > { %s1126_s2 = scalar_lea.hbm %s1429_s23, 16  ;;  %s1130_s28 = scalar_lea.hbm %s1480_s9, 32 }
 0x2a7   : > { %p1127_p4 = scmp.ne.s32.totalorder %s1429_s23, %s1126_s2  ;;  %p1131_p9 = scmp.lt.u32.totalorder %s1429_s23, %s1480_s9 }
 0x2a8   : > { %p1132_p10 = scmp.lt.u32.totalorder %s1130_s28, %s1126_s2  ;;  %p1134_p12 = scmp.lt.u32.totalorder %s1126_s2, %s1429_s23 }
 0x2a9   : > { %p1128_p7 = pnand %p1127_p4, %p1267_p5 }
 0x2aa   : > { %p1133_p11 = por %p1132_p10, %p1131_p9 }
 0x2ab   : > { %p1129_p8 = pneg %p1128_p7 }
 0x2ac   : > { %p1135_p13 = por %p1134_p12, %p1133_p11 }
 0x2ae   : > { %p1136_p0 = pnand %p1135_p13, %p1129_p8 }
 0x2b0   : > { %1139 = shalt.err (!%p1136_p0)
}
 0x2b1   : > { %1039 = dma.vmem_to_hbm [thread:$0]  (%p1267_p5), %s1431_s16, 16, %s1429_s23, %s819_s13  }
 0x2b2 PF: > { %p1045_p1 = scmp.ge.s32.totalorder %s1174_s12, 2  ;;  %s843_s17 = sand.u32 1, %s1162_s30  }
 0x2b3   : > { %s844_s22 = scalar_lea.sflag [#allocation3], %s843_s17 }
 0x2b4   : > { %p1042_p2 = pnand %p1045_p1, %p1271_p6 }
 0x2b6   : > { %1157 = dma.done.wait (!%p1042_p2), %s844_s22, 16  }
 0x2b7   : > { %1159 = vsyncadd (!%p1042_p2), %s844_s22, 4294967280  ;;  %p19_p3 = scmp.ge.s32.totalorder %s1254_s15, 4   ;;  %s1487_s30 = smov %s1166_s10 }
 0x2b8   : > { %s1488_s10 = smov %s1170_s11  ;;  %s1489_s11 = smov %s1265_s18 }
 0x2b9   : > { %s1490_s12 = smov %s1254_s15  ;;  %21 = sbr.rel (!%p19_p3) target bundleno = 6 (0x6), region = 97 }
 0x2c0   :  { %848 = vsyncpa [#allocation3], 1 }
 0x2c1   :  { %850 = vsyncpa [#allocation3 + $0x1], 1 }

// kernel: collection_status_forward.11
= control target key start
LH: loop header
LB: loop body
LE: loop exit
PB: predicated region body
PF: predicated region fallthrough
CT: control target
= control target key end

     0   :  { %s3179_s18 = smov 0   ;;  %s3754_s0 = inlined_call_operand.vmem [shape: f32[2,4,128], index: 0, kind: input, shape index: {}]   ;;  %s3755_s1 = inlined_call_operand.vmem [shape: f32[2,1,4], index: 1, kind: input, shape index: {}]   ;;  %s3756_s2 = inlined_call_operand.vmem [shape: f32[8,128], index: 2, kind: input, shape index: {}]   ;;  %s3757_s3 = inlined_call_operand.vmem [shape: bf16[128,384], index: 3, kind: input, shape index: {}]   ;;  %s3758_s4 = inlined_call_operand.vmem [shape: f32[1,384], index: 4, kind: input, shape index: {}]   ;;  %s3759_s5 = inlined_call_operand.vmem [shape: bf16[128,128], index: 5, kind: input, shape index: {}]   ;;  %s3760_s6 = inlined_call_operand.vmem [shape: f32[1,128], index: 6, kind: input, shape index: {}]   ;;  %s3761_s7 = inlined_call_operand.vmem [shape: bf16[128,512], index: 7, kind: input, shape index: {}]   ;;  %s3762_s8 = inlined_call_operand.vmem [shape: f32[1,512], index: 8, kind: input, shape index: {}]   ;;  %s3763_s9 = inlined_call_operand.vmem [shape: bf16[512,128], index: 9, kind: input, shape index: {}]   ;;  %s3764_s10 = inlined_call_operand.vmem [shape: f32[1,128], index: 10, kind: input, shape index: {}]   ;;  %s3765_s11 = inlined_call_operand.vmem [shape: f32[1,128], index: 11, kind: input, shape index: {}]   ;;  %s3766_s12 = inlined_call_operand.vmem [shape: f32[1,128], index: 12, kind: input, shape index: {}]   ;;  %s3767_s13 = inlined_call_operand.vmem [shape: f32[1,128], index: 13, kind: input, shape index: {}]   ;;  %s3768_s14 = inlined_call_operand.vmem [shape: f32[1,128], index: 14, kind: input, shape index: {}]   ;;  %s3769_s15 = inlined_call_operand.vmem [shape: f32[2,4,128], index: 15, kind: output, shape index: {}]  }
   0x1 LB: > { %s2535_s19 = sadd.s32 4294967295, %s3094_s18   ;;  %p2539_p0 = scmp.ge.s32.totalorder %s3094_s18, 1  ;;  %s3094_s18 = sphi %s3179_s18, %s25_s18  }
   0x2   : > { %p444_p1 = scmp.lt.s32.totalorder %s3094_s18, 3 }
   0x4   : > { %p445_p2 = pnand %p2539_p0, %p444_p1 }
   0x5   : > { %v2932_v0 = vld [vmem:[%s3757_s3 + $0x4] ss:$12 sps:$4 sm:$0xff] (!%p445_p2)   ;;  %v2934_v1 = vld [vmem:[%s3757_s3] ss:$12 sps:$4 sm:$0xff] (!%p445_p2)   ;;  %v3096_v2 = vmov (!%p445_p2), 0   ;;  %v3097_v4 = vmov (!%p445_p2), 0.0   ;;  %v542_v28 = vlaneseq (!%p445_p2) }
   0x6   : > { %448 = sbr.rel (%p445_p2) target bundleno = 2384 (0x950), region = 80  ;;  %717 = vmatprep.mubr.bf16.mxu0 (!%p445_p2), %v3096_v2  ;;  %685 = vmatprep.subr.bf16.mxu0 (!%p445_p2), %v2932_v0  ;;  %v2935_v3 = vld [vmem:[%s3757_s3 + $0x1c] ss:$12 sps:$4 sm:$0xff] (!%p445_p2)   ;;  %v2937_v5 = vld [vmem:[%s3757_s3 + $0x18] ss:$12 sps:$4 sm:$0xff] (!%p445_p2)   ;;  %p493_p3 = scmp.lt.s32.totalorder (!%p445_p2), %s2535_s19, 1 }
   0x7   : > { %2757 = vmatprep.subr.bf16.mxu1 (!%p445_p2), %v3097_v4  ;;  %686 = vmatpush1.bf16.msra.mxu0 (!%p445_p2), %v2934_v1  ;;  %v2938_v6 = vld [vmem:[%s3757_s3 + $0x34] ss:$12 sps:$4 sm:$0xff] (!%p445_p2)   ;;  %v2940_v7 = vld [vmem:[%s3757_s3 + $0x30] ss:$12 sps:$4 sm:$0xff] (!%p445_p2)   ;;  %v2941_v8 = vld [vmem:[%s3757_s3 + $0x4c] ss:$12 sps:$4 sm:$0xff] (!%p445_p2)  }
   0x8   : > { %687 = vmatprep.subr.bf16.mxu0 (!%p445_p2), %v2935_v3  ;;  %v2943_v9 = vld [vmem:[%s3757_s3 + $0x48] ss:$12 sps:$4 sm:$0xff] (!%p445_p2)   ;;  %v2944_v10 = vld [vmem:[%s3757_s3 + $0x64] ss:$12 sps:$4 sm:$0xff] (!%p445_p2)   ;;  %v2957_v12 = vld [vmem:[%s3757_s3 + $0x20] ss:$12 sps:$4 sm:$0xff] (!%p445_p2)  }
   0x9   : > { %v2956_v11 = vld [vmem:[%s3757_s3 + $0x8] ss:$12 sps:$4 sm:$0xff] (!%p445_p2)   ;;  %v2946_v13 = vld [vmem:[%s3757_s3 + $0x60] ss:$12 sps:$4 sm:$0xff] (!%p445_p2)   ;;  %v2958_v15 = vld [vmem:[%s3757_s3 + $0x38] ss:$12 sps:$4 sm:$0xff] (!%p445_p2)  }
   0xa   : > { %2758 = vmatpush3.bf16.msra.mxu1 (!%p445_p2), %v2956_v11  ;;  %v2947_v14 = vld [vmem:[%s3757_s3 + $0x7c] ss:$12 sps:$4 sm:$0xff] (!%p445_p2)   ;;  %v2949_v16 = vld [vmem:[%s3757_s3 + $0x78] ss:$12 sps:$4 sm:$0xff] (!%p445_p2)   ;;  %v2950_v17 = vld [vmem:[%s3757_s3 + $0x94] ss:$12 sps:$4 sm:$0xff] (!%p445_p2)  }
   0xb   : > { %688 = vmatpush1.bf16.msra.mxu0 (!%p445_p2), %v2937_v5  ;;  %2759 = vmatprep.subr.bf16.mxu1 (!%p445_p2), %v3097_v4  ;;  %v2959_v18 = vld [vmem:[%s3757_s3 + $0x50] ss:$12 sps:$4 sm:$0xff] (!%p445_p2)   ;;  %v2953_v20 = vld [vmem:[%s3757_s3 + $0xac] ss:$12 sps:$4 sm:$0xff] (!%p445_p2)   ;;  %v2960_v21 = vld [vmem:[%s3757_s3 + $0x68] ss:$12 sps:$4 sm:$0xff] (!%p445_p2)  }
   0xc   : > { %689 = vmatprep.subr.bf16.mxu0 (!%p445_p2), %v2938_v6  ;;  %v2952_v19 = vld [vmem:[%s3757_s3 + $0x90] ss:$12 sps:$4 sm:$0xff] (!%p445_p2)   ;;  %v2955_v22 = vld [vmem:[%s3757_s3 + $0xa8] ss:$12 sps:$4 sm:$0xff] (!%p445_p2)   ;;  %v2961_v24 = vld [vmem:[%s3757_s3 + $0x80] ss:$12 sps:$4 sm:$0xff] (!%p445_p2)  }
   0xd   : > { %s3771_s19 = smov (!%p493_p3, %s2535_s19), 1  ;;  %v2962_v26 = vld [vmem:[%s3757_s3 + $0x98] ss:$12 sps:$4 sm:$0xff]   ;;  %v2963_v27 = vld [vmem:[%s3757_s3 + $0xb0] ss:$12 sps:$4 sm:$0xff]   ;;  %vm3098_vm0 = vmmov 0  }
   0xe   : > { %s2540_s20 = sshll.u32 %s3771_s19, 2  ;;  %2760 = vmatpush3.bf16.msra.mxu1 %v2957_v12  ;;  %2773 = vmatprep.mubr.msk.bf16.mxu1 %vm3098_vm0, %v3097_v4  ;;  %v3288_v29 = vshrl.u32 %v542_v28, 7  ;;  %v3294_v31 = vld [vmem:[%s3758_s4] sm:$0x7]  ;;  %v2573_v49 = vld [vmem:[%s3756_s2 + $0x3] ss:$0 sm:$0xff]  ;;  %s499_s30 = scalar_lea.vmem %s3755_s1, %s3771_s19 }
   0xf   : > { %690 = vmatpush1.bf16.msra.mxu0 %v2940_v7  ;;  %2761 = vmatprep.subr.bf16.mxu1 %v3097_v4  ;;  %s496_s23 = scalar_lea.vmem %s3754_s0, %s2540_s20  ;;  %v3306_v42 = vld [vmem:[%s3756_s2] ss:$0 sm:$0xff]  ;;  %v3311_v43 = vld [vmem:[%s3756_s2 + $0x2] ss:$0 sm:$0xff]  ;;  %v2568_v48 = vld [vmem:[%s3756_s2 + $0x1] ss:$0 sm:$0xff] }
  0x10   : > { %691 = vmatprep.subr.bf16.mxu0 %v2941_v8  ;;  %v3263_v23 = vld [vmem:[%s496_s23] sm:$0xf]  ;;  %v548_v30 = vsub.s32 1, %v3288_v29  ;;  %v544_v32 = vsub.s32 0, %v3288_v29  ;;  %v2575_v54 = vld [vmem:[%s3756_s2 + $0x4] ss:$0 sm:$0xff]  ;;  %s503_s23 = scalar_lea.vmem %s3769_s15, %s2540_s20 }
  0x11   : > { %v539_v25 = vpack.c.bf16 %v3263_v23, %v3263_v23  ;;  %v2577_v57 = vld [vmem:[%s3756_s2 + $0x5] ss:$0 sm:$0xff]  ;;  %v2579_v60 = vld [vmem:[%s3756_s2 + $0x6] ss:$0 sm:$0xff]  ;;  %v2581_v63 = vld [vmem:[%s3756_s2 + $0x7] ss:$0 sm:$0xff] }
  0x12   : > { %2762 = vmatpush3.bf16.msra.mxu1 %v2958_v15  ;;  %v549_v33 = vrot.slane %v3294_v31, %v548_v30  ;;  %v545_v34 = vrot.slane %v3294_v31, %v544_v32  ;;  %v552_v8 = vsub.s32 2, %v3288_v29  ;;  %vm904_vm1 = vcmask 1041408  }
  0x13   : > { %692 = vmatpush1.bf16.msra.mxu0 %v2943_v9  ;;  %2763 = vmatprep.subr.bf16.mxu1 %v3097_v4  ;;  %vm822_vm2 = vcmask 27648   ;;  %vm900_vm3 = vcmask 31744   ;;  %vm1769_vm4 = vcmask 1043456  }
  0x14   : > { %693 = vmatprep.subr.bf16.mxu0 %v2944_v10  ;;  %v553_v9 = vrot.slane %v3294_v31, %v552_v8 }
  0x16   : > { %2764 = vmatpush3.bf16.msra.mxu1 %v2959_v18 }
  0x17   : > { %694 = vmatpush1.bf16.msra.mxu0 %v2946_v13  ;;  %2765 = vmatprep.subr.bf16.mxu1 %v3097_v4 }
  0x18   : > { %695 = vmatprep.subr.bf16.mxu0 %v2947_v14 }
  0x1a   : > { %2766 = vmatpush3.bf16.msra.mxu1 %v2960_v21 }
  0x1b   : > { %696 = vmatpush1.bf16.msra.mxu0 %v2949_v16  ;;  %2767 = vmatprep.subr.bf16.mxu1 %v3097_v4 }
  0x1c   : > { %697 = vmatprep.subr.bf16.mxu0 %v2950_v17 }
  0x1e   : > { %2768 = vmatpush3.bf16.msra.mxu1 %v2961_v24 }
  0x1f   : > { %698 = vmatpush1.bf16.msra.mxu0 %v2952_v19  ;;  %2769 = vmatprep.subr.bf16.mxu1 %v3097_v4 }
  0x20   : > { %699 = vmatprep.subr.bf16.mxu0 %v2953_v20 }
  0x22   : > { %2770 = vmatpush3.bf16.msra.mxu1 %v2962_v26 }
  0x23   : > { %700 = vmatpush1.bf16.msra.mxu0 %v2955_v22  ;;  %2771 = vmatprep.subr.bf16.mxu1 %v3097_v4 }
  0x24   : > { %2777 = vmatprep.subr.bf16.mxu0 %v3097_v4 }
  0x26   : > { %718 = vmatmul.mubr.bf16.vlgmr.msra.gmra.mrb[0].mxu0 %v539_v25  ;;  %2772 = vmatpush3.bf16.msra.mxu1 %v2963_v27 }
  0x27   : > { %2801 = vmatprep.subr.bf16.mxu1 %v3097_v4  ;;  %2779 = vmatprep.mubr.msk.bf16.mxu0 %vm3098_vm0, %v3097_v4 }
  0x29   : > { %2774 = vmatmul.mubr.bf16.vlgmr.msra.gmra.mrb[0].mxu1 %v539_v25 }
  0x2a   : > { %2803 = vmatprep.mubr.msk.bf16.mxu1 %vm3098_vm0, %v3097_v4 }
  0xf9   : > { %v719_v35 = vpop.f32.mrb[0].mxu0 }
  0xfa   : > { %v721_v36 = vpop.f32.mrb[1].mxu0  ;;  %v720_v39 = vadd.f32 %v719_v35, %v545_v34 }
  0xfb   : > { %v722_v37 = vadd.f32 %v721_v36, %v549_v33  ;;  %v723_v38 = vpop.f32.mrb[2].mxu0 }
  0xfc   : > { %v724_v40 = vpop.f32.mrb[3].mxu0  ;;  %v771_v44 = vmul.f32 %v3306_v42, %v720_v39  ;;  %v999_v45 = vmul.f32 %v3311_v43, %v720_v39  ;;  %v842_v50 = vmul.f32 %v2568_v48, %v720_v39  ;;  %v1109_v51 = vmul.f32 %v2573_v49, %v720_v39  ;;  %v760_v3 = vpop.f32.mrb[0].mxu1 }
  0xfd   : > { %v773_v41 = vpack.c.bf16 %v722_v37, %v722_v37  ;;  %v1219_v55 = vmul.f32 %v2575_v54, %v720_v39  ;;  %v1329_v58 = vmul.f32 %v2577_v57, %v720_v39  ;;  %v1439_v61 = vmul.f32 %v2579_v60, %v720_v39  ;;  %v2775_v5 = vpop.f32.mrb[1].mxu1 }
  0xfe   : > { %v772_v46 = vpack.c.bf16 %v771_v44, %v771_v44  ;;  %v1000_v47 = vpack.c.bf16 %v999_v45, %v999_v45  ;;  %v843_v52 = vpack.c.bf16 %v842_v50, %v842_v50  ;;  %v1110_v53 = vpack.c.bf16 %v1109_v51, %v1109_v51  ;;  %v763_v6 = vpop.f32.mrb[2].mxu1 }
  0xff   : > { %2778 = vmatpush3.bf16.xpose.msra.mxu0 %v773_v41  ;;  %2802 = vmatpush3.bf16.xpose.msra.mxu1 %v773_v41  ;;  %v1220_v56 = vpack.c.bf16 %v1219_v55, %v1219_v55  ;;  %v1330_v59 = vpack.c.bf16 %v1329_v58, %v1329_v58  ;;  %v1440_v62 = vpack.c.bf16 %v1439_v61, %v1439_v61  ;;  %v2776_v7 = vpop.f32.mrb[3].mxu1 }
 0x100   : > { %2783 = vmatprep.subr.bf16.mxu0 %v3097_v4  ;;  %2813 = vmatprep.subr.bf16.mxu1 %v3097_v4  ;;  %v1549_v0 = vmul.f32 %v2581_v63, %v720_v39  ;;  %v761_v10 = vadd.f32 %v760_v3, %v553_v9  ;;  %v3390_v39 = vld [vmem:[%s499_s30] ss:$0 sm:$0xff] }
 0x102   : > { %v1550_v1 = vpack.c.bf16 %v1549_v0, %v1549_v0  ;;  %v897_v11 = vmul.f32 %v2568_v48, %v761_v10  ;;  %v834_v12 = vmul.f32 %v3306_v42, %v761_v10  ;;  %v1054_v13 = vmul.f32 %v3311_v43, %v761_v10 }
 0x103   : > { %v1164_v14 = vmul.f32 %v2573_v49, %v761_v10  ;;  %v1274_v15 = vmul.f32 %v2575_v54, %v761_v10  ;;  %v1384_v16 = vmul.f32 %v2577_v57, %v761_v10  ;;  %v1494_v17 = vmul.f32 %v2579_v60, %v761_v10 }
 0x104   : > { %v1604_v18 = vmul.f32 %v2581_v63, %v761_v10  ;;  %v899_v19 = vpack.c.bf16 %v897_v11, %v897_v11  ;;  %v836_v20 = vpack.c.bf16 %v834_v12, %v834_v12  ;;  %v1056_v21 = vpack.c.bf16 %v1054_v13, %v1054_v13 }
 0x105   : > { %v1166_v22 = vpack.c.bf16 %v1164_v14, %v1164_v14  ;;  %v1276_v24 = vpack.c.bf16 %v1274_v15, %v1274_v15  ;;  %v1386_v25 = vpack.c.bf16 %v1384_v16, %v1384_v16  ;;  %v1496_v26 = vpack.c.bf16 %v1494_v17, %v1494_v17 }
 0x106   : > { %2780 = vmatmul.mubr.bf16.vlgmr.msra.gmra.mrb[4].mxu0 %v772_v46  ;;  %2804 = vmatmul.mubr.bf16.vlgmr.msra.gmra.mrb[4].mxu1 %v1000_v47  ;;  %v906_v27 = vsel %vm904_vm1, %v899_v19, 0  ;;  %v3365_v28 = vsel %vm904_vm1, %v836_v20, 0  ;;  %v3368_v31 = vsel %vm904_vm1, %v1056_v21, 0  ;;  %v1606_v33 = vpack.c.bf16 %v1604_v18, %v1604_v18 }
 0x107   : > { %2784 = vmatpush3.bf16.xpose.msra.mxu0 %v773_v41  ;;  %2814 = vmatpush3.bf16.xpose.msra.mxu1 %v773_v41  ;;  %v3371_v34 = vsel %vm904_vm1, %v1166_v22, 0  ;;  %v3374_v35 = vsel %vm904_vm1, %v1276_v24, 0  ;;  %v3377_v36 = vsel %vm904_vm1, %v1386_v25, 0  ;;  %v3380_v37 = vsel %vm904_vm1, %v1496_v26, 0 }
 0x108   : > { %2785 = vmatprep.mubr.msk.bf16.mxu0 %vm3098_vm0, %v3097_v4  ;;  %2815 = vmatprep.mubr.msk.bf16.mxu1 %vm3098_vm0, %v3097_v4  ;;  %v3384_v38 = vsel %vm904_vm1, %v1606_v33, 0 }
 0x109   : > { %2825 = vmatprep.subr.bf16.mxu1 %v3097_v4  ;;  %2789 = vmatprep.subr.bf16.mxu0 %v3097_v4 }
 0x10e   : > { %2786 = vmatmul.mubr.bf16.vlgmr.msra.gmra.mrb[8].mxu0 %v843_v52  ;;  %2816 = vmatmul.mubr.bf16.vlgmr.msra.gmra.mrb[8].mxu1 %v1110_v53 }
 0x10f   : > { %2826 = vmatpush3.bf16.xpose.msra.mxu1 %v773_v41  ;;  %2827 = vmatprep.mubr.msk.bf16.mxu1 %vm3098_vm0, %v3097_v4 }
 0x110   : > { %2837 = vmatprep.subr.bf16.mxu1 %v3097_v4  ;;  %2791 = vmatprep.mubr.msk.bf16.mxu0 %vm3098_vm0, %v3097_v4 }
 0x111   : > { %2790 = vmatpush3.bf16.msra.mxu0 %v906_v27 }
 0x112   : > { %2795 = vmatprep.subr.bf16.mxu0 %v3097_v4 }
 0x116   : > { %2828 = vmatmul.mubr.bf16.vlgmr.msra.gmra.mrb[12].mxu1 %v1220_v56 }
 0x117   : > { %2838 = vmatpush3.bf16.xpose.msra.mxu1 %v773_v41  ;;  %2839 = vmatprep.mubr.msk.bf16.mxu1 %vm3098_vm0, %v3097_v4 }
 0x118   : > { %2849 = vmatprep.subr.bf16.mxu1 %v3097_v4 }
 0x11e   : > { %2840 = vmatmul.mubr.bf16.vlgmr.msra.gmra.mrb[16].mxu1 %v1330_v59 }
 0x11f   : > { %2850 = vmatpush3.bf16.xpose.msra.mxu1 %v773_v41  ;;  %2851 = vmatprep.mubr.msk.bf16.mxu1 %vm3098_vm0, %v3097_v4 }
 0x120   : > { %2861 = vmatprep.subr.bf16.mxu1 %v3097_v4 }
 0x126   : > { %2852 = vmatmul.mubr.bf16.vlgmr.msra.gmra.mrb[20].mxu1 %v1440_v62 }
 0x127   : > { %2862 = vmatpush3.bf16.xpose.msra.mxu1 %v773_v41  ;;  %2863 = vmatprep.mubr.msk.bf16.mxu1 %vm3098_vm0, %v3097_v4 }
 0x128   : > { %2873 = vmatprep.subr.bf16.mxu1 %v3097_v4 }
 0x12e   : > { %2864 = vmatmul.mubr.bf16.vlgmr.msra.gmra.mrb[24].mxu1 %v1550_v1 }
 0x12f   : > { %2889 = vmatprep.mubr.msk.bf16.mxu1 %vm3098_vm0, %v3097_v4 }
 0x1d9   : > { %v808_v40 = vpop.f32.mrb[4].mxu0  ;;  %v1035_v41 = vpop.f32.mrb[4].mxu1 }
 0x1da   : > { %v814_v42 = vmul.f32 0.25, %v808_v40  ;;  %v1041_v43 = vmul.f32 0.25, %v1035_v41  ;;  %v2781_v44 = vpop.f32.mrb[5].mxu0  ;;  %v2805_v45 = vpop.f32.mrb[5].mxu1 }
 0x1db   : > { %v811_v46 = vpop.f32.mrb[6].mxu0  ;;  %v1038_v47 = vpop.f32.mrb[6].mxu1 }
 0x1dc   : > { %v2782_v48 = vpop.f32.mrb[7].mxu0  ;;  %v2806_v49 = vpop.f32.mrb[7].mxu1  ;;  %v1042_v50 = vadd.f32 %v3390_v39, %v1041_v43  ;;  %v3394_v51 = vadd.f32 %v3390_v39, %v814_v42 }
 0x1de   : > { %v1043_v52 = vsel %vm822_vm2, %v1042_v50, -inf  ;;  %v823_v9 = vsel %vm822_vm2, %v3394_v51, -inf }
 0x1df   : > { %1044 = vmax.xlane.f32.xlu1 %v1043_v52 }
 0x1e1   : > { %v878_v53 = vpop.f32.mrb[8].mxu0  ;;  %v1145_v54 = vpop.f32.mrb[8].mxu1 }
 0x1e2   : > { %v884_v55 = vmul.f32 0.25, %v878_v53  ;;  %v1151_v56 = vmul.f32 0.25, %v1145_v54  ;;  %v2787_v57 = vpop.f32.mrb[9].mxu0  ;;  %v2817_v58 = vpop.f32.mrb[9].mxu1 }
 0x1e3   : > { %v881_v59 = vpop.f32.mrb[10].mxu0  ;;  %v1148_v60 = vpop.f32.mrb[10].mxu1 }
 0x1e4   : > { %v2788_v61 = vpop.f32.mrb[11].mxu0  ;;  %v2818_v62 = vpop.f32.mrb[11].mxu1  ;;  %v1152_v63 = vadd.f32 %v3390_v39, %v1151_v56  ;;  %v885_v0 = vadd.f32 %v3390_v39, %v884_v55 }
 0x1e6   : > { %v1153_v1 = vsel %vm822_vm2, %v1152_v63, -inf  ;;  %v886_v3 = vsel %vm822_vm2, %v885_v0, -inf }
 0x1e7   : > { %1154 = vmax.xlane.f32.xlu1 %v1153_v1  ;;  %887 = vmax.xlane.f32.xlu0 %v886_v3 }
 0x1e9   : > { %v1255_v5 = vpop.f32.mrb[12].mxu1 }
 0x1ea   : > { %v1261_v6 = vmul.f32 0.25, %v1255_v5  ;;  %v2829_v7 = vpop.f32.mrb[13].mxu1 }
 0x1eb   : > { %v1258_v10 = vpop.f32.mrb[14].mxu1  ;;  %824 = vmax.xlane.f32.xlu0 %v823_v9 }
 0x1ec   : > { %v2830_v11 = vpop.f32.mrb[15].mxu1  ;;  %v1262_v12 = vadd.f32 %v3390_v39, %v1261_v6 }
 0x1ee   : > { %v1263_v13 = vsel %vm822_vm2, %v1262_v12, -inf }
 0x1ef   : > { %1264 = vmax.xlane.f32.xlu0 %v1263_v13 }
 0x1f1   : > { %v1365_v14 = vpop.f32.mrb[16].mxu1 }
 0x1f2   : > { %v1371_v15 = vmul.f32 0.25, %v1365_v14  ;;  %v2841_v16 = vpop.f32.mrb[17].mxu1 }
 0x1f3   : > { %v1368_v17 = vpop.f32.mrb[18].mxu1 }
 0x1f4   : > { %v2842_v18 = vpop.f32.mrb[19].mxu1  ;;  %v1372_v19 = vadd.f32 %v3390_v39, %v1371_v15 }
 0x1f6   : > { %v1373_v20 = vsel %vm822_vm2, %v1372_v19, -inf }
 0x1f7   : > { %1374 = vmax.xlane.f32.xlu1 %v1373_v20 }
 0x1f9   : > { %v1475_v21 = vpop.f32.mrb[20].mxu1 }
 0x1fa   : > { %v1481_v22 = vmul.f32 0.25, %v1475_v21  ;;  %v2853_v24 = vpop.f32.mrb[21].mxu1 }
 0x1fb   : > { %v1478_v25 = vpop.f32.mrb[22].mxu1 }
 0x1fc   : > { %v2854_v26 = vpop.f32.mrb[23].mxu1  ;;  %v1482_v27 = vadd.f32 %v3390_v39, %v1481_v22 }
 0x1fd   : > { %v2964_v26 = vld [vmem:[%s3759_s5] sm:$0xff]  }
 0x1fe   : > { %v1483_v33 = vsel %vm822_vm2, %v1482_v27, -inf  ;;  %2874 = vmatpush3.bf16.msra.mxu1 %v2964_v26  ;;  %v2981_v26 = vld [vmem:[%s3761_s7 + $0x28] ss:$16 sps:$4 sm:$0xff]  }
 0x1ff   : > { %1484 = vmax.xlane.f32.xlu0 %v1483_v33  ;;  %2875 = vmatprep.subr.bf16.mxu1 %v3097_v4  ;;  %v2966_v33 = vld [vmem:[%s3759_s5 + $0x10] sm:$0xff]  }
 0x201   : > { %v1585_v40 = vpop.f32.mrb[24].mxu1 }
 0x202   : > { %v1591_v41 = vmul.f32 0.25, %v1585_v40  ;;  %v2865_v42 = vpop.f32.mrb[25].mxu1  ;;  %v2967_v40 = vld [vmem:[%s3759_s5 + $0x18] sm:$0xff]  }
 0x203   : > { %v1588_v43 = vpop.f32.mrb[26].mxu1  ;;  %v2969_v42 = vld [vmem:[%s3759_s5 + $0x28] sm:$0xff]  }
 0x204   : > { %v2866_v44 = vpop.f32.mrb[27].mxu1  ;;  %v1592_v45 = vadd.f32 %v3390_v39, %v1591_v41  ;;  %v2968_v41 = vld [vmem:[%s3759_s5 + $0x20] sm:$0xff]   ;;  %v2970_v43 = vld [vmem:[%s3759_s5 + $0x30] sm:$0xff]  }
 0x206   : > { %v1593_v46 = vsel %vm822_vm2, %v1592_v45, -inf }
 0x207   : > { %1594 = vmax.xlane.f32.xlu1 %v1593_v46 }
 0x26c   : > { %v1045_v47 = vpop.xlane.xlu1 %1044 }
 0x26d   : > { %v1046_v48 = vsub.f32 %v1042_v50, %v1045_v47 }
 0x26f   : > { %v1047_v56 = vmul.f32 1.442695, %v1046_v48 }
 0x274   : > { %v1155_v49 = vpop.xlane.xlu1 %1154  ;;  %v888_v52 = vpop.xlane.xlu0 %887 }
 0x275   : > { %v889_v53 = vsub.f32 %v885_v0, %v888_v52  ;;  %v1156_v54 = vsub.f32 %v1152_v63, %v1155_v49 }
 0x277   : > { %v890_v55 = vmul.f32 1.442695, %v889_v53  ;;  %v1157_v59 = vmul.f32 1.442695, %v1156_v54 }
 0x278   : > { %v825_v57 = vpop.xlane.xlu0 %824 }
 0x279   : > { %v826_v58 = vsub.f32 %v3394_v51, %v825_v57  ;;  %3052 = vpow2.f32 %v890_v55 }
 0x27a   : > { %3054 = vpow2.f32 %v1047_v56 }
 0x27b   : > { %v827_v60 = vmul.f32 1.442695, %v826_v58 }
 0x27c   : > { %v1265_v61 = vpop.xlane.xlu0 %1264 }
 0x27d   : > { %3056 = vpow2.f32 %v827_v60  ;;  %v1266_v39 = vsub.f32 %v1262_v12, %v1265_v61 }
 0x27e   : > { %3058 = vpow2.f32 %v1157_v59 }
 0x27f   : > { %v1267_v62 = vmul.f32 1.442695, %v1266_v39 }
 0x281   : > { %3060 = vpow2.f32 %v1267_v62 }
 0x283   : > { %v3053_v50 = vpop.eup %3052 }
 0x284   : > { %v1375_v1 = vpop.xlane.xlu1 %1374  ;;  %v892_v63 = vsel %vm822_vm2, %v3053_v50, 0.0  ;;  %v3413_v0 = vpop.eup %3054 }
 0x285   : > { %v1376_v3 = vsub.f32 %v1372_v19, %v1375_v1  ;;  %893 = vadd.xlane.f32.xlu0 %v892_v63  ;;  %v1049_v9 = vsel %vm822_vm2, %v3413_v0, 0.0 }
 0x287   : > { %v3415_v5 = vpop.eup %3056  ;;  %v1377_v51 = vmul.f32 1.442695, %v1376_v3 }
 0x288   : > { %v829_v6 = vsel %vm822_vm2, %v3415_v5, 0.0  ;;  %v3419_v7 = vpop.eup %3058 }
 0x289   : > { %3062 = vpow2.f32 %v1377_v51  ;;  %830 = vadd.xlane.f32.xlu1 %v829_v6  ;;  %1050 = vadd.xlane.f32.xlu0 %v1049_v9  ;;  %v1159_v12 = vsel %vm822_vm2, %v3419_v7, 0.0 }
 0x28b   : > { %v3423_v10 = vpop.eup %3060 }
 0x28c   : > { %v1485_v11 = vpop.xlane.xlu0 %1484  ;;  %v1269_v13 = vsel %vm822_vm2, %v3423_v10, 0.0 }
 0x28d   : > { %v1486_v14 = vsub.f32 %v1482_v27, %v1485_v11  ;;  %1160 = vadd.xlane.f32.xlu1 %v1159_v12  ;;  %1270 = vadd.xlane.f32.xlu0 %v1269_v13  ;;  %v2965_v27 = vld [vmem:[%s3759_s5 + $0x8] sm:$0xff]  }
 0x28e   : > { %2876 = vmatpush3.bf16.msra.mxu1 %v2965_v27  ;;  %v2986_v27 = vld [vmem:[%s3761_s7 + $0x44] ss:$16 sps:$4 sm:$0xff]  }
 0x28f   : > { %v1487_v15 = vmul.f32 1.442695, %v1486_v14  ;;  %2877 = vmatprep.subr.bf16.mxu1 %v3097_v4 }
 0x291   : > { %3064 = vpow2.f32 %v1487_v15 }
 0x292   : > { %2878 = vmatpush3.bf16.msra.mxu1 %v2966_v33  ;;  %v2989_v33 = vld [vmem:[%s3761_s7 + $0x4c] ss:$16 sps:$4 sm:$0xff]  }
 0x293   : > { %v3429_v16 = vpop.eup %3062  ;;  %2879 = vmatprep.subr.bf16.mxu1 %v3097_v4 }
 0x294   : > { %v1595_v17 = vpop.xlane.xlu1 %1594  ;;  %v1379_v18 = vsel %vm822_vm2, %v3429_v16, 0.0 }
 0x295   : > { %v1596_v19 = vsub.f32 %v1592_v45, %v1595_v17  ;;  %1380 = vadd.xlane.f32.xlu1 %v1379_v18 }
 0x296   : > { %2880 = vmatpush3.bf16.msra.mxu1 %v2967_v40  ;;  %v2984_v40 = vld [vmem:[%s3761_s7 + $0x40] ss:$16 sps:$4 sm:$0xff]  }
 0x297   : > { %v1597_v20 = vmul.f32 1.442695, %v1596_v19  ;;  %2881 = vmatprep.subr.bf16.mxu1 %v3097_v4 }
 0x299   : > { %3066 = vpow2.f32 %v1597_v20  ;;  %v2972_v20 = vld [vmem:[%s3761_s7] ss:$16 sps:$4 sm:$0xff]  }
 0x29a   : > { %2882 = vmatpush3.bf16.msra.mxu1 %v2968_v41  ;;  %v2987_v41 = vld [vmem:[%s3761_s7 + $0x48] ss:$16 sps:$4 sm:$0xff]  }
 0x29b   : > { %v3433_v21 = vpop.eup %3064  ;;  %2883 = vmatprep.subr.bf16.mxu1 %v3097_v4 }
 0x29c   : > { %v1489_v22 = vsel %vm822_vm2, %v3433_v21, 0.0 }
 0x29d   : > { %1490 = vadd.xlane.f32.xlu0 %v1489_v22  ;;  %v2977_v22 = vld [vmem:[%s3761_s7 + $0xc] ss:$16 sps:$4 sm:$0xff]  }
 0x29e   : > { %2884 = vmatpush3.bf16.msra.mxu1 %v2969_v42 }
 0x29f   : > { %2885 = vmatprep.subr.bf16.mxu1 %v3097_v4 }
 0x2a2   : > { %2886 = vmatpush3.bf16.msra.mxu1 %v2970_v43 }
 0x2a3   : > { %v3437_v24 = vpop.eup %3066  ;;  %2887 = vmatprep.subr.bf16.mxu1 %v3097_v4 }
 0x2a4   : > { %v1599_v25 = vsel %vm822_vm2, %v3437_v24, 0.0 }
 0x2a5   : > { %1600 = vadd.xlane.f32.xlu1 %v1599_v25  ;;  %v2978_v25 = vld [vmem:[%s3761_s7 + $0x20] ss:$16 sps:$4 sm:$0xff]  }
 0x312   : > { %v894_v44 = vpop.xlane.xlu0 %893 }
 0x313   : > { %3068 = vrcp.f32 %v894_v44 }
 0x316   : > { %v831_v45 = vpop.xlane.xlu1 %830  ;;  %v1051_v49 = vpop.xlane.xlu0 %1050 }
 0x317   : > { %3070 = vrcp.f32 %v831_v45 }
 0x318   : > { %3072 = vrcp.f32 %v1051_v49  ;;  %v2990_v49 = vld [vmem:[%s3761_s7 + $0x60] ss:$16 sps:$4 sm:$0xff]  }
 0x31a   : > { %v1161_v55 = vpop.xlane.xlu1 %1160  ;;  %v1271_v58 = vpop.xlane.xlu0 %1270 }
 0x31b   : > { %3074 = vrcp.f32 %v1161_v55  ;;  %v2996_v55 = vld [vmem:[%s3761_s7 + $0x80] ss:$16 sps:$4 sm:$0xff]  }
 0x31c   : > { %3076 = vrcp.f32 %v1271_v58  ;;  %v3002_v58 = vld [vmem:[%s3761_s7 + $0xa0] ss:$16 sps:$4 sm:$0xff]  }
 0x31d   : > { %v3069_v46 = vpop.eup %3068 }
 0x31e   : > { %v896_v47 = vmul.f32 %v3069_v46, %v3053_v50 }
 0x320   : > { %v898_v48 = vpack.c.bf16 %v896_v47, %v896_v47  ;;  %v2992_v47 = vld [vmem:[%s3761_s7 + $0x64] ss:$16 sps:$4 sm:$0xff]  }
 0x321   : > { %v3071_v52 = vpop.eup %3070 }
 0x322   : > { %2792 = vmatmul.mubr.msk.bf16.vlgmr.msra.gmra.mrb[12].mxu0 %vm900_vm3, %v898_v48  ;;  %v833_v53 = vmul.f32 %v3071_v52, %v3415_v5  ;;  %v1381_v61 = vpop.xlane.xlu1 %1380  ;;  %v2995_v48 = vld [vmem:[%s3761_s7 + $0x6c] ss:$16 sps:$4 sm:$0xff]   ;;  %v2993_v52 = vld [vmem:[%s3761_s7 + $0x68] ss:$16 sps:$4 sm:$0xff]  }
 0x323   : > { %2796 = vmatpush3.bf16.msra.mxu0 %v3365_v28  ;;  %2797 = vmatprep.mubr.msk.bf16.mxu0 %vm3098_vm0, %v3097_v4  ;;  %v3073_v28 = vpop.eup %3072  ;;  %3078 = vrcp.f32 %v1381_v61  ;;  %v3011_v61 = vld [vmem:[%s3761_s7 + $0xc8] ss:$16 sps:$4 sm:$0xff]  }
 0x324   : > { %2807 = vmatprep.subr.bf16.mxu0 %v3097_v4  ;;  %v835_v54 = vpack.c.bf16 %v833_v53, %v833_v53  ;;  %v1053_v56 = vmul.f32 %v3073_v28, %v3413_v0  ;;  %v2998_v53 = vld [vmem:[%s3761_s7 + $0x84] ss:$16 sps:$4 sm:$0xff]   ;;  %v2999_v28 = vld [vmem:[%s3761_s7 + $0x88] ss:$16 sps:$4 sm:$0xff]  }
 0x326   : > { %v1055_v57 = vpack.c.bf16 %v1053_v56, %v1053_v56  ;;  %v3004_v56 = vld [vmem:[%s3761_s7 + $0xa4] ss:$16 sps:$4 sm:$0xff]  }
 0x32a   : > { %v1491_v50 = vpop.xlane.xlu0 %1490 }
 0x32b   : > { %3080 = vrcp.f32 %v1491_v50  ;;  %v3014_v50 = vld [vmem:[%s3761_s7 + $0xe0] ss:$16 sps:$4 sm:$0xff]  }
 0x32e   : > { %2798 = vmatmul.mubr.msk.bf16.vlgmr.msra.gmra.mrb[12].mxu0 %vm900_vm3, %v835_v54  ;;  %v3001_v54 = vld [vmem:[%s3761_s7 + $0x8c] ss:$16 sps:$4 sm:$0xff]  }
 0x32f   : > { %2808 = vmatpush3.bf16.msra.mxu0 %v3368_v31  ;;  %2809 = vmatprep.mubr.msk.bf16.mxu0 %vm3098_vm0, %v3097_v4  ;;  %v3075_v31 = vpop.eup %3074 }
 0x330   : > { %2819 = vmatprep.subr.bf16.mxu0 %v3097_v4  ;;  %v1163_v59 = vmul.f32 %v3075_v31, %v3419_v7  ;;  %v2971_v7 = vld [vmem:[%s3759_s5 + $0x38] sm:$0xff]  }
 0x331   : > { %2888 = vmatpush3.bf16.msra.mxu1 %v2971_v7  ;;  %v3005_v31 = vld [vmem:[%s3761_s7 + $0xa8] ss:$16 sps:$4 sm:$0xff]  }
 0x332   : > { %v1165_v60 = vpack.c.bf16 %v1163_v59, %v1163_v59  ;;  %v1601_v63 = vpop.xlane.xlu1 %1600  ;;  %2054 = vmatprep.subr.bf16.mxu1 %v2977_v22  ;;  %v3008_v59 = vld [vmem:[%s3761_s7 + $0xc0] ss:$16 sps:$4 sm:$0xff]  }
 0x333   : > { %3082 = vrcp.f32 %v1601_v63  ;;  %v3036_v22 = vld [vmem:[%s3763_s9 + $0x60] sm:$0xff]  }
 0x33a   : > { %2810 = vmatmul.mubr.msk.bf16.vlgmr.msra.gmra.mrb[12].mxu0 %vm900_vm3, %v1055_v57  ;;  %v3007_v57 = vld [vmem:[%s3761_s7 + $0xac] ss:$16 sps:$4 sm:$0xff]  }
 0x33b   : > { %2820 = vmatpush3.bf16.msra.mxu0 %v3371_v34  ;;  %2821 = vmatprep.mubr.msk.bf16.mxu0 %vm3098_vm0, %v3097_v4  ;;  %v3077_v34 = vpop.eup %3076 }
 0x33c   : > { %2831 = vmatprep.subr.bf16.mxu0 %v3097_v4  ;;  %v1273_v39 = vmul.f32 %v3077_v34, %v3423_v10  ;;  %v3013_v34 = vld [vmem:[%s3761_s7 + $0xcc] ss:$16 sps:$4 sm:$0xff]  }
 0x33e   : > { %v1275_v62 = vpack.c.bf16 %v1273_v39, %v1273_v39  ;;  %v3016_v39 = vld [vmem:[%s3761_s7 + $0xe4] ss:$16 sps:$4 sm:$0xff]  }
 0x346   : > { %2822 = vmatmul.mubr.msk.bf16.vlgmr.msra.gmra.mrb[12].mxu0 %vm900_vm3, %v1165_v60  ;;  %v3010_v60 = vld [vmem:[%s3761_s7 + $0xc4] ss:$16 sps:$4 sm:$0xff]  }
 0x347   : > { %2832 = vmatpush3.bf16.msra.mxu0 %v3374_v35  ;;  %2833 = vmatprep.mubr.msk.bf16.mxu0 %vm3098_vm0, %v3097_v4  ;;  %v3079_v35 = vpop.eup %3078 }
 0x348   : > { %2843 = vmatprep.subr.bf16.mxu0 %v3097_v4  ;;  %v1383_v1 = vmul.f32 %v3079_v35, %v3429_v16  ;;  %v3017_v35 = vld [vmem:[%s3761_s7 + $0xe8] ss:$16 sps:$4 sm:$0xff]  }
 0x34a   : > { %v1385_v3 = vpack.c.bf16 %v1383_v1, %v1383_v1  ;;  %v3020_v1 = vld [vmem:[%s3763_s9 + $0x40] sm:$0xff]  }
 0x352   : > { %2834 = vmatmul.mubr.msk.bf16.vlgmr.msra.gmra.mrb[12].mxu0 %vm900_vm3, %v1275_v62  ;;  %v3019_v62 = vld [vmem:[%s3761_s7 + $0xec] ss:$16 sps:$4 sm:$0xff]  }
 0x353   : > { %2844 = vmatpush3.bf16.msra.mxu0 %v3377_v36  ;;  %2845 = vmatprep.mubr.msk.bf16.mxu0 %vm3098_vm0, %v3097_v4  ;;  %v3081_v36 = vpop.eup %3080 }
 0x354   : > { %2855 = vmatprep.subr.bf16.mxu0 %v3097_v4  ;;  %v1493_v0 = vmul.f32 %v3081_v36, %v3433_v21  ;;  %v3083_v51 = vpop.eup %3082  ;;  %v2975_v21 = vld [vmem:[%s3761_s7 + $0x8] ss:$16 sps:$4 sm:$0xff]  }
 0x356   : > { %v1495_v5 = vpack.c.bf16 %v1493_v0, %v1493_v0 }
 0x35e   : > { %2846 = vmatmul.mubr.msk.bf16.vlgmr.msra.gmra.mrb[12].mxu0 %vm900_vm3, %v1385_v3  ;;  %v3021_v3 = vld [vmem:[%s3763_s9 + $0xc0] sm:$0xff]  }
 0x35f   : > { %2856 = vmatpush3.bf16.msra.mxu0 %v3380_v37  ;;  %2857 = vmatprep.mubr.msk.bf16.mxu0 %vm3098_vm0, %v3097_v4  ;;  %v1603_v37 = vmul.f32 %v3083_v51, %v3437_v24  ;;  %v2983_v24 = vld [vmem:[%s3761_s7 + $0x2c] ss:$16 sps:$4 sm:$0xff]   ;;  %v2592_v51 = vld [vmem:[%s3765_s11] ss:$0 sm:$0xff] }
 0x360   : > { %2867 = vmatprep.subr.bf16.mxu0 %v3097_v4 }
 0x361   : > { %v1605_v6 = vpack.c.bf16 %v1603_v37, %v1603_v37 }
 0x36a   : > { %2858 = vmatmul.mubr.msk.bf16.vlgmr.msra.gmra.mrb[12].mxu0 %vm900_vm3, %v1495_v5 }
 0x36b   : > { %2868 = vmatpush3.bf16.msra.mxu0 %v3384_v38  ;;  %2869 = vmatprep.mubr.msk.bf16.mxu0 %vm3098_vm0, %v3097_v4  ;;  %v2583_v4 = vld [vmem:[%s3760_s6] ss:$0 sm:$0xff] }
 0x376   : > { %2870 = vmatmul.mubr.msk.bf16.vlgmr.msra.gmra.mrb[12].mxu0 %vm900_vm3, %v1605_v6  ;;  %v2593_v6 = vld [vmem:[%s3766_s12] ss:$0 sm:$0xff] }
 0x377   : > { %2045 = vmatprep.mubr.bf16.mxu0 %v3096_v2 }
 0x449   : > { %v1647_v9 = vpop.f32.mrb[12].mxu0 }
 0x44a   : > { %v1670_v10 = vpack.c.bf16 %v1647_v9, %v1647_v9  ;;  %v2871_v11 = vpop.f32.mrb[13].mxu0 }
 0x44b   : > { %v1650_v38 = vpop.f32.mrb[14].mxu0  ;;  %v3023_v11 = vld [vmem:[%s3763_s9 + $0x80] sm:$0xff]  }
 0x44c   : > { %v2872_v12 = vpop.f32.mrb[15].mxu0  ;;  %2890 = vmatmul.mubr.bf16.vlgmr.msra.gmra.mrb[28].mxu1 %v1670_v10  ;;  %v3022_v10 = vld [vmem:[%s3763_s9] sm:$0xff]  }
 0x44d   : > { %2086 = vmatprep.mubr.bf16.mxu1 %v3096_v2  ;;  %v2974_v2 = vld [vmem:[%s3761_s7 + $0x4] ss:$16 sps:$4 sm:$0xff]   ;;  %2055 = vmatpush1.bf16.msra.mxu1 %v2975_v21  ;;  %v3024_v12 = vld [vmem:[%s3763_s9 + $0x48] sm:$0xff]   ;;  %v3035_v21 = vld [vmem:[%s3763_s9 + $0x98] sm:$0xff]  }
 0x44e   : > { %2013 = vmatprep.subr.bf16.mxu0 %v2974_v2  ;;  %2056 = vmatprep.subr.bf16.mxu1 %v2983_v24  ;;  %v3034_v2 = vld [vmem:[%s3763_s9 + $0x18] sm:$0xff]   ;;  %v3038_v24 = vld [vmem:[%s3763_s9 + $0x20] sm:$0xff]  }
 0x44f   : > { %2014 = vmatpush1.bf16.msra.mxu0 %v2972_v20  ;;  %v3033_v20 = vld [vmem:[%s3763_s9 + $0xd8] sm:$0xff]  }
 0x451   : > { %2057 = vmatpush1.bf16.msra.mxu1 %v2981_v26  ;;  %v3040_v26 = vld [vmem:[%s3763_s9 + $0x68] sm:$0xff]  }
 0x452   : > { %2058 = vmatprep.subr.bf16.mxu1 %v2989_v33  ;;  %v3042_v33 = vld [vmem:[%s3763_s9 + $0x28] sm:$0xff]  }
 0x455   : > { %2059 = vmatpush1.bf16.msra.mxu1 %v2987_v41  ;;  %v3044_v41 = vld [vmem:[%s3763_s9 + $0x70] sm:$0xff]  }
 0x456   : > { %2060 = vmatprep.subr.bf16.mxu1 %v2995_v48  ;;  %v3051_v48 = vld [vmem:[%s3763_s9 + $0xb8] sm:$0xff]  }
 0x459   : > { %2061 = vmatpush1.bf16.msra.mxu1 %v2993_v52  ;;  %v1847_v52 = vsub.s32 3, %v3288_v29 }
 0x45a   : > { %2062 = vmatprep.subr.bf16.mxu1 %v3001_v54 }
 0x45d   : > { %2063 = vmatpush1.bf16.msra.mxu1 %v2999_v28 }
 0x45e   : > { %2064 = vmatprep.subr.bf16.mxu1 %v3007_v57 }
 0x461   : > { %2065 = vmatpush1.bf16.msra.mxu1 %v3005_v31 }
 0x462   : > { %2066 = vmatprep.subr.bf16.mxu1 %v3013_v34 }
 0x465   : > { %2067 = vmatpush1.bf16.msra.mxu1 %v3011_v61 }
 0x466   : > { %2068 = vmatprep.subr.bf16.mxu1 %v3019_v62 }
 0x469   : > { %2069 = vmatpush1.bf16.msra.mxu1 %v3017_v35 }
 0x46a   : > { %2735 = vmatprep.subr.bf16.mxu1 %v3021_v3 }
 0x51f   : > { %v1760_v13 = vpop.f32.mrb[28].mxu1 }
 0x520   : > { %v1761_v14 = vadd.f32 %v2583_v4, %v1760_v13  ;;  %v2891_v15 = vpop.f32.mrb[29].mxu1  ;;  %v3025_v4 = vld [vmem:[%s3763_s9 + $0xc8] sm:$0xff]  }
 0x521   : > { %v1763_v16 = vpop.f32.mrb[30].mxu1  ;;  %v3026_v13 = vld [vmem:[%s3763_s9 + $0x8] sm:$0xff]   ;;  %v3028_v15 = vld [vmem:[%s3763_s9 + $0x50] sm:$0xff]  }
 0x522   : > { %v2892_v17 = vpop.f32.mrb[31].mxu1  ;;  %v1766_v18 = vadd.f32 %v1761_v14, %v3263_v23  ;;  %v2980_v23 = vld [vmem:[%s3761_s7 + $0x24] ss:$16 sps:$4 sm:$0xff]   ;;  %v3027_v14 = vld [vmem:[%s3763_s9 + $0x88] sm:$0xff]  }
 0x523   : > { %2015 = vmatprep.subr.bf16.mxu0 %v2980_v23  ;;  %v3029_v16 = vld [vmem:[%s3763_s9 + $0xd0] sm:$0xff]   ;;  %v3037_v23 = vld [vmem:[%s3763_s9 + $0xe0] sm:$0xff]  }
 0x524   : > { %v1770_v19 = vsel %vm1769_vm4, %v1766_v18, 0.0  ;;  %2016 = vmatpush1.bf16.msra.mxu0 %v2978_v25  ;;  %v3030_v17 = vld [vmem:[%s3763_s9 + $0x10] sm:$0xff]   ;;  %v3039_v25 = vld [vmem:[%s3763_s9 + $0xa0] sm:$0xff]  }
 0x525   : > { %1771 = vadd.xlane.f32.xlu0 %v1770_v19  ;;  %2017 = vmatprep.subr.bf16.mxu0 %v2986_v27  ;;  %v3032_v19 = vld [vmem:[%s3763_s9 + $0x58] sm:$0xff]   ;;  %v3041_v27 = vld [vmem:[%s3763_s9 + $0xe8] sm:$0xff]  }
 0x528   : > { %2018 = vmatpush1.bf16.msra.mxu0 %v2984_v40  ;;  %v3043_v40 = vld [vmem:[%s3763_s9 + $0xa8] sm:$0xff]  }
 0x529   : > { %2019 = vmatprep.subr.bf16.mxu0 %v2992_v47  ;;  %v3050_v47 = vld [vmem:[%s3763_s9 + $0x38] sm:$0xff]  }
 0x52c   : > { %2020 = vmatpush1.bf16.msra.mxu0 %v2990_v49  ;;  %v1831_v49 = vld [vmem:[%s3762_s8] sm:$0xf] }
 0x52d   : > { %2021 = vmatprep.subr.bf16.mxu0 %v2998_v53  ;;  %v1836_v53 = vrot.slane %v1831_v49, %v544_v32  ;;  %v1844_v54 = vrot.slane %v1831_v49, %v552_v8  ;;  %v1848_v28 = vrot.slane %v1831_v49, %v1847_v52 }
 0x530   : > { %2022 = vmatpush1.bf16.msra.mxu0 %v2996_v55  ;;  %v1840_v55 = vrot.slane %v1831_v49, %v548_v30 }
 0x531   : > { %2023 = vmatprep.subr.bf16.mxu0 %v3004_v56 }
 0x534   : > { %2024 = vmatpush1.bf16.msra.mxu0 %v3002_v58 }
 0x535   : > { %2025 = vmatprep.subr.bf16.mxu0 %v3010_v60 }
 0x538   : > { %2026 = vmatpush1.bf16.msra.mxu0 %v3008_v59 }
 0x539   : > { %2027 = vmatprep.subr.bf16.mxu0 %v3016_v39 }
 0x53c   : > { %2028 = vmatpush1.bf16.msra.mxu0 %v3014_v50 }
 0x53d   : > { %2713 = vmatprep.subr.bf16.mxu0 %v3020_v1 }
 0x5b2   : > { %v1772_v42 = vpop.xlane.xlu0 %1771 }
 0x5b3   : > { %v1774_v43 = vmul.f32 0.0078125, %v1772_v42  ;;  %v3045_v42 = vld [vmem:[%s3763_s9 + $0xf0] sm:$0xff]  }
 0x5b5   : > { %v1775_v44 = vsub.f32 %v1766_v18, %v1774_v43  ;;  %v3031_v18 = vld [vmem:[%s3763_s9 + $0x90] sm:$0xff]  }
 0x5b6   : > { %v3046_v43 = vld [vmem:[%s3763_s9 + $0x30] sm:$0xff]  }
 0x5b7   : > { %v1776_v45 = vmul.f32 %v1775_v44, %v1775_v44 }
 0x5b9   : > { %v1777_v46 = vsel %vm1769_vm4, %v1776_v45, 0.0  ;;  %v3048_v45 = vld [vmem:[%s3763_s9 + $0x78] sm:$0xff]  }
 0x5ba   : > { %1778 = vadd.xlane.f32.xlu1 %v1777_v46  ;;  %v3049_v46 = vld [vmem:[%s3763_s9 + $0xf8] sm:$0xff]  }
 0x647   : > { %v1779_v63 = vpop.xlane.xlu1 %1778 }
 0x648   : > { %v1780_v36 = vmul.f32 0.0078125, %v1779_v63  ;;  %v2626_v63 = vld [vmem:[%s3764_s10] ss:$0 sm:$0xff] }
 0x64a   : > { %v1781_v0 = vadd.f32 1e-05, %v1780_v36 }
 0x64c   : > { %3084 = vrsqrt.f32 %v1781_v0 }
 0x656   : > { %v3085_v5 = vpop.eup %3084 }
 0x657   : > { %v1783_v37 = vmul.f32 %v3085_v5, %v1775_v44  ;;  %v3047_v44 = vld [vmem:[%s3763_s9 + $0xb0] sm:$0xff]  }
 0x659   : > { %v1790_v7 = vmul.f32 %v2592_v51, %v1783_v37 }
 0x65b   : > { %v3630_v9 = vadd.f32 %v2593_v6, %v1790_v7 }
 0x65d   : > { %v1830_v38 = vpack.c.bf16 %v3630_v9, %v3630_v9 }
 0x65f   : > { %2046 = vmatmul.mubr.bf16.vlgmr.msra.gmra.mrb[16].mxu0 %v1830_v38  ;;  %2087 = vmatmul.mubr.bf16.vlgmr.msra.gmra.mrb[32].mxu1 %v1830_v38 }
 0x660   : > { %2714 = vmatpush3.bf16.msra.mxu0 %v3022_v10  ;;  %2736 = vmatpush3.bf16.msra.mxu1 %v3023_v11 }
 0x661   : > { %2715 = vmatprep.subr.bf16.mxu0 %v3024_v12  ;;  %2737 = vmatprep.subr.bf16.mxu1 %v3025_v4 }
 0x664   : > { %2716 = vmatpush3.bf16.msra.mxu0 %v3026_v13  ;;  %2738 = vmatpush3.bf16.msra.mxu1 %v3027_v14 }
 0x665   : > { %2717 = vmatprep.subr.bf16.mxu0 %v3028_v15  ;;  %2739 = vmatprep.subr.bf16.mxu1 %v3029_v16 }
 0x668   : > { %2718 = vmatpush3.bf16.msra.mxu0 %v3030_v17  ;;  %2740 = vmatpush3.bf16.msra.mxu1 %v3031_v18 }
 0x669   : > { %2719 = vmatprep.subr.bf16.mxu0 %v3032_v19  ;;  %2741 = vmatprep.subr.bf16.mxu1 %v3033_v20 }
 0x66c   : > { %2720 = vmatpush3.bf16.msra.mxu0 %v3034_v2  ;;  %2742 = vmatpush3.bf16.msra.mxu1 %v3035_v21 }
 0x66d   : > { %2721 = vmatprep.subr.bf16.mxu0 %v3036_v22  ;;  %2743 = vmatprep.subr.bf16.mxu1 %v3037_v23  ;;  %v2660_v22 = vld [vmem:[%s3768_s14] ss:$0 sm:$0xff] }
 0x670   : > { %2722 = vmatpush3.bf16.msra.mxu0 %v3038_v24  ;;  %2744 = vmatpush3.bf16.msra.mxu1 %v3039_v25 }
 0x671   : > { %2723 = vmatprep.subr.bf16.mxu0 %v3040_v26  ;;  %2745 = vmatprep.subr.bf16.mxu1 %v3041_v27 }
 0x674   : > { %2724 = vmatpush3.bf16.msra.mxu0 %v3042_v33  ;;  %2746 = vmatpush3.bf16.msra.mxu1 %v3043_v40 }
 0x675   : > { %2725 = vmatprep.subr.bf16.mxu0 %v3044_v41  ;;  %2747 = vmatprep.subr.bf16.mxu1 %v3045_v42 }
 0x678   : > { %2726 = vmatpush3.bf16.msra.mxu0 %v3046_v43  ;;  %2748 = vmatpush3.bf16.msra.mxu1 %v3047_v44 }
 0x679   : > { %2727 = vmatprep.subr.bf16.mxu0 %v3048_v45  ;;  %2749 = vmatprep.subr.bf16.mxu1 %v3049_v46 }
 0x67c   : > { %2728 = vmatpush3.bf16.msra.mxu0 %v3050_v47  ;;  %2750 = vmatpush3.bf16.msra.mxu1 %v3051_v48 }
 0x732   : > { %v2047_v56 = vpop.f32.mrb[16].mxu0  ;;  %v2088_v57 = vpop.f32.mrb[32].mxu1 }
 0x733   : > { %v2048_v58 = vadd.f32 %v2047_v56, %v1836_v53  ;;  %v2089_v31 = vadd.f32 %v2088_v57, %v1844_v54  ;;  %v2049_v59 = vpop.f32.mrb[17].mxu0  ;;  %v2090_v60 = vpop.f32.mrb[33].mxu1 }
 0x734   : > { %v2050_v61 = vadd.f32 %v2049_v59, %v1840_v55  ;;  %v2091_v34 = vadd.f32 %v2090_v60, %v1848_v28  ;;  %v2051_v39 = vpop.f32.mrb[18].mxu0  ;;  %v2092_v62 = vpop.f32.mrb[34].mxu1 }
 0x735   : > { %v2052_v50 = vpop.f32.mrb[19].mxu0  ;;  %v2093_v35 = vpop.f32.mrb[35].mxu1  ;;  %v2159_v3 = vpack.c.bf16 %v2048_v58, %v2048_v58  ;;  %v2161_v8 = vpack.c.bf16 %v2089_v31, %v2089_v31 }
 0x736   : > { %v2160_v32 = vpack.c.bf16 %v2050_v61, %v2050_v61  ;;  %v2162_v1 = vpack.c.bf16 %v2091_v34, %v2091_v34 }
 0x738   : > { %2394 = vmatprep.mubr.bf16.mxu0 %v2160_v32  ;;  %2434 = vmatprep.mubr.bf16.mxu1 %v2162_v1 }
 0x739   : > { %2395 = vmatmul.mubr.bf16.vlgmr.msra.gmra.mrb[20].mxu0 %v2159_v3  ;;  %2435 = vmatmul.mubr.bf16.vlgmr.msra.gmra.mrb[36].mxu1 %v2161_v8 }
 0x80c   : > { %v2729_v29 = vpop.f32.mrb[20].mxu0  ;;  %v2751_v30 = vpop.f32.mrb[36].mxu1 }
 0x80d   : > { %v2730_v36 = vpop.f32.mrb[21].mxu0  ;;  %v2752_v0 = vpop.f32.mrb[37].mxu1 }
 0x80e   : > { %v2731_v5 = vadd.f32 %v2730_v36, %v2729_v29  ;;  %v2753_v51 = vadd.f32 %v2752_v0, %v2751_v30  ;;  %v2732_v37 = vpop.f32.mrb[22].mxu0  ;;  %v2754_v6 = vpop.f32.mrb[38].mxu1 }
 0x80f   : > { %v2733_v7 = vpop.f32.mrb[23].mxu0  ;;  %v2755_v10 = vpop.f32.mrb[39].mxu1 }
 0x810   : > { %v2397_v11 = vadd.f32 %v2731_v5, %v2626_v63 }
 0x812   : > { %v2437_v38 = vadd.f32 %v2753_v51, %v2397_v11 }
 0x814   : > { %v2442_v12 = vadd.f32 %v2437_v38, %v3630_v9  ;;  %v2659_v9 = vld [vmem:[%s3767_s13] ss:$0 sm:$0xff] }
 0x816   : > { %v2445_v4 = vsel %vm1769_vm4, %v2442_v12, 0.0 }
 0x817   : > { %2446 = vadd.xlane.f32.xlu0 %v2445_v4 }
 0x8a4   : > { %v2447_v13 = vpop.xlane.xlu0 %2446 }
 0x8a5   : > { %v2448_v14 = vmul.f32 0.0078125, %v2447_v13 }
 0x8a7   : > { %v2449_v15 = vsub.f32 %v2442_v12, %v2448_v14 }
 0x8a9   : > { %v2450_v16 = vmul.f32 %v2449_v15, %v2449_v15 }
 0x8ab   : > { %v2451_v17 = vsel %vm1769_vm4, %v2450_v16, 0.0 }
 0x8ac   : > { %2452 = vadd.xlane.f32.xlu1 %v2451_v17 }
 0x939   : > { %v2453_v18 = vpop.xlane.xlu1 %2452 }
 0x93a   : > { %v2454_v19 = vmul.f32 0.0078125, %v2453_v18 }
 0x93c   : > { %v2455_v20 = vadd.f32 1e-05, %v2454_v19 }
 0x93e   : > { %3086 = vrsqrt.f32 %v2455_v20 }
 0x948   : > { %v3087_v2 = vpop.eup %3086 }
 0x949   : > { %v2457_v21 = vmul.f32 %v3087_v2, %v2449_v15 }
 0x94b   : > { %v2464_v23 = vmul.f32 %v2659_v9, %v2457_v21 }
 0x94d   : > { %v2471_v24 = vadd.f32 %v2660_v22, %v2464_v23 }
 0x94f   : > { %2472 = vst [vmem:[%s503_s23] sm:$0xf] %v2471_v24 }
 0x950 PF: > { %s25_s18 = sadd.s32 1, %s3094_s18  }
 0x951   : > { %p22_p4 = scmp.ge.s32.totalorder %s25_s18, 4  }
 0x953   :  { %24 = sbr.rel (!%p22_p4) target bundleno = 1 (0x1), region = 113 }

// kernel: collection_status_forward.13
= control target key start
LH: loop header
LB: loop body
LE: loop exit
PB: predicated region body
PF: predicated region fallthrough
CT: control target
= control target key end

     0   :  { %s3379_s18 = smov 0   ;;  %s4158_s0 = inlined_call_operand.vmem [shape: f32[2,16,128], index: 0, kind: input, shape index: {}]   ;;  %s4159_s1 = inlined_call_operand.vmem [shape: f32[2,1,16], index: 1, kind: input, shape index: {}]   ;;  %s4160_s2 = inlined_call_operand.vmem [shape: f32[8,128], index: 2, kind: input, shape index: {}]   ;;  %s4161_s3 = inlined_call_operand.vmem [shape: bf16[128,384], index: 3, kind: input, shape index: {}]   ;;  %s4162_s4 = inlined_call_operand.vmem [shape: f32[1,384], index: 4, kind: input, shape index: {}]   ;;  %s4163_s5 = inlined_call_operand.vmem [shape: bf16[128,128], index: 5, kind: input, shape index: {}]   ;;  %s4164_s6 = inlined_call_operand.vmem [shape: f32[1,128], index: 6, kind: input, shape index: {}]   ;;  %s4165_s7 = inlined_call_operand.vmem [shape: bf16[128,512], index: 7, kind: input, shape index: {}]   ;;  %s4166_s8 = inlined_call_operand.vmem [shape: f32[1,512], index: 8, kind: input, shape index: {}]   ;;  %s4167_s9 = inlined_call_operand.vmem [shape: bf16[512,128], index: 9, kind: input, shape index: {}]   ;;  %s4168_s10 = inlined_call_operand.vmem [shape: f32[1,128], index: 10, kind: input, shape index: {}]   ;;  %s4169_s11 = inlined_call_operand.vmem [shape: f32[1,128], index: 11, kind: input, shape index: {}]   ;;  %s4170_s12 = inlined_call_operand.vmem [shape: f32[1,128], index: 12, kind: input, shape index: {}]   ;;  %s4171_s13 = inlined_call_operand.vmem [shape: f32[1,128], index: 13, kind: input, shape index: {}]   ;;  %s4172_s14 = inlined_call_operand.vmem [shape: f32[1,128], index: 14, kind: input, shape index: {}]   ;;  %s4173_s15 = inlined_call_operand.vmem [shape: f32[2,16,128], index: 15, kind: output, shape index: {}]  }
   0x1 LB: > { %s2693_s19 = sadd.s32 4294967295, %s3294_s18   ;;  %p2697_p0 = scmp.ge.s32.totalorder %s3294_s18, 1  ;;  %s3294_s18 = sphi %s3379_s18, %s25_s18  }
   0x2   : > { %p445_p1 = scmp.lt.s32.totalorder %s3294_s18, 3 }
   0x4   : > { %p446_p2 = pnand %p2697_p0, %p445_p1 }
   0x5   : > { %v3094_v0 = vld [vmem:[%s4161_s3 + $0x4] ss:$12 sps:$4 sm:$0xff] (!%p446_p2)   ;;  %v3096_v1 = vld [vmem:[%s4161_s3] ss:$12 sps:$4 sm:$0xff] (!%p446_p2)   ;;  %v3296_v2 = vmov (!%p446_p2), 0   ;;  %v3297_v4 = vmov (!%p446_p2), 0.0   ;;  %v548_v29 = vlaneseq (!%p446_p2) }
   0x6   : > { %449 = sbr.rel (%p446_p2) target bundleno = 2394 (0x95a), region = 80  ;;  %723 = vmatprep.mubr.bf16.mxu0 (!%p446_p2), %v3296_v2  ;;  %691 = vmatprep.subr.bf16.mxu0 (!%p446_p2), %v3094_v0  ;;  %v3097_v3 = vld [vmem:[%s4161_s3 + $0x1c] ss:$12 sps:$4 sm:$0xff] (!%p446_p2)   ;;  %v3099_v5 = vld [vmem:[%s4161_s3 + $0x18] ss:$12 sps:$4 sm:$0xff] (!%p446_p2)   ;;  %p496_p3 = scmp.lt.s32.totalorder (!%p446_p2), %s2693_s19, 1 }
   0x7   : > { %2919 = vmatprep.subr.bf16.mxu1 (!%p446_p2), %v3297_v4  ;;  %692 = vmatpush1.bf16.msra.mxu0 (!%p446_p2), %v3096_v1  ;;  %v3100_v6 = vld [vmem:[%s4161_s3 + $0x34] ss:$12 sps:$4 sm:$0xff] (!%p446_p2)   ;;  %v3102_v7 = vld [vmem:[%s4161_s3 + $0x30] ss:$12 sps:$4 sm:$0xff] (!%p446_p2)   ;;  %v3103_v8 = vld [vmem:[%s4161_s3 + $0x4c] ss:$12 sps:$4 sm:$0xff] (!%p446_p2)  }
   0x8   : > { %693 = vmatprep.subr.bf16.mxu0 (!%p446_p2), %v3097_v3  ;;  %v3105_v9 = vld [vmem:[%s4161_s3 + $0x48] ss:$12 sps:$4 sm:$0xff] (!%p446_p2)   ;;  %v3106_v10 = vld [vmem:[%s4161_s3 + $0x64] ss:$12 sps:$4 sm:$0xff] (!%p446_p2)   ;;  %v3119_v12 = vld [vmem:[%s4161_s3 + $0x20] ss:$12 sps:$4 sm:$0xff] (!%p446_p2)  }
   0x9   : > { %v3118_v11 = vld [vmem:[%s4161_s3 + $0x8] ss:$12 sps:$4 sm:$0xff] (!%p446_p2)   ;;  %v3108_v13 = vld [vmem:[%s4161_s3 + $0x60] ss:$12 sps:$4 sm:$0xff] (!%p446_p2)   ;;  %v3120_v15 = vld [vmem:[%s4161_s3 + $0x38] ss:$12 sps:$4 sm:$0xff] (!%p446_p2)  }
   0xa   : > { %2920 = vmatpush3.bf16.msra.mxu1 (!%p446_p2), %v3118_v11  ;;  %v3109_v14 = vld [vmem:[%s4161_s3 + $0x7c] ss:$12 sps:$4 sm:$0xff] (!%p446_p2)   ;;  %v3111_v16 = vld [vmem:[%s4161_s3 + $0x78] ss:$12 sps:$4 sm:$0xff] (!%p446_p2)   ;;  %v3112_v17 = vld [vmem:[%s4161_s3 + $0x94] ss:$12 sps:$4 sm:$0xff] (!%p446_p2)  }
   0xb   : > { %694 = vmatpush1.bf16.msra.mxu0 (!%p446_p2), %v3099_v5  ;;  %2921 = vmatprep.subr.bf16.mxu1 (!%p446_p2), %v3297_v4  ;;  %v3121_v18 = vld [vmem:[%s4161_s3 + $0x50] ss:$12 sps:$4 sm:$0xff] (!%p446_p2)   ;;  %v3115_v20 = vld [vmem:[%s4161_s3 + $0xac] ss:$12 sps:$4 sm:$0xff] (!%p446_p2)   ;;  %v3122_v21 = vld [vmem:[%s4161_s3 + $0x68] ss:$12 sps:$4 sm:$0xff] (!%p446_p2)  }
   0xc   : > { %695 = vmatprep.subr.bf16.mxu0 (!%p446_p2), %v3100_v6  ;;  %v3114_v19 = vld [vmem:[%s4161_s3 + $0x90] ss:$12 sps:$4 sm:$0xff] (!%p446_p2)   ;;  %v3117_v22 = vld [vmem:[%s4161_s3 + $0xa8] ss:$12 sps:$4 sm:$0xff] (!%p446_p2)   ;;  %v3123_v25 = vld [vmem:[%s4161_s3 + $0x80] ss:$12 sps:$4 sm:$0xff] (!%p446_p2)  }
   0xd   : > { %s4175_s19 = smov (!%p496_p3, %s2693_s19), 1  ;;  %v3124_v27 = vld [vmem:[%s4161_s3 + $0x98] ss:$12 sps:$4 sm:$0xff]   ;;  %v3125_v28 = vld [vmem:[%s4161_s3 + $0xb0] ss:$12 sps:$4 sm:$0xff]   ;;  %vm3298_vm0 = vmmov 0  }
   0xe   : > { %s2823_s20 = sshll.u32 %s4175_s19, 4  ;;  %2922 = vmatpush3.bf16.msra.mxu1 %v3119_v12  ;;  %2935 = vmatprep.mubr.msk.bf16.mxu1 %vm3298_vm0, %v3297_v4  ;;  %v3488_v30 = vshrl.u32 %v548_v29, 7  ;;  %v3494_v32 = vld [vmem:[%s4162_s4] sm:$0x7]  ;;  %v3521_v40 = vld [vmem:[%s4160_s2 + $0x3] ss:$0 sm:$0xff]  ;;  %s503_s17 = scalar_lea.vmem %s4159_s1, %s4175_s19 }
   0xf   : > { %696 = vmatpush1.bf16.msra.mxu0 %v3102_v7  ;;  %2923 = vmatprep.subr.bf16.mxu1 %v3297_v4  ;;  %s3456_s23 = scalar_lea.vmem %s4158_s0, %s2823_s20  ;;  %v3506_v36 = vld [vmem:[%s4160_s2] ss:$0 sm:$0xff]  ;;  %v3511_v37 = vld [vmem:[%s4160_s2 + $0x2] ss:$0 sm:$0xff]  ;;  %v3516_v39 = vld [vmem:[%s4160_s2 + $0x1] ss:$0 sm:$0xff]  ;;  %s508_s27 = scalar_lea.vmem %s4173_s15, %s2823_s20 }
  0x10   : > { %697 = vmatprep.subr.bf16.mxu0 %v3103_v8  ;;  %v510_v23 = vld [vmem:[%s3456_s23] sm:$0xff]  ;;  %v511_v24 = vld [vmem:[%s3456_s23 + $0x8] sm:$0xff]  ;;  %v550_v31 = vsub.s32 0, %v3488_v30  ;;  %v554_v33 = vsub.s32 1, %v3488_v30  ;;  %vm835_vm1 = vcmask 130048  }
  0x11   : > { %v545_v26 = vpack.c.bf16 %v511_v24, %v510_v23  ;;  %v3526_v43 = vld [vmem:[%s4160_s2 + $0x4] ss:$0 sm:$0xff]  ;;  %v3531_v44 = vld [vmem:[%s4160_s2 + $0x5] ss:$0 sm:$0xff]  ;;  %v3539_v52 = vld [vmem:[%s4160_s2 + $0x6] ss:$0 sm:$0xff] }
  0x12   : > { %2924 = vmatpush3.bf16.msra.mxu1 %v3120_v15  ;;  %v551_v34 = vrot.slane %v3494_v32, %v550_v31  ;;  %v555_v35 = vrot.slane %v3494_v32, %v554_v33  ;;  %v3554_v1 = vld [vmem:[%s4160_s2 + $0x7] ss:$0 sm:$0xff] }
  0x13   : > { %698 = vmatpush1.bf16.msra.mxu0 %v3105_v9  ;;  %2925 = vmatprep.subr.bf16.mxu1 %v3297_v4 }
  0x14   : > { %699 = vmatprep.subr.bf16.mxu0 %v3106_v10 }
  0x16   : > { %2926 = vmatpush3.bf16.msra.mxu1 %v3121_v18 }
  0x17   : > { %700 = vmatpush1.bf16.msra.mxu0 %v3108_v13  ;;  %2927 = vmatprep.subr.bf16.mxu1 %v3297_v4 }
  0x18   : > { %701 = vmatprep.subr.bf16.mxu0 %v3109_v14 }
  0x1a   : > { %2928 = vmatpush3.bf16.msra.mxu1 %v3122_v21 }
  0x1b   : > { %702 = vmatpush1.bf16.msra.mxu0 %v3111_v16  ;;  %2929 = vmatprep.subr.bf16.mxu1 %v3297_v4 }
  0x1c   : > { %703 = vmatprep.subr.bf16.mxu0 %v3112_v17 }
  0x1e   : > { %2930 = vmatpush3.bf16.msra.mxu1 %v3123_v25 }
  0x1f   : > { %704 = vmatpush1.bf16.msra.mxu0 %v3114_v19  ;;  %2931 = vmatprep.subr.bf16.mxu1 %v3297_v4  ;;  %v558_v19 = vsub.s32 2, %v3488_v30 }
  0x20   : > { %705 = vmatprep.subr.bf16.mxu0 %v3115_v20 }
  0x21   : > { %v559_v20 = vrot.slane %v3494_v32, %v558_v19 }
  0x22   : > { %2932 = vmatpush3.bf16.msra.mxu1 %v3124_v27 }
  0x23   : > { %706 = vmatpush1.bf16.msra.mxu0 %v3117_v22  ;;  %2933 = vmatprep.subr.bf16.mxu1 %v3297_v4 }
  0x24   : > { %2939 = vmatprep.subr.bf16.mxu0 %v3297_v4 }
  0x26   : > { %724 = vmatmul.mubr.bf16.vlgmr.msra.gmra.mrb[0].mxu0 %v545_v26  ;;  %2934 = vmatpush3.bf16.msra.mxu1 %v3125_v28 }
  0x27   : > { %2963 = vmatprep.subr.bf16.mxu1 %v3297_v4  ;;  %2941 = vmatprep.mubr.msk.bf16.mxu0 %vm3298_vm0, %v3297_v4 }
  0x29   : > { %2936 = vmatmul.mubr.bf16.vlgmr.msra.gmra.mrb[0].mxu1 %v545_v26 }
  0x2a   : > { %2965 = vmatprep.mubr.msk.bf16.mxu1 %vm3298_vm0, %v3297_v4 }
  0xf9   : > { %v725_v38 = vpop.f32.mrb[0].mxu0 }
  0xfa   : > { %v726_v41 = vadd.f32 %v725_v38, %v551_v34  ;;  %v727_v42 = vpop.f32.mrb[1].mxu0 }
  0xfb   : > { %v728_v45 = vadd.f32 %v727_v42, %v555_v35  ;;  %v729_v46 = vpop.f32.mrb[2].mxu0 }
  0xfc   : > { %v730_v47 = vadd.f32 %v729_v46, %v551_v34  ;;  %v731_v48 = vpop.f32.mrb[3].mxu0  ;;  %v780_v49 = vmul.f32 %v3506_v36, %v726_v41  ;;  %v1034_v50 = vmul.f32 %v3511_v37, %v726_v41  ;;  %v867_v51 = vmul.f32 %v3516_v39, %v726_v41  ;;  %v768_v15 = vpop.f32.mrb[0].mxu1 }
  0xfd   : > { %v732_v53 = vadd.f32 %v731_v48, %v555_v35  ;;  %v1159_v54 = vmul.f32 %v3521_v40, %v726_v41  ;;  %v1284_v55 = vmul.f32 %v3526_v43, %v726_v41  ;;  %v1409_v56 = vmul.f32 %v3531_v44, %v726_v41  ;;  %v2937_v16 = vpop.f32.mrb[1].mxu1 }
  0xfe   : > { %v781_v57 = vmul.f32 %v3506_v36, %v730_v47  ;;  %v1035_v58 = vmul.f32 %v3511_v37, %v730_v47  ;;  %v868_v59 = vmul.f32 %v3516_v39, %v730_v47  ;;  %v1160_v60 = vmul.f32 %v3521_v40, %v730_v47  ;;  %v771_v17 = vpop.f32.mrb[2].mxu1 }
  0xff   : > { %v783_v61 = vpack.c.bf16 %v732_v53, %v728_v45  ;;  %v1285_v62 = vmul.f32 %v3526_v43, %v730_v47  ;;  %v1410_v63 = vmul.f32 %v3531_v44, %v730_v47  ;;  %v1534_v0 = vmul.f32 %v3539_v52, %v726_v41  ;;  %v2938_v18 = vpop.f32.mrb[3].mxu1 }
 0x100   : > { %v782_v3 = vpack.c.bf16 %v781_v57, %v780_v49  ;;  %v1036_v5 = vpack.c.bf16 %v1035_v58, %v1034_v50  ;;  %v869_v6 = vpack.c.bf16 %v868_v59, %v867_v51  ;;  %v1161_v7 = vpack.c.bf16 %v1160_v60, %v1159_v54  ;;  %v3650_v50 = vld [vmem:[%s503_s17] ss:$0 sm:$0xff] }
 0x101   : > { %2940 = vmatpush3.bf16.xpose.msra.mxu0 %v783_v61  ;;  %2964 = vmatpush3.bf16.xpose.msra.mxu1 %v783_v61  ;;  %v1286_v8 = vpack.c.bf16 %v1285_v62, %v1284_v55  ;;  %v1411_v9 = vpack.c.bf16 %v1410_v63, %v1409_v56  ;;  %v1535_v10 = vmul.f32 %v3539_v52, %v730_v47 }
 0x102   : > { %2945 = vmatprep.subr.bf16.mxu0 %v3297_v4  ;;  %2975 = vmatprep.subr.bf16.mxu1 %v3297_v4  ;;  %v1659_v11 = vmul.f32 %v3554_v1, %v726_v41  ;;  %v1660_v12 = vmul.f32 %v3554_v1, %v730_v47  ;;  %v769_v21 = vadd.f32 %v768_v15, %v559_v20 }
 0x103   : > { %v1536_v13 = vpack.c.bf16 %v1535_v10, %v1534_v0  ;;  %v772_v22 = vadd.f32 %v771_v17, %v559_v20 }
 0x104   : > { %v1661_v14 = vpack.c.bf16 %v1660_v12, %v1659_v11  ;;  %v937_v23 = vmul.f32 %v3516_v39, %v769_v21  ;;  %v3590_v26 = vmul.f32 %v3506_v36, %v769_v21  ;;  %v3596_v28 = vmul.f32 %v3511_v37, %v769_v21 }
 0x105   : > { %v938_v24 = vmul.f32 %v3516_v39, %v772_v22  ;;  %v3593_v27 = vmul.f32 %v3506_v36, %v772_v22  ;;  %v3599_v29 = vmul.f32 %v3511_v37, %v772_v22  ;;  %v3602_v32 = vmul.f32 %v3521_v40, %v769_v21 }
 0x106   : > { %v3605_v34 = vmul.f32 %v3521_v40, %v772_v22  ;;  %v3608_v35 = vmul.f32 %v3526_v43, %v769_v21  ;;  %v3613_v38 = vmul.f32 %v3526_v43, %v772_v22  ;;  %v3616_v37 = vmul.f32 %v3531_v44, %v769_v21 }
 0x107   : > { %v940_v25 = vpack.c.bf16 %v938_v24, %v937_v23  ;;  %v861_v36 = vpack.c.bf16 %v3593_v27, %v3590_v26  ;;  %v3619_v39 = vmul.f32 %v3531_v44, %v772_v22  ;;  %v1107_v40 = vpack.c.bf16 %v3599_v29, %v3596_v28 }
 0x108   : > { %2942 = vmatmul.mubr.bf16.vlgmr.msra.gmra.mrb[4].mxu0 %v782_v3  ;;  %2966 = vmatmul.mubr.bf16.vlgmr.msra.gmra.mrb[4].mxu1 %v1036_v5  ;;  %v1232_v41 = vpack.c.bf16 %v3605_v34, %v3602_v32  ;;  %v3627_v42 = vmul.f32 %v3539_v52, %v769_v21  ;;  %v3630_v43 = vmul.f32 %v3539_v52, %v772_v22 }
 0x109   : > { %2946 = vmatpush3.bf16.xpose.msra.mxu0 %v783_v61  ;;  %2976 = vmatpush3.bf16.xpose.msra.mxu1 %v783_v61  ;;  %v1357_v45 = vpack.c.bf16 %v3613_v38, %v3608_v35  ;;  %v1482_v44 = vpack.c.bf16 %v3619_v39, %v3616_v37  ;;  %v3637_v46 = vmul.f32 %v3554_v1, %v769_v21 }
 0x10a   : > { %2947 = vmatprep.mubr.msk.bf16.mxu0 %vm3298_vm0, %v3297_v4  ;;  %2977 = vmatprep.mubr.msk.bf16.mxu1 %vm3298_vm0, %v3297_v4  ;;  %v3640_v47 = vmul.f32 %v3554_v1, %v772_v22  ;;  %v1607_v48 = vpack.c.bf16 %v3630_v43, %v3627_v42 }
 0x10b   : > { %2987 = vmatprep.subr.bf16.mxu1 %v3297_v4  ;;  %2951 = vmatprep.subr.bf16.mxu0 %v3297_v4 }
 0x10c   : > { %v1732_v49 = vpack.c.bf16 %v3640_v47, %v3637_v46 }
 0x110   : > { %2948 = vmatmul.mubr.bf16.vlgmr.msra.gmra.mrb[8].mxu0 %v869_v6  ;;  %2978 = vmatmul.mubr.bf16.vlgmr.msra.gmra.mrb[8].mxu1 %v1161_v7 }
 0x111   : > { %2988 = vmatpush3.bf16.xpose.msra.mxu1 %v783_v61  ;;  %2989 = vmatprep.mubr.msk.bf16.mxu1 %vm3298_vm0, %v3297_v4 }
 0x112   : > { %2999 = vmatprep.subr.bf16.mxu1 %v3297_v4  ;;  %2953 = vmatprep.mubr.msk.bf16.mxu0 %vm3298_vm0, %v3297_v4 }
 0x113   : > { %2952 = vmatpush3.bf16.msra.mxu0 %v940_v25 }
 0x114   : > { %2957 = vmatprep.subr.bf16.mxu0 %v3297_v4 }
 0x118   : > { %2990 = vmatmul.mubr.bf16.vlgmr.msra.gmra.mrb[12].mxu1 %v1286_v8 }
 0x119   : > { %3000 = vmatpush3.bf16.xpose.msra.mxu1 %v783_v61  ;;  %3001 = vmatprep.mubr.msk.bf16.mxu1 %vm3298_vm0, %v3297_v4 }
 0x11a   : > { %3011 = vmatprep.subr.bf16.mxu1 %v3297_v4 }
 0x120   : > { %3002 = vmatmul.mubr.bf16.vlgmr.msra.gmra.mrb[16].mxu1 %v1411_v9 }
 0x121   : > { %3012 = vmatpush3.bf16.xpose.msra.mxu1 %v783_v61  ;;  %3013 = vmatprep.mubr.msk.bf16.mxu1 %vm3298_vm0, %v3297_v4 }
 0x122   : > { %3023 = vmatprep.subr.bf16.mxu1 %v3297_v4 }
 0x128   : > { %3014 = vmatmul.mubr.bf16.vlgmr.msra.gmra.mrb[20].mxu1 %v1536_v13 }
 0x129   : > { %3024 = vmatpush3.bf16.xpose.msra.mxu1 %v783_v61  ;;  %3025 = vmatprep.mubr.msk.bf16.mxu1 %vm3298_vm0, %v3297_v4 }
 0x12a   : > { %3035 = vmatprep.subr.bf16.mxu1 %v3297_v4 }
 0x130   : > { %3026 = vmatmul.mubr.bf16.vlgmr.msra.gmra.mrb[24].mxu1 %v1661_v14 }
 0x131   : > { %3051 = vmatprep.mubr.msk.bf16.mxu1 %vm3298_vm0, %v3297_v4 }
 0x1db   : > { %v818_v51 = vpop.f32.mrb[4].mxu0  ;;  %v1071_v52 = vpop.f32.mrb[4].mxu1 }
 0x1dc   : > { %v825_v53 = vmul.f32 0.25, %v818_v51  ;;  %v1078_v54 = vmul.f32 0.25, %v1071_v52  ;;  %v2943_v55 = vpop.f32.mrb[5].mxu0  ;;  %v2967_v56 = vpop.f32.mrb[5].mxu1 }
 0x1dd   : > { %v821_v57 = vpop.f32.mrb[6].mxu0  ;;  %v1074_v58 = vpop.f32.mrb[6].mxu1 }
 0x1de   : > { %v826_v59 = vmul.f32 0.25, %v821_v57  ;;  %v1079_v60 = vmul.f32 0.25, %v1074_v58  ;;  %v2944_v61 = vpop.f32.mrb[7].mxu0  ;;  %v2968_v62 = vpop.f32.mrb[7].mxu1  ;;  %v3653_v63 = vadd.f32 %v3650_v50, %v825_v53  ;;  %v3656_v0 = vadd.f32 %v3650_v50, %v1078_v54 }
 0x1e0   : > { %v836_v1 = vsel %vm835_vm1, %v3653_v63, -inf  ;;  %v3661_v3 = vadd.f32 %v3650_v50, %v826_v59  ;;  %v3664_v5 = vadd.f32 %v3650_v50, %v1079_v60  ;;  %v1082_v60 = vsel %vm835_vm1, %v3656_v0, -inf }
 0x1e1   : > { %837 = vmax.xlane.f32.xlu1 %v836_v1 }
 0x1e2   : > { %v839_v12 = vsel %vm835_vm1, %v3661_v3, -inf  ;;  %v1085_v22 = vsel %vm835_vm1, %v3664_v5, -inf }
 0x1e3   : > { %v904_v6 = vpop.f32.mrb[8].mxu0  ;;  %v1196_v7 = vpop.f32.mrb[8].mxu1 }
 0x1e4   : > { %v911_v8 = vmul.f32 0.25, %v904_v6  ;;  %v1203_v9 = vmul.f32 0.25, %v1196_v7  ;;  %v2949_v10 = vpop.f32.mrb[9].mxu0  ;;  %v2979_v11 = vpop.f32.mrb[9].mxu1 }
 0x1e5   : > { %v1199_v13 = vpop.f32.mrb[10].mxu1  ;;  %840 = vmax.xlane.f32.xlu1 %v839_v12  ;;  %v907_v14 = vpop.f32.mrb[10].mxu0 }
 0x1e6   : > { %v1204_v15 = vmul.f32 0.25, %v1199_v13  ;;  %v912_v16 = vmul.f32 0.25, %v907_v14  ;;  %v2950_v17 = vpop.f32.mrb[11].mxu0  ;;  %v2980_v18 = vpop.f32.mrb[11].mxu1  ;;  %v3669_v20 = vadd.f32 %v3650_v50, %v911_v8  ;;  %v3672_v21 = vadd.f32 %v3650_v50, %v1203_v9 }
 0x1e8   : > { %v915_v23 = vsel %vm835_vm1, %v3669_v20, -inf  ;;  %v3679_v24 = vadd.f32 %v3650_v50, %v1204_v15  ;;  %v3682_v25 = vadd.f32 %v3650_v50, %v912_v16  ;;  %v1207_v8 = vsel %vm835_vm1, %v3672_v21, -inf }
 0x1e9   : > { %1086 = vmax.xlane.f32.xlu1 %v1085_v22  ;;  %916 = vmax.xlane.f32.xlu0 %v915_v23 }
 0x1ea   : > { %v1210_v54 = vsel %vm835_vm1, %v3679_v24, -inf  ;;  %v918_v55 = vsel %vm835_vm1, %v3682_v25, -inf }
 0x1eb   : > { %v1321_v51 = vpop.f32.mrb[12].mxu1 }
 0x1ec   : > { %v1328_v52 = vmul.f32 0.25, %v1321_v51  ;;  %v2991_v53 = vpop.f32.mrb[13].mxu1 }
 0x1ed   : > { %v1324_v56 = vpop.f32.mrb[14].mxu1  ;;  %1211 = vmax.xlane.f32.xlu1 %v1210_v54  ;;  %919 = vmax.xlane.f32.xlu0 %v918_v55 }
 0x1ee   : > { %v1329_v57 = vmul.f32 0.25, %v1324_v56  ;;  %v2992_v58 = vpop.f32.mrb[15].mxu1  ;;  %v3689_v59 = vadd.f32 %v3650_v50, %v1328_v52 }
 0x1f0   : > { %v3694_v61 = vadd.f32 %v3650_v50, %v1329_v57  ;;  %v1332_v13 = vsel %vm835_vm1, %v3689_v59, -inf }
 0x1f1   : > { %1083 = vmax.xlane.f32.xlu0 %v1082_v60 }
 0x1f2   : > { %v1335_v62 = vsel %vm835_vm1, %v3694_v61, -inf }
 0x1f3   : > { %v1446_v1 = vpop.f32.mrb[16].mxu1  ;;  %1336 = vmax.xlane.f32.xlu1 %v1335_v62 }
 0x1f4   : > { %v1453_v6 = vmul.f32 0.25, %v1446_v1  ;;  %v3003_v7 = vpop.f32.mrb[17].mxu1 }
 0x1f5   : > { %v1449_v9 = vpop.f32.mrb[18].mxu1  ;;  %1208 = vmax.xlane.f32.xlu0 %v1207_v8 }
 0x1f6   : > { %v1454_v10 = vmul.f32 0.25, %v1449_v9  ;;  %v3004_v11 = vpop.f32.mrb[19].mxu1  ;;  %v3701_v12 = vadd.f32 %v3650_v50, %v1453_v6 }
 0x1f8   : > { %v3706_v14 = vadd.f32 %v3650_v50, %v1454_v10  ;;  %v1457_v22 = vsel %vm835_vm1, %v3701_v12, -inf }
 0x1f9   : > { %1333 = vmax.xlane.f32.xlu0 %v1332_v13 }
 0x1fa   : > { %v1460_v15 = vsel %vm835_vm1, %v3706_v14, -inf }
 0x1fb   : > { %v1571_v16 = vpop.f32.mrb[20].mxu1  ;;  %1461 = vmax.xlane.f32.xlu1 %v1460_v15 }
 0x1fc   : > { %v1578_v17 = vmul.f32 0.25, %v1571_v16  ;;  %v3015_v18 = vpop.f32.mrb[21].mxu1 }
 0x1fd   : > { %v1574_v23 = vpop.f32.mrb[22].mxu1  ;;  %1458 = vmax.xlane.f32.xlu0 %v1457_v22 }
 0x1fe   : > { %v1579_v51 = vmul.f32 0.25, %v1574_v23  ;;  %v3016_v52 = vpop.f32.mrb[23].mxu1  ;;  %v3713_v53 = vadd.f32 %v3650_v50, %v1578_v17 }
 0x200   : > { %v1582_v54 = vsel %vm835_vm1, %v3713_v53, -inf  ;;  %v3718_v55 = vadd.f32 %v3650_v50, %v1579_v51 }
 0x201   : > { %1583 = vmax.xlane.f32.xlu0 %v1582_v54 }
 0x202   : > { %v1585_v56 = vsel %vm835_vm1, %v3718_v55, -inf }
 0x203   : > { %v1696_v57 = vpop.f32.mrb[24].mxu1  ;;  %1586 = vmax.xlane.f32.xlu1 %v1585_v56 }
 0x204   : > { %v1703_v58 = vmul.f32 0.25, %v1696_v57  ;;  %v3027_v60 = vpop.f32.mrb[25].mxu1 }
 0x205   : > { %v1699_v62 = vpop.f32.mrb[26].mxu1 }
 0x206   : > { %v1704_v1 = vmul.f32 0.25, %v1699_v62  ;;  %v3028_v6 = vpop.f32.mrb[27].mxu1  ;;  %v3723_v7 = vadd.f32 %v3650_v50, %v1703_v58 }
 0x208   : > { %v1707_v8 = vsel %vm835_vm1, %v3723_v7, -inf  ;;  %v3728_v9 = vadd.f32 %v3650_v50, %v1704_v1 }
 0x209   : > { %1708 = vmax.xlane.f32.xlu0 %v1707_v8 }
 0x20a   : > { %v1710_v10 = vsel %vm835_vm1, %v3728_v9, -inf }
 0x20b   : > { %1711 = vmax.xlane.f32.xlu1 %v1710_v10 }
 0x26e   : > { %v838_v11 = vpop.xlane.xlu1 %837 }
 0x26f   : > { %v842_v15 = vsub.f32 %v3653_v63, %v838_v11 }
 0x271   : > { %v844_v23 = vmul.f32 1.442695, %v842_v15 }
 0x272   : > { %v841_v13 = vpop.xlane.xlu1 %840 }
 0x273   : > { %v843_v51 = vsub.f32 %v3661_v3, %v841_v13 }
 0x275   : > { %v846_v56 = vmul.f32 1.442695, %v843_v51 }
 0x276   : > { %v917_v16 = vpop.xlane.xlu0 %916  ;;  %v1087_v18 = vpop.xlane.xlu1 %1086 }
 0x277   : > { %v921_v17 = vsub.f32 %v3669_v20, %v917_v16  ;;  %v1089_v57 = vsub.f32 %v3664_v5, %v1087_v18 }
 0x279   : > { %v923_v22 = vmul.f32 1.442695, %v921_v17  ;;  %v1092_v62 = vmul.f32 1.442695, %v1089_v57 }
 0x27a   : > { %v920_v52 = vpop.xlane.xlu0 %919  ;;  %v1212_v60 = vpop.xlane.xlu1 %1211 }
 0x27b   : > { %v922_v50 = vsub.f32 %v3682_v25, %v920_v52  ;;  %3214 = vpow2.f32 %v923_v22  ;;  %v1214_v1 = vsub.f32 %v3679_v24, %v1212_v60 }
 0x27c   : > { %3216 = vpow2.f32 %v844_v23 }
 0x27d   : > { %v925_v54 = vmul.f32 1.442695, %v922_v50  ;;  %v1217_v5 = vmul.f32 1.442695, %v1214_v1 }
 0x27e   : > { %v1084_v58 = vpop.xlane.xlu0 %1083 }
 0x27f   : > { %v1088_v63 = vsub.f32 %v3656_v0, %v1084_v58  ;;  %3218 = vpow2.f32 %v925_v54 }
 0x280   : > { %3220 = vpow2.f32 %v846_v56  ;;  %v1337_v6 = vpop.xlane.xlu1 %1336 }
 0x281   : > { %v1090_v20 = vmul.f32 1.442695, %v1088_v63  ;;  %v1339_v11 = vsub.f32 %v3694_v61, %v1337_v6 }
 0x282   : > { %v1209_v3 = vpop.xlane.xlu0 %1208 }
 0x283   : > { %3222 = vpow2.f32 %v1090_v20  ;;  %v1213_v25 = vsub.f32 %v3672_v21, %v1209_v3  ;;  %v1342_v18 = vmul.f32 1.442695, %v1339_v11 }
 0x284   : > { %3224 = vpow2.f32 %v1092_v62 }
 0x285   : > { %v1215_v8 = vmul.f32 1.442695, %v1213_v25  ;;  %v3740_v10 = vpop.eup %3214 }
 0x286   : > { %v1334_v13 = vpop.xlane.xlu0 %1333  ;;  %v927_v15 = vsel %vm835_vm1, %v3740_v10, 0.0  ;;  %v3746_v24 = vpop.eup %3216 }
 0x287   : > { %3226 = vpow2.f32 %v1215_v8  ;;  %v1338_v0 = vsub.f32 %v3689_v59, %v1334_v13  ;;  %928 = vadd.xlane.f32.xlu0 %v927_v15  ;;  %v848_v59 = vsel %vm835_vm1, %v3746_v24, 0.0 }
 0x288   : > { %v1462_v16 = vpop.xlane.xlu1 %1461  ;;  %3228 = vpow2.f32 %v1217_v5 }
 0x289   : > { %v1340_v17 = vmul.f32 1.442695, %v1338_v0  ;;  %v3748_v21 = vpop.eup %3218  ;;  %v1464_v22 = vsub.f32 %v3706_v14, %v1462_v16 }
 0x28a   : > { %v1459_v23 = vpop.xlane.xlu0 %1458  ;;  %v930_v51 = vsel %vm835_vm1, %v3748_v21, 0.0  ;;  %v3756_v52 = vpop.eup %3220 }
 0x28b   : > { %3230 = vpow2.f32 %v1340_v17  ;;  %v1463_v61 = vsub.f32 %v3701_v12, %v1459_v23  ;;  %849 = vadd.xlane.f32.xlu0 %v848_v59  ;;  %931 = vadd.xlane.f32.xlu1 %v930_v51  ;;  %v1467_v56 = vmul.f32 1.442695, %v1464_v22  ;;  %v851_v58 = vsel %vm835_vm1, %v3756_v52, 0.0 }
 0x28c   : > { %3232 = vpow2.f32 %v1342_v18 }
 0x28d   : > { %v3758_v50 = vpop.eup %3222  ;;  %v1465_v54 = vmul.f32 1.442695, %v1463_v61 }
 0x28e   : > { %v1584_v14 = vpop.xlane.xlu0 %1583  ;;  %v1094_v57 = vsel %vm835_vm1, %v3758_v50, 0.0  ;;  %v3765_v60 = vpop.eup %3224 }
 0x28f   : > { %3234 = vpow2.f32 %v1465_v54  ;;  %v1588_v12 = vsub.f32 %v3713_v53, %v1584_v14  ;;  %852 = vadd.xlane.f32.xlu1 %v851_v58  ;;  %1095 = vadd.xlane.f32.xlu0 %v1094_v57  ;;  %v1097_v53 = vsel %vm835_vm1, %v3765_v60, 0.0 }
 0x290   : > { %v1587_v63 = vpop.xlane.xlu1 %1586  ;;  %3236 = vpow2.f32 %v1467_v56 }
 0x291   : > { %v3767_v20 = vpop.eup %3226  ;;  %v1590_v62 = vmul.f32 1.442695, %v1588_v12  ;;  %v1589_v1 = vsub.f32 %v3718_v55, %v1587_v63  ;;  %v3126_v63 = vld [vmem:[%s4163_s5] sm:$0xff]  }
 0x292   : > { %v1219_v3 = vsel %vm835_vm1, %v3767_v20, 0.0  ;;  %v3774_v25 = vpop.eup %3228  ;;  %3036 = vmatpush3.bf16.msra.mxu1 %v3126_v63 }
 0x293   : > { %3238 = vpow2.f32 %v1590_v62  ;;  %v1592_v6 = vmul.f32 1.442695, %v1589_v1  ;;  %1098 = vadd.xlane.f32.xlu1 %v1097_v53  ;;  %1220 = vadd.xlane.f32.xlu0 %v1219_v3  ;;  %v1222_v13 = vsel %vm835_vm1, %v3774_v25, 0.0  ;;  %v3127_v62 = vld [vmem:[%s4163_s5 + $0x8] sm:$0xff]   ;;  %v3128_v1 = vld [vmem:[%s4163_s5 + $0x10] sm:$0xff]   ;;  %v3129_v3 = vld [vmem:[%s4163_s5 + $0x18] sm:$0xff]  }
 0x294   : > { %3037 = vmatprep.subr.bf16.mxu1 %v3297_v4  ;;  %v3131_v53 = vld [vmem:[%s4163_s5 + $0x28] sm:$0xff]  }
 0x295   : > { %v3776_v8 = vpop.eup %3230  ;;  %3240 = vpow2.f32 %v1592_v6  ;;  %v3130_v6 = vld [vmem:[%s4163_s5 + $0x20] sm:$0xff]  }
 0x296   : > { %v1709_v5 = vpop.xlane.xlu0 %1708  ;;  %v1344_v55 = vsel %vm835_vm1, %v3776_v8, 0.0  ;;  %v3783_v0 = vpop.eup %3232  ;;  %3038 = vmatpush3.bf16.msra.mxu1 %v3127_v62 }
 0x297   : > { %v1713_v11 = vsub.f32 %v3723_v7, %v1709_v5  ;;  %1223 = vadd.xlane.f32.xlu1 %v1222_v13  ;;  %1345 = vadd.xlane.f32.xlu0 %v1344_v55  ;;  %v1347_v7 = vsel %vm835_vm1, %v3783_v0, 0.0  ;;  %v3132_v5 = vld [vmem:[%s4163_s5 + $0x30] sm:$0xff]  }
 0x298   : > { %v1712_v15 = vpop.xlane.xlu1 %1711  ;;  %3039 = vmatprep.subr.bf16.mxu1 %v3297_v4 }
 0x299   : > { %v3785_v16 = vpop.eup %3234  ;;  %v1715_v17 = vmul.f32 1.442695, %v1713_v11  ;;  %v1714_v18 = vsub.f32 %v3728_v9, %v1712_v15 }
 0x29a   : > { %v1469_v22 = vsel %vm835_vm1, %v3785_v16, 0.0  ;;  %v3792_v61 = vpop.eup %3236  ;;  %3040 = vmatpush3.bf16.msra.mxu1 %v3128_v1 }
 0x29b   : > { %3242 = vpow2.f32 %v1715_v17  ;;  %v1717_v23 = vmul.f32 1.442695, %v1714_v18  ;;  %1348 = vadd.xlane.f32.xlu1 %v1347_v7  ;;  %1470 = vadd.xlane.f32.xlu0 %v1469_v22  ;;  %v1472_v9 = vsel %vm835_vm1, %v3792_v61, 0.0 }
 0x29c   : > { %3041 = vmatprep.subr.bf16.mxu1 %v3297_v4 }
 0x29d   : > { %v3794_v59 = vpop.eup %3238  ;;  %3244 = vpow2.f32 %v1717_v23 }
 0x29e   : > { %v1594_v51 = vsel %vm835_vm1, %v3794_v59, 0.0  ;;  %3042 = vmatpush3.bf16.msra.mxu1 %v3129_v3 }
 0x29f   : > { %v3800_v54 = vpop.eup %3240  ;;  %1473 = vadd.xlane.f32.xlu1 %v1472_v9  ;;  %1595 = vadd.xlane.f32.xlu0 %v1594_v51 }
 0x2a0   : > { %v1597_v56 = vsel %vm835_vm1, %v3800_v54, 0.0  ;;  %3043 = vmatprep.subr.bf16.mxu1 %v3297_v4 }
 0x2a2   : > { %3044 = vmatpush3.bf16.msra.mxu1 %v3130_v6 }
 0x2a3   : > { %1598 = vadd.xlane.f32.xlu1 %v1597_v56  ;;  %3045 = vmatprep.subr.bf16.mxu1 %v3297_v4 }
 0x2a5   : > { %v3804_v14 = vpop.eup %3242 }
 0x2a6   : > { %v1719_v57 = vsel %vm835_vm1, %v3804_v14, 0.0  ;;  %3046 = vmatpush3.bf16.msra.mxu1 %v3131_v53 }
 0x2a7   : > { %v3808_v12 = vpop.eup %3244  ;;  %1720 = vadd.xlane.f32.xlu0 %v1719_v57  ;;  %3047 = vmatprep.subr.bf16.mxu1 %v3297_v4 }
 0x2a8   : > { %v1722_v58 = vsel %vm835_vm1, %v3808_v12, 0.0 }
 0x2a9   : > { %1723 = vadd.xlane.f32.xlu1 %v1722_v58 }
 0x2aa   : > { %3048 = vmatpush3.bf16.msra.mxu1 %v3132_v5 }
 0x2ab   : > { %3049 = vmatprep.subr.bf16.mxu1 %v3297_v4 }
 0x314   : > { %v929_v55 = vpop.xlane.xlu0 %928 }
 0x315   : > { %3246 = vrcp.f32 %v929_v55 }
 0x318   : > { %v932_v11 = vpop.xlane.xlu1 %931  ;;  %v850_v15 = vpop.xlane.xlu0 %849 }
 0x319   : > { %3248 = vrcp.f32 %v932_v11 }
 0x31c   : > { %v853_v13 = vpop.xlane.xlu1 %852  ;;  %v1096_v56 = vpop.xlane.xlu0 %1095 }
 0x31d   : > { %3250 = vrcp.f32 %v853_v13 }
 0x31e   : > { %3252 = vrcp.f32 %v850_v15 }
 0x31f   : > { %v3247_v17 = vpop.eup %3246 }
 0x320   : > { %v935_v22 = vmul.f32 %v3247_v17, %v3740_v10  ;;  %v1099_v51 = vpop.xlane.xlu1 %1098 }
 0x321   : > { %3254 = vrcp.f32 %v1099_v51 }
 0x322   : > { %3256 = vrcp.f32 %v1096_v56 }
 0x323   : > { %v3249_v18 = vpop.eup %3248 }
 0x324   : > { %v936_v23 = vmul.f32 %v3249_v18, %v3748_v21  ;;  %v1224_v26 = vpop.xlane.xlu1 %1223 }
 0x325   : > { %3258 = vrcp.f32 %v1224_v26  ;;  %v3139_v26 = vld [vmem:[%s4165_s7 + $0xc] ss:$16 sps:$4 sm:$0xff]  }
 0x326   : > { %v939_v7 = vpack.c.bf16 %v936_v23, %v935_v22 }
 0x327   : > { %v3251_v9 = vpop.eup %3250 }
 0x328   : > { %2954 = vmatmul.mubr.msk.bf16.vlgmr.msra.gmra.mrb[12].mxu0 %vm835_vm1, %v939_v7  ;;  %v3253_v57 = vpop.eup %3252  ;;  %v857_v10 = vmul.f32 %v3251_v9, %v3756_v52  ;;  %v1349_v28 = vpop.xlane.xlu1 %1348  ;;  %v3286_v9 = vld [vmem:[%s3456_s23] sm:$0xff] }
 0x329   : > { %2958 = vmatpush3.bf16.msra.mxu0 %v861_v36  ;;  %2959 = vmatprep.mubr.msk.bf16.mxu0 %vm3298_vm0, %v3297_v4  ;;  %v856_v21 = vmul.f32 %v3253_v57, %v3746_v24  ;;  %v1221_v36 = vpop.xlane.xlu0 %1220  ;;  %v3287_v57 = vld [vmem:[%s3456_s23 + $0x8] sm:$0xff] }
 0x32a   : > { %2969 = vmatprep.subr.bf16.mxu0 %v3297_v4  ;;  %3260 = vrcp.f32 %v1221_v36  ;;  %v3145_v36 = vld [vmem:[%s4165_s7 + $0x2c] ss:$16 sps:$4 sm:$0xff]  }
 0x32b   : > { %v860_v58 = vpack.c.bf16 %v857_v10, %v856_v21  ;;  %v3255_v27 = vpop.eup %3254  ;;  %3262 = vrcp.f32 %v1349_v28  ;;  %v3136_v21 = vld [vmem:[%s4165_s7 + $0x4] ss:$16 sps:$4 sm:$0xff]  }
 0x32c   : > { %v3257_v63 = vpop.eup %3256  ;;  %v1103_v52 = vmul.f32 %v3255_v27, %v3765_v60  ;;  %v1474_v32 = vpop.xlane.xlu1 %1473  ;;  %v3142_v27 = vld [vmem:[%s4165_s7 + $0x24] ss:$16 sps:$4 sm:$0xff]  }
 0x32d   : > { %v1102_v24 = vmul.f32 %v3257_v63, %v3758_v50  ;;  %v3140_v63 = vld [vmem:[%s4165_s7 + $0x20] ss:$16 sps:$4 sm:$0xff]  }
 0x32f   : > { %v1106_v62 = vpack.c.bf16 %v1103_v52, %v1102_v24  ;;  %v3259_v29 = vpop.eup %3258  ;;  %v3143_v52 = vld [vmem:[%s4165_s7 + $0x28] ss:$16 sps:$4 sm:$0xff]  }
 0x330   : > { %v1228_v60 = vmul.f32 %v3259_v29, %v3774_v25  ;;  %v1599_v35 = vpop.xlane.xlu1 %1598 }
 0x334   : > { %2960 = vmatmul.mubr.msk.bf16.vlgmr.msra.gmra.mrb[12].mxu0 %vm835_vm1, %v860_v58  ;;  %v3261_v1 = vpop.eup %3260  ;;  %v3137_v58 = vld [vmem:[%s4165_s7 + $0x8] ss:$16 sps:$4 sm:$0xff]  }
 0x335   : > { %2970 = vmatpush3.bf16.msra.mxu0 %v1107_v40  ;;  %2971 = vmatprep.mubr.msk.bf16.mxu0 %vm3298_vm0, %v3297_v4  ;;  %v1346_v40 = vpop.xlane.xlu0 %1345  ;;  %v1227_v50 = vmul.f32 %v3261_v1, %v3767_v20  ;;  %v3263_v34 = vpop.eup %3262 }
 0x336   : > { %2981 = vmatprep.subr.bf16.mxu0 %v3297_v4  ;;  %3264 = vrcp.f32 %v1346_v40  ;;  %v1353_v25 = vmul.f32 %v3263_v34, %v3783_v0  ;;  %v1724_v37 = vpop.xlane.xlu1 %1723  ;;  %v3146_v34 = vld [vmem:[%s4165_s7 + $0x40] ss:$16 sps:$4 sm:$0xff]  }
 0x337   : > { %v1231_v3 = vpack.c.bf16 %v1228_v60, %v1227_v50  ;;  %3266 = vrcp.f32 %v1474_v32  ;;  %v3151_v32 = vld [vmem:[%s4165_s7 + $0x4c] ss:$16 sps:$4 sm:$0xff]  }
 0x340   : > { %2972 = vmatmul.mubr.msk.bf16.vlgmr.msra.gmra.mrb[12].mxu0 %vm835_vm1, %v1106_v62  ;;  %v3265_v6 = vpop.eup %3264 }
 0x341   : > { %2982 = vmatpush3.bf16.msra.mxu0 %v1232_v41  ;;  %2983 = vmatprep.mubr.msk.bf16.mxu0 %vm3298_vm0, %v3297_v4  ;;  %v1471_v41 = vpop.xlane.xlu0 %1470  ;;  %v1352_v20 = vmul.f32 %v3265_v6, %v3776_v8  ;;  %v3267_v38 = vpop.eup %3266  ;;  %v3154_v6 = vld [vmem:[%s4165_s7 + $0x64] ss:$16 sps:$4 sm:$0xff]  }
 0x342   : > { %2993 = vmatprep.subr.bf16.mxu0 %v3297_v4  ;;  %3268 = vrcp.f32 %v1471_v41  ;;  %v1478_v0 = vmul.f32 %v3267_v38, %v3792_v61  ;;  %v3149_v41 = vld [vmem:[%s4165_s7 + $0x48] ss:$16 sps:$4 sm:$0xff]   ;;  %v3163_v38 = vld [vmem:[%s4165_s7 + $0x8c] ss:$16 sps:$4 sm:$0xff]  }
 0x343   : > { %v1356_v53 = vpack.c.bf16 %v1353_v25, %v1352_v20  ;;  %3270 = vrcp.f32 %v1599_v35  ;;  %v3157_v25 = vld [vmem:[%s4165_s7 + $0x6c] ss:$16 sps:$4 sm:$0xff]   ;;  %v3152_v20 = vld [vmem:[%s4165_s7 + $0x60] ss:$16 sps:$4 sm:$0xff]   ;;  %v3160_v35 = vld [vmem:[%s4165_s7 + $0x84] ss:$16 sps:$4 sm:$0xff]  }
 0x34c   : > { %2984 = vmatmul.mubr.msk.bf16.vlgmr.msra.gmra.mrb[12].mxu0 %vm835_vm1, %v1231_v3  ;;  %v3269_v5 = vpop.eup %3268  ;;  %v3148_v3 = vld [vmem:[%s4165_s7 + $0x44] ss:$16 sps:$4 sm:$0xff]  }
 0x34d   : > { %2994 = vmatpush3.bf16.msra.mxu0 %v1357_v45  ;;  %2995 = vmatprep.mubr.msk.bf16.mxu0 %vm3298_vm0, %v3297_v4  ;;  %v1596_v45 = vpop.xlane.xlu0 %1595  ;;  %v1477_v8 = vmul.f32 %v3269_v5, %v3785_v16  ;;  %v3271_v39 = vpop.eup %3270  ;;  %v3161_v5 = vld [vmem:[%s4165_s7 + $0x88] ss:$16 sps:$4 sm:$0xff]  }
 0x34e   : > { %3005 = vmatprep.subr.bf16.mxu0 %v3297_v4  ;;  %3272 = vrcp.f32 %v1596_v45  ;;  %v1603_v61 = vmul.f32 %v3271_v39, %v3800_v54  ;;  %v3158_v45 = vld [vmem:[%s4165_s7 + $0x80] ss:$16 sps:$4 sm:$0xff]   ;;  %v3172_v39 = vld [vmem:[%s4165_s7 + $0xc4] ss:$16 sps:$4 sm:$0xff]  }
 0x34f   : > { %v1481_v55 = vpack.c.bf16 %v1478_v0, %v1477_v8  ;;  %3274 = vrcp.f32 %v1724_v37  ;;  %v3166_v0 = vld [vmem:[%s4165_s7 + $0xa4] ss:$16 sps:$4 sm:$0xff]   ;;  %v3169_v8 = vld [vmem:[%s4165_s7 + $0xac] ss:$16 sps:$4 sm:$0xff]   ;;  %v3167_v37 = vld [vmem:[%s4165_s7 + $0xa8] ss:$16 sps:$4 sm:$0xff]  }
 0x358   : > { %2996 = vmatmul.mubr.msk.bf16.vlgmr.msra.gmra.mrb[12].mxu0 %vm835_vm1, %v1356_v53  ;;  %v3273_v11 = vpop.eup %3272  ;;  %v3155_v53 = vld [vmem:[%s4165_s7 + $0x68] ss:$16 sps:$4 sm:$0xff]  }
 0x359   : > { %3006 = vmatpush3.bf16.msra.mxu0 %v1482_v44  ;;  %3007 = vmatprep.mubr.msk.bf16.mxu0 %vm3298_vm0, %v3297_v4  ;;  %v1721_v44 = vpop.xlane.xlu0 %1720  ;;  %v1602_v16 = vmul.f32 %v3273_v11, %v3794_v59  ;;  %v3275_v42 = vpop.eup %3274  ;;  %v3133_v59 = vld [vmem:[%s4163_s5 + $0x38] sm:$0xff]   ;;  %v3170_v11 = vld [vmem:[%s4165_s7 + $0xc0] ss:$16 sps:$4 sm:$0xff]  }
 0x35a   : > { %3017 = vmatprep.subr.bf16.mxu0 %v3297_v4  ;;  %3276 = vrcp.f32 %v1721_v44  ;;  %3050 = vmatpush3.bf16.msra.mxu1 %v3133_v59  ;;  %v3175_v44 = vld [vmem:[%s4165_s7 + $0xcc] ss:$16 sps:$4 sm:$0xff]  }
 0x35b   : > { %v1606_v13 = vpack.c.bf16 %v1603_v61, %v1602_v16  ;;  %2193 = vmatprep.subr.bf16.mxu1 %v3139_v26  ;;  %v3173_v61 = vld [vmem:[%s4165_s7 + $0xc8] ss:$16 sps:$4 sm:$0xff]   ;;  %v3178_v16 = vld [vmem:[%s4165_s7 + $0xe4] ss:$16 sps:$4 sm:$0xff]  }
 0x35c   : > { %v3188_v26 = vld [vmem:[%s4167_s9 + $0x8] sm:$0xff]  }
 0x364   : > { %3008 = vmatmul.mubr.msk.bf16.vlgmr.msra.gmra.mrb[12].mxu0 %vm835_vm1, %v1481_v55  ;;  %v3277_v43 = vpop.eup %3276  ;;  %v3164_v55 = vld [vmem:[%s4165_s7 + $0xa0] ss:$16 sps:$4 sm:$0xff]  }
 0x365   : > { %3018 = vmatpush3.bf16.msra.mxu0 %v1607_v48  ;;  %3019 = vmatprep.mubr.msk.bf16.mxu0 %vm3298_vm0, %v3297_v4  ;;  %v1728_v48 = vmul.f32 %v3275_v42, %v3808_v12  ;;  %v1727_v15 = vmul.f32 %v3277_v43, %v3804_v14  ;;  %v2743_v14 = vld [vmem:[%s4164_s6] ss:$0 sm:$0xff]  ;;  %v3179_v43 = vld [vmem:[%s4165_s7 + $0xe8] ss:$16 sps:$4 sm:$0xff]  }
 0x366   : > { %3029 = vmatprep.subr.bf16.mxu0 %v3297_v4  ;;  %v3176_v42 = vld [vmem:[%s4165_s7 + $0xe0] ss:$16 sps:$4 sm:$0xff]  }
 0x367   : > { %v1731_v54 = vpack.c.bf16 %v1728_v48, %v1727_v15  ;;  %v3182_v48 = vld [vmem:[%s4167_s9 + $0x40] sm:$0xff]  }
 0x368   : > { %v3183_v15 = vld [vmem:[%s4167_s9 + $0xc0] sm:$0xff]  }
 0x370   : > { %3020 = vmatmul.mubr.msk.bf16.vlgmr.msra.gmra.mrb[12].mxu0 %vm835_vm1, %v1606_v13  ;;  %v3181_v13 = vld [vmem:[%s4165_s7 + $0xec] ss:$16 sps:$4 sm:$0xff]  }
 0x371   : > { %3030 = vmatpush3.bf16.msra.mxu0 %v1732_v49  ;;  %3031 = vmatprep.mubr.msk.bf16.mxu0 %vm3298_vm0, %v3297_v4 }
 0x372   : > { %2150 = vmatprep.subr.bf16.mxu0 %v3136_v21  ;;  %v3186_v21 = vld [vmem:[%s4167_s9 + $0x48] sm:$0xff]  }
 0x37c   : > { %3032 = vmatmul.mubr.msk.bf16.vlgmr.msra.gmra.mrb[12].mxu0 %vm835_vm1, %v1731_v54 }
 0x37d   : > { %2182 = vmatprep.mubr.bf16.mxu0 %v3296_v2 }
 0x44f   : > { %v1770_v46 = vpop.f32.mrb[12].mxu0 }
 0x450   : > { %v3033_v47 = vpop.f32.mrb[13].mxu0 }
 0x451   : > { %v1773_v4 = vpop.f32.mrb[14].mxu0 }
 0x452   : > { %v1795_v49 = vpack.c.bf16 %v1773_v4, %v1770_v46  ;;  %v3034_v17 = vpop.f32.mrb[15].mxu0 }
 0x454   : > { %3052 = vmatmul.mubr.bf16.vlgmr.msra.gmra.mrb[28].mxu1 %v1795_v49 }
 0x455   : > { %2225 = vmatprep.mubr.bf16.mxu1 %v3296_v2  ;;  %v3134_v2 = vld [vmem:[%s4165_s7] ss:$16 sps:$4 sm:$0xff]   ;;  %2194 = vmatpush1.bf16.msra.mxu1 %v3137_v58  ;;  %v3187_v58 = vld [vmem:[%s4167_s9 + $0xc8] sm:$0xff]  }
 0x456   : > { %2151 = vmatpush1.bf16.msra.mxu0 %v3134_v2  ;;  %2195 = vmatprep.subr.bf16.mxu1 %v3145_v36  ;;  %v3190_v36 = vld [vmem:[%s4167_s9 + $0x50] sm:$0xff]  }
 0x457   : > { %2152 = vmatprep.subr.bf16.mxu0 %v3142_v27  ;;  %v3189_v27 = vld [vmem:[%s4167_s9 + $0x88] sm:$0xff]  }
 0x459   : > { %2196 = vmatpush1.bf16.msra.mxu1 %v3143_v52  ;;  %v3192_v52 = vld [vmem:[%s4167_s9 + $0x10] sm:$0xff]  }
 0x45a   : > { %2153 = vmatpush1.bf16.msra.mxu0 %v3140_v63  ;;  %2197 = vmatprep.subr.bf16.mxu1 %v3151_v32  ;;  %v3191_v63 = vld [vmem:[%s4167_s9 + $0xd0] sm:$0xff]   ;;  %v3202_v32 = vld [vmem:[%s4167_s9 + $0x68] sm:$0xff]  }
 0x45b   : > { %2154 = vmatprep.subr.bf16.mxu0 %v3148_v3  ;;  %v3201_v3 = vld [vmem:[%s4167_s9 + $0xa0] sm:$0xff]  }
 0x45d   : > { %2198 = vmatpush1.bf16.msra.mxu1 %v3149_v41  ;;  %v3204_v41 = vld [vmem:[%s4167_s9 + $0x28] sm:$0xff]  }
 0x45e   : > { %2155 = vmatpush1.bf16.msra.mxu0 %v3146_v34  ;;  %2199 = vmatprep.subr.bf16.mxu1 %v3157_v25  ;;  %v3203_v34 = vld [vmem:[%s4167_s9 + $0xe8] sm:$0xff]   ;;  %v3206_v25 = vld [vmem:[%s4167_s9 + $0x70] sm:$0xff]  }
 0x45f   : > { %2156 = vmatprep.subr.bf16.mxu0 %v3154_v6  ;;  %v3205_v6 = vld [vmem:[%s4167_s9 + $0xa8] sm:$0xff]  }
 0x461   : > { %2200 = vmatpush1.bf16.msra.mxu1 %v3155_v53  ;;  %v3208_v53 = vld [vmem:[%s4167_s9 + $0x30] sm:$0xff]  }
 0x462   : > { %2157 = vmatpush1.bf16.msra.mxu0 %v3152_v20  ;;  %2201 = vmatprep.subr.bf16.mxu1 %v3163_v38  ;;  %v3207_v20 = vld [vmem:[%s4167_s9 + $0xf0] sm:$0xff]   ;;  %v3210_v38 = vld [vmem:[%s4167_s9 + $0x78] sm:$0xff]  }
 0x463   : > { %2158 = vmatprep.subr.bf16.mxu0 %v3160_v35  ;;  %v3209_v35 = vld [vmem:[%s4167_s9 + $0xb0] sm:$0xff]  }
 0x465   : > { %2202 = vmatpush1.bf16.msra.mxu1 %v3161_v5  ;;  %v3212_v5 = vld [vmem:[%s4167_s9 + $0x38] sm:$0xff]  }
 0x466   : > { %2159 = vmatpush1.bf16.msra.mxu0 %v3158_v45  ;;  %2203 = vmatprep.subr.bf16.mxu1 %v3169_v8  ;;  %v3211_v45 = vld [vmem:[%s4167_s9 + $0xf8] sm:$0xff]   ;;  %v1968_v8 = vld [vmem:[%s4166_s8] sm:$0xf] }
 0x467   : > { %2160 = vmatprep.subr.bf16.mxu0 %v3166_v0  ;;  %v3213_v0 = vld [vmem:[%s4167_s9 + $0xb8] sm:$0xff]  }
 0x469   : > { %2204 = vmatpush1.bf16.msra.mxu1 %v3167_v37  ;;  %v1973_v37 = vrot.slane %v1968_v8, %v550_v31 }
 0x46a   : > { %2161 = vmatpush1.bf16.msra.mxu0 %v3164_v55  ;;  %2205 = vmatprep.subr.bf16.mxu1 %v3175_v44  ;;  %v1984_v55 = vsub.s32 3, %v3488_v30 }
 0x46b   : > { %2162 = vmatprep.subr.bf16.mxu0 %v3172_v39  ;;  %v1981_v39 = vrot.slane %v1968_v8, %v558_v19 }
 0x46d   : > { %2206 = vmatpush1.bf16.msra.mxu1 %v3173_v61  ;;  %v1977_v61 = vrot.slane %v1968_v8, %v554_v33 }
 0x46e   : > { %2163 = vmatpush1.bf16.msra.mxu0 %v3170_v11  ;;  %2207 = vmatprep.subr.bf16.mxu1 %v3181_v13 }
 0x46f   : > { %2164 = vmatprep.subr.bf16.mxu0 %v3178_v16  ;;  %v1985_v16 = vrot.slane %v1968_v8, %v1984_v55 }
 0x471   : > { %2208 = vmatpush1.bf16.msra.mxu1 %v3179_v43 }
 0x472   : > { %2165 = vmatpush1.bf16.msra.mxu0 %v3176_v42  ;;  %2897 = vmatprep.subr.bf16.mxu1 %v3183_v15 }
 0x473   : > { %2875 = vmatprep.subr.bf16.mxu0 %v3182_v48 }
 0x527   : > { %v1885_v12 = vpop.f32.mrb[28].mxu1 }
 0x528   : > { %v1886_v18 = vadd.f32 %v2743_v14, %v1885_v12  ;;  %v3053_v22 = vpop.f32.mrb[29].mxu1 }
 0x529   : > { %v1888_v23 = vpop.f32.mrb[30].mxu1 }
 0x52a   : > { %v1889_v7 = vadd.f32 %v2743_v14, %v1888_v23  ;;  %v3054_v51 = vpop.f32.mrb[31].mxu1  ;;  %v1892_v56 = vadd.f32 %v3286_v9, %v1886_v18  ;;  %v2752_v14 = vld [vmem:[%s4169_s11] ss:$0 sm:$0xff] }
 0x52c   : > { %1896 = vadd.xlane.f32.xlu0 %v1892_v56  ;;  %v1893_v10 = vadd.f32 %v3287_v57, %v1889_v7  ;;  %v2753_v7 = vld [vmem:[%s4170_s12] ss:$0 sm:$0xff] }
 0x52d   : > { %v3184_v57 = vld [vmem:[%s4167_s9] sm:$0xff]  }
 0x52e   : > { %1898 = vadd.xlane.f32.xlu1 %v1893_v10 }
 0x5b9   : > { %v1897_v24 = vpop.xlane.xlu0 %1896 }
 0x5ba   : > { %v1901_v62 = vmul.f32 0.0078125, %v1897_v24  ;;  %v3193_v24 = vld [vmem:[%s4167_s9 + $0x90] sm:$0xff]  }
 0x5bb   : > { %v1899_v28 = vpop.xlane.xlu1 %1898 }
 0x5bc   : > { %v3939_v29 = vsub.f32 %v1892_v56, %v1901_v62  ;;  %v1902_v40 = vmul.f32 0.0078125, %v1899_v28  ;;  %v3194_v62 = vld [vmem:[%s4167_s9 + $0x58] sm:$0xff]  }
 0x5bd   : > { %v3195_v28 = vld [vmem:[%s4167_s9 + $0xd8] sm:$0xff]  }
 0x5be   : > { %v3941_v1 = vsub.f32 %v1893_v10, %v1902_v40  ;;  %v1905_v60 = vmul.f32 %v3939_v29, %v3939_v29  ;;  %v3185_v10 = vld [vmem:[%s4167_s9 + $0x80] sm:$0xff]   ;;  %v3197_v40 = vld [vmem:[%s4167_s9 + $0x98] sm:$0xff]  }
 0x5c0   : > { %1907 = vadd.xlane.f32.xlu0 %v1905_v60  ;;  %v1906_v50 = vmul.f32 %v3941_v1, %v3941_v1  ;;  %v3199_v60 = vld [vmem:[%s4167_s9 + $0xe0] sm:$0xff]  }
 0x5c2   : > { %1909 = vadd.xlane.f32.xlu1 %v1906_v50  ;;  %v3200_v50 = vld [vmem:[%s4167_s9 + $0x20] sm:$0xff]  }
 0x64d   : > { %v1908_v54 = vpop.xlane.xlu0 %1907 }
 0x64e   : > { %v1911_v59 = vmul.f32 0.0078125, %v1908_v54 }
 0x64f   : > { %v1910_v46 = vpop.xlane.xlu1 %1909 }
 0x650   : > { %v1913_v47 = vadd.f32 1e-05, %v1911_v59  ;;  %v1912_v4 = vmul.f32 0.0078125, %v1910_v46 }
 0x652   : > { %3278 = vrsqrt.f32 %v1913_v47  ;;  %v1914_v49 = vadd.f32 1e-05, %v1912_v4 }
 0x654   : > { %3280 = vrsqrt.f32 %v1914_v49 }
 0x65c   : > { %v3279_v17 = vpop.eup %3278 }
 0x65d   : > { %v1917_v12 = vmul.f32 %v3279_v17, %v3939_v29  ;;  %v3196_v29 = vld [vmem:[%s4167_s9 + $0x18] sm:$0xff]  }
 0x65e   : > { %v3281_v18 = vpop.eup %3280 }
 0x65f   : > { %v1918_v22 = vmul.f32 %v3281_v18, %v3941_v1  ;;  %v1925_v23 = vmul.f32 %v2752_v14, %v1917_v12  ;;  %v3198_v1 = vld [vmem:[%s4167_s9 + $0x60] sm:$0xff]  }
 0x661   : > { %v1926_v51 = vmul.f32 %v2752_v14, %v1918_v22  ;;  %v4033_v9 = vadd.f32 %v2753_v7, %v1925_v23  ;;  %v2786_v23 = vld [vmem:[%s4168_s10] ss:$0 sm:$0xff] }
 0x663   : > { %v4035_v56 = vadd.f32 %v2753_v7, %v1926_v51 }
 0x665   : > { %v1967_v2 = vpack.c.bf16 %v4035_v56, %v4033_v9 }
 0x667   : > { %2183 = vmatmul.mubr.bf16.vlgmr.msra.gmra.mrb[16].mxu0 %v1967_v2  ;;  %2226 = vmatmul.mubr.bf16.vlgmr.msra.gmra.mrb[32].mxu1 %v1967_v2 }
 0x668   : > { %2876 = vmatpush3.bf16.msra.mxu0 %v3184_v57  ;;  %2898 = vmatpush3.bf16.msra.mxu1 %v3185_v10 }
 0x669   : > { %2877 = vmatprep.subr.bf16.mxu0 %v3186_v21  ;;  %2899 = vmatprep.subr.bf16.mxu1 %v3187_v58 }
 0x66c   : > { %2878 = vmatpush3.bf16.msra.mxu0 %v3188_v26  ;;  %2900 = vmatpush3.bf16.msra.mxu1 %v3189_v27 }
 0x66d   : > { %2879 = vmatprep.subr.bf16.mxu0 %v3190_v36  ;;  %2901 = vmatprep.subr.bf16.mxu1 %v3191_v63 }
 0x670   : > { %2880 = vmatpush3.bf16.msra.mxu0 %v3192_v52  ;;  %2902 = vmatpush3.bf16.msra.mxu1 %v3193_v24 }
 0x671   : > { %2881 = vmatprep.subr.bf16.mxu0 %v3194_v62  ;;  %2903 = vmatprep.subr.bf16.mxu1 %v3195_v28 }
 0x674   : > { %2882 = vmatpush3.bf16.msra.mxu0 %v3196_v29  ;;  %2904 = vmatpush3.bf16.msra.mxu1 %v3197_v40 }
 0x675   : > { %2883 = vmatprep.subr.bf16.mxu0 %v3198_v1  ;;  %2905 = vmatprep.subr.bf16.mxu1 %v3199_v60 }
 0x678   : > { %2884 = vmatpush3.bf16.msra.mxu0 %v3200_v50  ;;  %2906 = vmatpush3.bf16.msra.mxu1 %v3201_v3 }
 0x679   : > { %2885 = vmatprep.subr.bf16.mxu0 %v3202_v32  ;;  %2907 = vmatprep.subr.bf16.mxu1 %v3203_v34 }
 0x67c   : > { %2886 = vmatpush3.bf16.msra.mxu0 %v3204_v41  ;;  %2908 = vmatpush3.bf16.msra.mxu1 %v3205_v6 }
 0x67d   : > { %2887 = vmatprep.subr.bf16.mxu0 %v3206_v25  ;;  %2909 = vmatprep.subr.bf16.mxu1 %v3207_v20 }
 0x680   : > { %2888 = vmatpush3.bf16.msra.mxu0 %v3208_v53  ;;  %2910 = vmatpush3.bf16.msra.mxu1 %v3209_v35 }
 0x681   : > { %2889 = vmatprep.subr.bf16.mxu0 %v3210_v38  ;;  %2911 = vmatprep.subr.bf16.mxu1 %v3211_v45  ;;  %v2819_v38 = vld [vmem:[%s4171_s13] ss:$0 sm:$0xff] }
 0x684   : > { %2890 = vmatpush3.bf16.msra.mxu0 %v3212_v5  ;;  %2912 = vmatpush3.bf16.msra.mxu1 %v3213_v0  ;;  %v2820_v0 = vld [vmem:[%s4172_s14] ss:$0 sm:$0xff] }
 0x73a   : > { %v2184_v44 = vpop.f32.mrb[16].mxu0  ;;  %v2227_v11 = vpop.f32.mrb[32].mxu1 }
 0x73b   : > { %v2186_v13 = vpop.f32.mrb[17].mxu0  ;;  %v2229_v42 = vpop.f32.mrb[33].mxu1  ;;  %v2185_v15 = vadd.f32 %v2184_v44, %v1973_v37  ;;  %v2228_v54 = vadd.f32 %v2227_v11, %v1981_v39 }
 0x73c   : > { %v2188_v43 = vpop.f32.mrb[18].mxu0  ;;  %v2231_v48 = vpop.f32.mrb[34].mxu1  ;;  %v2187_v31 = vadd.f32 %v2186_v13, %v1977_v61  ;;  %v2230_v49 = vadd.f32 %v2229_v42, %v1985_v16 }
 0x73d   : > { %v2189_v59 = vadd.f32 %v2188_v43, %v1973_v37  ;;  %v2232_v46 = vadd.f32 %v2231_v48, %v1981_v39  ;;  %v2190_v47 = vpop.f32.mrb[19].mxu0  ;;  %v2233_v4 = vpop.f32.mrb[35].mxu1 }
 0x73e   : > { %v2191_v17 = vadd.f32 %v2190_v47, %v1977_v61  ;;  %v2234_v19 = vadd.f32 %v2233_v4, %v1985_v16 }
 0x73f   : > { %v2300_v14 = vpack.c.bf16 %v2189_v59, %v2185_v15  ;;  %v2302_v12 = vpack.c.bf16 %v2232_v46, %v2228_v54 }
 0x740   : > { %v2301_v18 = vpack.c.bf16 %v2191_v17, %v2187_v31  ;;  %v2303_v30 = vpack.c.bf16 %v2234_v19, %v2230_v49 }
 0x742   : > { %2535 = vmatprep.mubr.bf16.mxu0 %v2301_v18  ;;  %2576 = vmatprep.mubr.bf16.mxu1 %v2303_v30 }
 0x743   : > { %2536 = vmatmul.mubr.bf16.vlgmr.msra.gmra.mrb[20].mxu0 %v2300_v14  ;;  %2577 = vmatmul.mubr.bf16.vlgmr.msra.gmra.mrb[36].mxu1 %v2302_v12 }
 0x816   : > { %v2891_v33 = vpop.f32.mrb[20].mxu0  ;;  %v2913_v22 = vpop.f32.mrb[36].mxu1 }
 0x817   : > { %v2892_v7 = vpop.f32.mrb[21].mxu0  ;;  %v2914_v51 = vpop.f32.mrb[37].mxu1 }
 0x818   : > { %v2893_v57 = vadd.f32 %v2892_v7, %v2891_v33  ;;  %v2915_v10 = vadd.f32 %v2914_v51, %v2913_v22  ;;  %v2894_v2 = vpop.f32.mrb[22].mxu0  ;;  %v2916_v21 = vpop.f32.mrb[38].mxu1 }
 0x819   : > { %v2895_v58 = vpop.f32.mrb[23].mxu0  ;;  %v2917_v26 = vpop.f32.mrb[39].mxu1 }
 0x81a   : > { %v2538_v27 = vadd.f32 %v2893_v57, %v2786_v23  ;;  %v2896_v36 = vadd.f32 %v2895_v58, %v2894_v2  ;;  %v2918_v63 = vadd.f32 %v2917_v26, %v2916_v21 }
 0x81c   : > { %v2579_v52 = vadd.f32 %v2915_v10, %v2538_v27  ;;  %v2541_v24 = vadd.f32 %v2896_v36, %v2786_v23 }
 0x81e   : > { %v2582_v62 = vadd.f32 %v2918_v63, %v2541_v24  ;;  %v2585_v28 = vadd.f32 %v2579_v52, %v4033_v9 }
 0x820   : > { %2589 = vadd.xlane.f32.xlu0 %v2585_v28  ;;  %v2586_v29 = vadd.f32 %v2582_v62, %v4035_v56 }
 0x822   : > { %2591 = vadd.xlane.f32.xlu1 %v2586_v29 }
 0x8ad   : > { %v2590_v40 = vpop.xlane.xlu0 %2589 }
 0x8ae   : > { %v2593_v1 = vmul.f32 0.0078125, %v2590_v40 }
 0x8af   : > { %v2592_v60 = vpop.xlane.xlu1 %2591 }
 0x8b0   : > { %v2595_v50 = vsub.f32 %v2585_v28, %v2593_v1  ;;  %v2594_v3 = vmul.f32 0.0078125, %v2592_v60 }
 0x8b2   : > { %v2596_v32 = vsub.f32 %v2586_v29, %v2594_v3  ;;  %v2597_v34 = vmul.f32 %v2595_v50, %v2595_v50 }
 0x8b4   : > { %2599 = vadd.xlane.f32.xlu0 %v2597_v34  ;;  %v2598_v41 = vmul.f32 %v2596_v32, %v2596_v32 }
 0x8b6   : > { %2601 = vadd.xlane.f32.xlu1 %v2598_v41 }
 0x941   : > { %v2600_v6 = vpop.xlane.xlu0 %2599 }
 0x942   : > { %v2603_v25 = vmul.f32 0.0078125, %v2600_v6 }
 0x943   : > { %v2602_v20 = vpop.xlane.xlu1 %2601 }
 0x944   : > { %v2605_v53 = vadd.f32 1e-05, %v2603_v25  ;;  %v2604_v9 = vmul.f32 0.0078125, %v2602_v20 }
 0x946   : > { %3282 = vrsqrt.f32 %v2605_v53  ;;  %v2606_v35 = vadd.f32 1e-05, %v2604_v9 }
 0x948   : > { %3284 = vrsqrt.f32 %v2606_v35 }
 0x950   : > { %v3283_v56 = vpop.eup %3282 }
 0x951   : > { %v2609_v45 = vmul.f32 %v3283_v56, %v2595_v50 }
 0x952   : > { %v3285_v5 = vpop.eup %3284 }
 0x953   : > { %v2617_v8 = vmul.f32 %v2819_v38, %v2609_v45  ;;  %v2610_v55 = vmul.f32 %v3285_v5, %v2596_v32 }
 0x955   : > { %v2625_v37 = vadd.f32 %v2820_v0, %v2617_v8  ;;  %v2618_v39 = vmul.f32 %v2819_v38, %v2610_v55 }
 0x957   : > { %2627 = vst [vmem:[%s508_s27] sm:$0xff] %v2625_v37  ;;  %v2626_v44 = vadd.f32 %v2820_v0, %v2618_v39 }
 0x959   : > { %2628 = vst [vmem:[%s508_s27 + $0x8] sm:$0xff] %v2626_v44 }
 0x95a PF: > { %s25_s18 = sadd.s32 1, %s3294_s18  }
 0x95b   : > { %p22_p4 = scmp.ge.s32.totalorder %s25_s18, 4  }
 0x95d   :  { %24 = sbr.rel (!%p22_p4) target bundleno = 1 (0x1), region = 113 }

</bundles_post_ra>
